<compile_context>
chip_gen: v5e
topology: v5e:2x2
jax: 0.10.0
libtpu: 0.0.40
codegen_flags: <defaults>
</compile_context>

<pallas_src>
import functools

import jax
import jax.numpy as jnp
from jax import lax
from jax.experimental import pallas as pl
from jax.experimental.pallas import tpu as pltpu


# Storage dtype of the hoisted gate pre-activations in HBM.
# Set to jnp.bfloat16 to halve the gates HBM traffic (loosen test tolerance).
GATES_DTYPE = jnp.float32
_VMEM_LIMIT = 48 * 1024 * 1024  # well under every generation's physical VMEM


# ------------------------ Stage 1: hoisted input projection ------------------
def _input_proj_kernel(x_ref, w_ref, b_ref, of_ref, ob_ref, *, hidden):
    """(TM, feat) @ (feat, 8H) + (1, 8H); both directions in one MXU matmul.
    The result is split along lanes into the forward / backward gate outputs
    so the recurrence can consume them without any wrapper reshuffle."""
    acc = jnp.dot(x_ref[...].astype(jnp.bfloat16), w_ref[...],
                  preferred_element_type=jnp.float32) + b_ref[...]
    h4 = 4 * hidden
    of_ref[...] = acc[:, :h4].astype(of_ref.dtype)
    ob_ref[...] = acc[:, h4:].astype(ob_ref.dtype)


def _pick_m_tile(m, feat, hidden):
    """Largest M tile that divides m and fits a conservative VMEM budget."""
    budget = 12 * 1024 * 1024
    gate_isz = jnp.dtype(GATES_DTYPE).itemsize
    for tm in (1024, 512, 256, 128, 64, 32, 16, 8):
        if m % tm != 0:
            continue
        est = (2 * tm * feat * 4                      # x block, double-buffered
               + 2 * 2 * tm * 4 * hidden * gate_isz   # two gate outputs, x2 buf
               + feat * 8 * hidden * 2                # resident bf16 weight
               + 8 * hidden * 4)                      # bias
        if est <= budget:
            return tm
    return 8                                           # m is a multiple of 8


def input_projection(x2d, w_cat, b_cat, hidden):
    """x2d: (M, feat) f32; w_cat: (feat, 8H) bf16; b_cat: (1, 8H) f32.
    Returns (gates_fwd, gates_bwd), each (M, 4H)."""
    m, feat = x2d.shape
    n8 = w_cat.shape[1]
    n4 = 4 * hidden
    tm = _pick_m_tile(m, feat, hidden)
    kernel = functools.partial(_input_proj_kernel, hidden=hidden)
    return pl.pallas_call(
        kernel,
        grid_spec=pltpu.PrefetchScalarGridSpec(
            num_scalar_prefetch=0,
            grid=(m // tm,),
            in_specs=[
                pl.BlockSpec((tm, feat), lambda i: (i, 0)),
                pl.BlockSpec((feat, n8), lambda i: (0, 0)),
                pl.BlockSpec((1, n8), lambda i: (0, 0)),
            ],
            out_specs=[
                pl.BlockSpec((tm, n4), lambda i: (i, 0)),
                pl.BlockSpec((tm, n4), lambda i: (i, 0)),
            ],
        ),
        out_shape=[
            jax.ShapeDtypeStruct((m, n4), GATES_DTYPE),
            jax.ShapeDtypeStruct((m, n4), GATES_DTYPE),
        ],
        compiler_params=pltpu.CompilerParams(
            dimension_semantics=("parallel",),
            vmem_limit_bytes=_VMEM_LIMIT),
    )(x2d, w_cat, b_cat)


# ------------------------ Stage 2: blocked recurrence kernel ------------------
def _bilstm_recurrence_kernel(gf_ref, gb_ref, whf_ref, whb_ref,
                              outf_ref, outb_ref, hn_ref, cn_ref,
                              hf_scr, cf_scr, hb_scr, cb_scr,
                              *, time_block, nblk, seq_real, hidden):
    """Grid = (time_block_index,).  Both directions are interleaved in one
    body: forward consumes gate block t in order, reverse consumes gate block
    nblk-1-t in reverse in-block order (so its outputs land un-flipped).  The
    input projection is already folded into the gate tensors; the serial
    critical path per step is only (batch, H) @ (H, 4H) + gate math, and the
    two independent chains hide each other's MXU/EUP latency."""
    t = pl.program_id(0)

    @pl.when(t == 0)
    def _():
        hf_scr[...] = jnp.zeros_like(hf_scr)
        cf_scr[...] = jnp.zeros_like(cf_scr)
        hb_scr[...] = jnp.zeros_like(hb_scr)
        cb_scr[...] = jnp.zeros_like(cb_scr)

    hf = hf_scr[...]
    cf = cf_scr[...]
    hb = hb_scr[...]
    cb = cb_scr[...]
    whf = whf_ref[...]            # (H, 4H) bf16; resident across the whole grid
    whb = whb_ref[...]
    H = hidden
    has_pad = (nblk * time_block) != seq_real

    def cell(g, c):
        i_g = jax.nn.sigmoid(g[:, 0 * H:1 * H])
        f_g = jax.nn.sigmoid(g[:, 1 * H:2 * H])
        g_g = jnp.tanh(g[:, 2 * H:3 * H])
        o_g = jax.nn.sigmoid(g[:, 3 * H:4 * H])
        c_new = f_g * c + i_g * g_g
        h_new = o_g * jnp.tanh(c_new)
        return h_new, c_new

    # Small static trip count -> fully unrolled straight-line code; all ref
    # slices are static.  (For very large batch*H switch to lax.fori_loop with
    # a small unroll factor to bound vreg pressure.)
    for i in range(time_block):
        j = time_block - 1 - i    # reverse chain walks its block backwards

        # Issue both (independent) matmuls back-to-back: single-TC ILP.
        gf = gf_ref[i].astype(jnp.float32) + jnp.dot(
            hf.astype(jnp.bfloat16), whf, preferred_element_type=jnp.float32)
        gb = gb_ref[j].astype(jnp.float32) + jnp.dot(
            hb.astype(jnp.bfloat16), whb, preferred_element_type=jnp.float32)

        hf_new, cf_new = cell(gf, cf)
        hb_new, cb_new = cell(gb, cb)

        if has_pad:
            # Freeze state on padded time steps (exact 0/1 blend).
            mf = ((t * time_block + i) < seq_real).astype(jnp.float32)
            mb = (((nblk - 1 - t) * time_block + j) < seq_real).astype(
                jnp.float32)
            hf = mf * hf_new + (1.0 - mf) * hf
            cf = mf * cf_new + (1.0 - mf) * cf
            hb = mb * hb_new + (1.0 - mb) * hb
            cb = mb * cb_new + (1.0 - mb) * cb
        else:
            hf, cf = hf_new, cf_new
            hb, cb = hb_new, cb_new

        outf_ref[i] = hf
        outb_ref[j] = hb

    hf_scr[...] = hf
    cf_scr[...] = cf
    hb_scr[...] = hb
    cb_scr[...] = cb

    # Final hidden/cell state: both chains finish on the last grid step.
    @pl.when(t == nblk - 1)
    def _():
        hn_ref[0] = hf
        hn_ref[1] = hb
        cn_ref[0] = cf
        cn_ref[1] = cb


def bilstm_pallas(inp, params, *, time_block=16):
    """inp: (seq, batch, feat) time-major f32.
    Returns (output (seq, batch, 2H), (h_n, c_n) each (2, batch, H))."""
    seq, batch, feat = inp.shape
    wih_f, whh_f, b_f, wih_b, whh_b, b_b = params
    hidden = whh_f.shape[0]

    if seq == 0:  # degenerate j == 1 case of the original module
        out = jnp.zeros((0, batch, 2 * hidden), jnp.float32)
        zeros = jnp.zeros((2, batch, hidden), jnp.float32)
        return out, (zeros, zeros)

    # --- pad batch to a sublane multiple and seq to a multiple of the block --
    batch_pad = ((batch + 7) // 8) * 8
    tb = max(1, min(time_block, seq))

    gate_isz = jnp.dtype(GATES_DTYPE).itemsize

    def _vmem_est(tb_):
        return (2 * 2 * tb_ * batch_pad * 4 * hidden * gate_isz   # gate blocks
                + 2 * 2 * tb_ * batch_pad * hidden * 4            # out blocks
                + 2 * 2 * hidden * 4 * hidden * 2                 # bf16 W_hh
                + 2 * 2 * batch_pad * hidden * 4                  # h_n / c_n
                + 4 * batch_pad * hidden * 4)                     # h/c scratch

    while tb > 1 and _vmem_est(tb) > 10 * 1024 * 1024:
        tb //= 2
    nblk = -(-seq // tb)
    seq_pad = nblk * tb

    inp_p = jnp.pad(inp, ((0, seq_pad - seq), (0, batch_pad - batch), (0, 0)))

    # --- hoisted input projection: one bf16 MXU matmul for both directions ---
    x2d = inp_p.reshape(seq_pad * batch_pad, feat)
    w_cat = jnp.concatenate([wih_f, wih_b], axis=1).astype(jnp.bfloat16)
    b_cat = jnp.concatenate([b_f, b_b], axis=1)                    # (1, 8H) f32
    gates_f, gates_b = input_projection(x2d, w_cat, b_cat, hidden)
    gates_f = gates_f.reshape(seq_pad, batch_pad, 4 * hidden)
    gates_b = gates_b.reshape(seq_pad, batch_pad, 4 * hidden)

    whh_f_b = whh_f.astype(jnp.bfloat16)
    whh_b_b = whh_b.astype(jnp.bfloat16)

    kernel = functools.partial(_bilstm_recurrence_kernel,
                               time_block=tb, nblk=nblk, seq_real=seq,
                               hidden=hidden)

    out_f, out_b, h_n, c_n = pl.pallas_call(
        kernel,
        grid_spec=pltpu.PrefetchScalarGridSpec(
            num_scalar_prefetch=0,
            grid=(nblk,),
            in_specs=[
                pl.BlockSpec((tb, batch_pad, 4 * hidden),
                             lambda t: (t, 0, 0)),
                pl.BlockSpec((tb, batch_pad, 4 * hidden),
                             lambda t: (nblk - 1 - t, 0, 0)),
                pl.BlockSpec((hidden, 4 * hidden), lambda t: (0, 0)),
                pl.BlockSpec((hidden, 4 * hidden), lambda t: (0, 0)),
            ],
            out_specs=[
                pl.BlockSpec((tb, batch_pad, hidden),
                             lambda t: (t, 0, 0)),
                pl.BlockSpec((tb, batch_pad, hidden),
                             lambda t: (nblk - 1 - t, 0, 0)),
                pl.BlockSpec((2, batch_pad, hidden), lambda t: (0, 0, 0)),
                pl.BlockSpec((2, batch_pad, hidden), lambda t: (0, 0, 0)),
            ],
            scratch_shapes=[pltpu.VMEM((batch_pad, hidden), jnp.float32)] * 4,
        ),
        out_shape=[
            jax.ShapeDtypeStruct((seq_pad, batch_pad, hidden), jnp.float32),
            jax.ShapeDtypeStruct((seq_pad, batch_pad, hidden), jnp.float32),
            jax.ShapeDtypeStruct((2, batch_pad, hidden), jnp.float32),
            jax.ShapeDtypeStruct((2, batch_pad, hidden), jnp.float32),
        ],
        compiler_params=pltpu.CompilerParams(
            dimension_semantics=("arbitrary",),
            vmem_limit_bytes=_VMEM_LIMIT),
    )(gates_f, gates_b, whh_f_b, whh_b_b)

    # Both directions are already in forward-time order; only slice off the
    # padding and join the two halves.  (For H % 128 == 0 this concat could be
    # folded into a single lane-blocked output as well.)
    output = jnp.concatenate([out_f[:seq, :batch], out_b[:seq, :batch]],
                             axis=-1)
    return output, (h_n[:, :batch], c_n[:, :batch])


# ----------------------------- pBLSTM wrapper --------------------------------
def pblstm_forward(x, params, *, time_block=16):
    """Faithful re-implementation of pBLSTM.forward (glue in plain JAX)."""
    inp = jnp.swapaxes(x, 0, 1)
    i, j, k = inp.shape
    if j == 1:
        pass
    elif j % 2 != 0:
        inp = inp[:, :j - 1, :]
        j = j - 1
    inp = inp.reshape(i, j // 2, k * 2)
    inp = jnp.swapaxes(inp, 0, 1).astype(jnp.float32)  # (j//2, i, 2k) time-major
    return bilstm_pallas(inp, params, time_block=time_block)


def init_pblstm_params(key, input_dim, hidden_dim, factor=2):
    """PyTorch nn.LSTM-style uniform(-1/sqrt(H), 1/sqrt(H)) init.
    Weights stored pre-transposed (feat, 4H) / (H, 4H); b = b_ih + b_hh.
    Weights are rounded through bf16 so the kernel's bf16 cast is exact and
    the f32 reference parity check stays tight."""
    d = input_dim * factor
    std = 1.0 / jnp.sqrt(hidden_dim)
    ks = jax.random.split(key, 8)

    def u(k, shape):
        w = jax.random.uniform(k, shape, jnp.float32, -std, std)
        return w.astype(jnp.bfloat16).astype(jnp.float32)

    wih_f = u(ks[0], (d, 4 * hidden_dim))
    whh_f = u(ks[1], (hidden_dim, 4 * hidden_dim))
    b_f = u(ks[2], (1, 4 * hidden_dim)) + u(ks[3], (1, 4 * hidden_dim))
    wih_b = u(ks[4], (d, 4 * hidden_dim))
    whh_b = u(ks[5], (hidden_dim, 4 * hidden_dim))
    b_b = u(ks[6], (1, 4 * hidden_dim)) + u(ks[7], (1, 4 * hidden_dim))
    return (wih_f, whh_f, b_f, wih_b, whh_b, b_b)


# ----------------------------- pure-JAX reference ----------------------------
def _lstm_scan_ref(xs, wih, whh, b, reverse=False):
    H = whh.shape[0]

    def step(carry, xt):
        h, c = carry
        g = xt @ wih + h @ whh + b
        i_g = jax.nn.sigmoid(g[:, :H])
        f_g = jax.nn.sigmoid(g[:, H:2 * H])
        g_g = jnp.tanh(g[:, 2 * H:3 * H])
        o_g = jax.nn.sigmoid(g[:, 3 * H:])
        c = f_g * c + i_g * g_g
        h = o_g * jnp.tanh(c)
        return (h, c), h

    init = (jnp.zeros((xs.shape[1], H), jnp.float32),
            jnp.zeros((xs.shape[1], H), jnp.float32))
    (h, c), ys = lax.scan(step, init, xs, reverse=reverse)
    return ys, h, c


def pblstm_forward_ref(x, params):
    wih_f, whh_f, b_f, wih_b, whh_b, b_b = params
    inp = jnp.swapaxes(x, 0, 1)
    i, j, k = inp.shape
    if j != 1 and j % 2 != 0:
        inp = inp[:, :j - 1, :]
        j -= 1
    inp = jnp.swapaxes(inp.reshape(i, j // 2, k * 2), 0, 1)
    yf, hf, cf = _lstm_scan_ref(inp, wih_f, whh_f, b_f, reverse=False)
    yb, hb, cb = _lstm_scan_ref(inp, wih_b, whh_b, b_b, reverse=True)
    out = jnp.concatenate([yf, yb], axis=-1)
    return out, (jnp.stack([hf, hb]), jnp.stack([cf, cb]))


# ----------------------------------- main ------------------------------------
def _check(x, params, time_block, expect_seq, expect_batch, hidden):
    fwd = jax.jit(functools.partial(pblstm_forward, time_block=time_block))
    output, (h_n, c_n) = fwd(x, params)
    jax.block_until_ready((output, h_n, c_n))
    out_ref, (hn_ref, cn_ref) = pblstm_forward_ref(x, params)
    assert output.shape == (expect_seq, expect_batch, 2 * hidden)
    assert h_n.shape == (2, expect_batch, hidden)
    assert c_n.shape == (2, expect_batch, hidden)
    assert jnp.allclose(output, out_ref, atol=3e-2, rtol=3e-2), \
        float(jnp.max(jnp.abs(output - out_ref)))
    assert jnp.allclose(h_n, hn_ref, atol=3e-2, rtol=3e-2), \
        float(jnp.max(jnp.abs(h_n - hn_ref)))
    assert jnp.allclose(c_n, cn_ref, atol=3e-2, rtol=3e-2), \
        float(jnp.max(jnp.abs(c_n - cn_ref)))
    return output, h_n, c_n


if __name__ == "__main__":
    key = jax.random.PRNGKey(0)
    k_x1, k_p1, k_x2, k_p2 = jax.random.split(key, 4)

    # x: (N, T, H1). N is the time dim (pooled by 2 inside the module),
    # T is the batch dim.

    # Config A: odd N (exercises the trim), pooled seq=15 not divisible by the
    # time block (exercises the padded/masked tail), batch=4 (batch padding).
    N, T, H1, hidden = 31, 4, 16, 32
    x = jax.random.normal(k_x1, (N, T, H1), jnp.float32)
    x = x.astype(jnp.bfloat16).astype(jnp.float32)   # bf16-exact inputs
    params = init_pblstm_params(k_p1, input_dim=H1, hidden_dim=hidden)
    _check(x, params, time_block=8, expect_seq=N // 2, expect_batch=T,
           hidden=hidden)

    # Config B: clean shapes (no seq padding, batch already a sublane multiple).
    N2, T2 = 32, 8
    x2 = jax.random.normal(k_x2, (N2, T2, H1), jnp.float32)
    x2 = x2.astype(jnp.bfloat16).astype(jnp.float32)
    params2 = init_pblstm_params(k_p2, input_dim=H1, hidden_dim=hidden)
    _check(x2, params2, time_block=16, expect_seq=N2 // 2, expect_batch=T2,
           hidden=hidden)

    print("KERNEL_OK")
</pallas_src>

<mosaic_0001>
module attributes {stable_mosaic.version = 11 : i64} {
  func.func @_input_proj_kernel(%arg0: i32, %arg1: memref<128x32xf32, #tpu.memory_space<vmem>>, %arg2: memref<32x256xbf16, #tpu.memory_space<vmem>>, %arg3: memref<1x256xf32, #tpu.memory_space<vmem>>, %arg4: memref<128x128xf32, #tpu.memory_space<vmem>>, %arg5: memref<128x128xf32, #tpu.memory_space<vmem>>) attributes {dimension_semantics = [#tpu.dimension_semantics<parallel>], iteration_bounds = array<i64: 1>, scalar_prefetch = 0 : i64, scratch_operands = 0 : i64, tpu.core_type = #tpu.core_type<tc>, window_params = [{transform_indices = @transform_0, window_bounds = array<i64: 128, 32>}, {pipeline_mode = #tpu.pipeline_mode<synchronous>, transform_indices = @transform_1, window_bounds = array<i64: 32, 256>}, {pipeline_mode = #tpu.pipeline_mode<synchronous>, transform_indices = @transform_2, window_bounds = array<i64: 1, 256>}, {transform_indices = @transform_3, window_bounds = array<i64: 128, 128>}, {transform_indices = @transform_4, window_bounds = array<i64: 128, 128>}]} {
    %c0 = arith.constant 0 : index
    %c0_0 = arith.constant 0 : index
    %0 = vector.load %arg1[%c0, %c0_0] : memref<128x32xf32, #tpu.memory_space<vmem>>, vector<128x32xf32>
    %1 = arith.truncf %0 : vector<128x32xf32> to vector<128x32xbf16>
    %c0_1 = arith.constant 0 : index
    %c0_2 = arith.constant 0 : index
    %2 = vector.load %arg2[%c0_1, %c0_2] : memref<32x256xbf16, #tpu.memory_space<vmem>>, vector<32x256xbf16>
    %cst = arith.constant dense<0.000000e+00> : vector<128x256xf32>
    %3 = tpu.matmul %1, %2, %cst {dimension_numbers = #tpu.dot_dimension_numbers<[1], [0], [0], [1], [0, 0, 1, 1], [], []>} : vector<128x32xbf16>, vector<32x256xbf16>, vector<128x256xf32> -> vector<128x256xf32>
    %c0_3 = arith.constant 0 : index
    %c0_4 = arith.constant 0 : index
    %4 = vector.load %arg3[%c0_3, %c0_4] : memref<1x256xf32, #tpu.memory_space<vmem>>, vector<1x256xf32>
    %5 = vector.broadcast %4 : vector<1x256xf32> to vector<128x256xf32>
    %6 = arith.addf %3, %5 : vector<128x256xf32>
    %7 = vector.extract_strided_slice %6 {offsets = [0, 0], sizes = [128, 128], strides = [1, 1]} : vector<128x256xf32> to vector<128x128xf32>
    %c0_5 = arith.constant 0 : index
    %c0_6 = arith.constant 0 : index
    %8 = vector.load %arg4[%c0_5, %c0_6] : memref<128x128xf32, #tpu.memory_space<vmem>>, vector<128x128xf32>
    tpu.vector_store %arg4[%c0_5, %c0_6], %7 {strides = array<i32>} : memref<128x128xf32, #tpu.memory_space<vmem>>, vector<128x128xf32>,
    %9 = vector.extract_strided_slice %6 {offsets = [0, 128], sizes = [128, 128], strides = [1, 1]} : vector<128x256xf32> to vector<128x128xf32>
    %c0_7 = arith.constant 0 : index
    %c0_8 = arith.constant 0 : index
    %10 = vector.load %arg5[%c0_7, %c0_8] : memref<128x128xf32, #tpu.memory_space<vmem>>, vector<128x128xf32>
    tpu.vector_store %arg5[%c0_7, %c0_8], %9 {strides = array<i32>} : memref<128x128xf32, #tpu.memory_space<vmem>>, vector<128x128xf32>,
    return
  }
  func.func @transform_0(%arg0: i32) -> (i32, i32) {
    %c0_i32 = arith.constant 0 : i32
    %c0_i32_0 = arith.constant 0 : i32
    return %arg0, %c0_i32 : i32, i32
  }
  func.func @transform_1(%arg0: i32) -> (i32, i32) {
    %c0_i32 = arith.constant 0 : i32
    %c0_i32_0 = arith.constant 0 : i32
    %c0_i32_1 = arith.constant 0 : i32
    return %c0_i32, %c0_i32_0 : i32, i32
  }
  func.func @transform_2(%arg0: i32) -> (i32, i32) {
    %c0_i32 = arith.constant 0 : i32
    %c0_i32_0 = arith.constant 0 : i32
    %c0_i32_1 = arith.constant 0 : i32
    return %c0_i32, %c0_i32_0 : i32, i32
  }
  func.func @transform_3(%arg0: i32) -> (i32, i32) {
    %c0_i32 = arith.constant 0 : i32
    %c0_i32_0 = arith.constant 0 : i32
    return %arg0, %c0_i32 : i32, i32
  }
  func.func @transform_4(%arg0: i32) -> (i32, i32) {
    %c0_i32 = arith.constant 0 : i32
    %c0_i32_0 = arith.constant 0 : i32
    return %arg0, %c0_i32 : i32, i32
  }
}

module attributes {stable_mosaic.version = 11 : i64} {
  func.func @_bilstm_recurrence_kernel(%arg0: i32, %arg1: memref<8x8x128xf32, #tpu.memory_space<vmem>>, %arg2: memref<8x8x128xf32, #tpu.memory_space<vmem>>, %arg3: memref<32x128xbf16, #tpu.memory_space<vmem>>, %arg4: memref<32x128xbf16, #tpu.memory_space<vmem>>, %arg5: memref<8x8x32xf32, #tpu.memory_space<vmem>>, %arg6: memref<8x8x32xf32, #tpu.memory_space<vmem>>, %arg7: memref<2x8x32xf32, #tpu.memory_space<vmem>>, %arg8: memref<2x8x32xf32, #tpu.memory_space<vmem>>, %arg9: memref<8x32xf32, #tpu.memory_space<vmem>>, %arg10: memref<8x32xf32, #tpu.memory_space<vmem>>, %arg11: memref<8x32xf32, #tpu.memory_space<vmem>>, %arg12: memref<8x32xf32, #tpu.memory_space<vmem>>) attributes {dimension_semantics = [#tpu.dimension_semantics<arbitrary>], iteration_bounds = array<i64: 2>, scalar_prefetch = 0 : i64, scratch_operands = 4 : i64, tpu.core_type = #tpu.core_type<tc>, window_params = [{transform_indices = @transform_0, window_bounds = array<i64: 8, 8, 128>}, {transform_indices = @transform_1, window_bounds = array<i64: 8, 8, 128>}, {pipeline_mode = #tpu.pipeline_mode<synchronous>, transform_indices = @transform_2, window_bounds = array<i64: 32, 128>}, {pipeline_mode = #tpu.pipeline_mode<synchronous>, transform_indices = @transform_3, window_bounds = array<i64: 32, 128>}, {transform_indices = @transform_4, window_bounds = array<i64: 8, 8, 32>}, {transform_indices = @transform_5, window_bounds = array<i64: 8, 8, 32>}, {pipeline_mode = #tpu.pipeline_mode<synchronous>, transform_indices = @transform_6, window_bounds = array<i64: 2, 8, 32>}, {pipeline_mode = #tpu.pipeline_mode<synchronous>, transform_indices = @transform_7, window_bounds = array<i64: 2, 8, 32>}]} {
    %c0_i32 = arith.constant 0 : i32
    %0 = arith.cmpi eq, %arg0, %c0_i32 : i32
    %1 = arith.extui %0 : i1 to i32
    %c0_i32_0 = arith.constant 0 : i32
    %2 = arith.cmpi ne, %1, %c0_i32_0 : i32
    scf.if %2 {
      %cst_253 = arith.constant 0.000000e+00 : f32
      %824 = vector.broadcast %cst_253 : f32 to vector<8x32xf32>
      %c0_254 = arith.constant 0 : index
      %c0_255 = arith.constant 0 : index
      %825 = vector.load %arg9[%c0_254, %c0_255] : memref<8x32xf32, #tpu.memory_space<vmem>>, vector<8x32xf32>
      tpu.vector_store %arg9[%c0_254, %c0_255], %824 {strides = array<i32>} : memref<8x32xf32, #tpu.memory_space<vmem>>, vector<8x32xf32>,
      %cst_256 = arith.constant 0.000000e+00 : f32
      %826 = vector.broadcast %cst_256 : f32 to vector<8x32xf32>
      %c0_257 = arith.constant 0 : index
      %c0_258 = arith.constant 0 : index
      %827 = vector.load %arg10[%c0_257, %c0_258] : memref<8x32xf32, #tpu.memory_space<vmem>>, vector<8x32xf32>
      tpu.vector_store %arg10[%c0_257, %c0_258], %826 {strides = array<i32>} : memref<8x32xf32, #tpu.memory_space<vmem>>, vector<8x32xf32>,
      %cst_259 = arith.constant 0.000000e+00 : f32
      %828 = vector.broadcast %cst_259 : f32 to vector<8x32xf32>
      %c0_260 = arith.constant 0 : index
      %c0_261 = arith.constant 0 : index
      %829 = vector.load %arg11[%c0_260, %c0_261] : memref<8x32xf32, #tpu.memory_space<vmem>>, vector<8x32xf32>
      tpu.vector_store %arg11[%c0_260, %c0_261], %828 {strides = array<i32>} : memref<8x32xf32, #tpu.memory_space<vmem>>, vector<8x32xf32>,
      %cst_262 = arith.constant 0.000000e+00 : f32
      %830 = vector.broadcast %cst_262 : f32 to vector<8x32xf32>
      %c0_263 = arith.constant 0 : index
      %c0_264 = arith.constant 0 : index
      %831 = vector.load %arg12[%c0_263, %c0_264] : memref<8x32xf32, #tpu.memory_space<vmem>>, vector<8x32xf32>
      tpu.vector_store %arg12[%c0_263, %c0_264], %830 {strides = array<i32>} : memref<8x32xf32, #tpu.memory_space<vmem>>, vector<8x32xf32>,
    } else {
    }
    %c0 = arith.constant 0 : index
    %c0_1 = arith.constant 0 : index
    %3 = vector.load %arg9[%c0, %c0_1] : memref<8x32xf32, #tpu.memory_space<vmem>>, vector<8x32xf32>
    %c0_2 = arith.constant 0 : index
    %c0_3 = arith.constant 0 : index
    %4 = vector.load %arg10[%c0_2, %c0_3] : memref<8x32xf32, #tpu.memory_space<vmem>>, vector<8x32xf32>
    %c0_4 = arith.constant 0 : index
    %c0_5 = arith.constant 0 : index
    %5 = vector.load %arg11[%c0_4, %c0_5] : memref<8x32xf32, #tpu.memory_space<vmem>>, vector<8x32xf32>
    %c0_6 = arith.constant 0 : index
    %c0_7 = arith.constant 0 : index
    %6 = vector.load %arg12[%c0_6, %c0_7] : memref<8x32xf32, #tpu.memory_space<vmem>>, vector<8x32xf32>
    %c0_8 = arith.constant 0 : index
    %c0_9 = arith.constant 0 : index
    %7 = vector.load %arg3[%c0_8, %c0_9] : memref<32x128xbf16, #tpu.memory_space<vmem>>, vector<32x128xbf16>
    %c0_10 = arith.constant 0 : index
    %c0_11 = arith.constant 0 : index
    %8 = vector.load %arg4[%c0_10, %c0_11] : memref<32x128xbf16, #tpu.memory_space<vmem>>, vector<32x128xbf16>
    %c0_12 = arith.constant 0 : index
    %c0_13 = arith.constant 0 : index
    %c0_14 = arith.constant 0 : index
    %9 = vector.load %arg1[%c0_12, %c0_13, %c0_14] : memref<8x8x128xf32, #tpu.memory_space<vmem>>, vector<1x8x128xf32>
    %10 = vector.shape_cast %9 : vector<1x8x128xf32> to vector<8x128xf32>
    %11 = arith.truncf %3 : vector<8x32xf32> to vector<8x32xbf16>
    %cst = arith.constant dense<0.000000e+00> : vector<8x128xf32>
    %12 = tpu.matmul %11, %7, %cst {dimension_numbers = #tpu.dot_dimension_numbers<[1], [0], [0], [1], [0, 0, 1, 1], [], []>} : vector<8x32xbf16>, vector<32x128xbf16>, vector<8x128xf32> -> vector<8x128xf32>
    %13 = arith.addf %10, %12 : vector<8x128xf32>
    %c7 = arith.constant 7 : index
    %c0_15 = arith.constant 0 : index
    %c0_16 = arith.constant 0 : index
    %14 = vector.load %arg2[%c7, %c0_15, %c0_16] : memref<8x8x128xf32, #tpu.memory_space<vmem>>, vector<1x8x128xf32>
    %15 = vector.shape_cast %14 : vector<1x8x128xf32> to vector<8x128xf32>
    %16 = arith.truncf %5 : vector<8x32xf32> to vector<8x32xbf16>
    %cst_17 = arith.constant dense<0.000000e+00> : vector<8x128xf32>
    %17 = tpu.matmul %16, %8, %cst_17 {dimension_numbers = #tpu.dot_dimension_numbers<[1], [0], [0], [1], [0, 0, 1, 1], [], []>} : vector<8x32xbf16>, vector<32x128xbf16>, vector<8x128xf32> -> vector<8x128xf32>
    %18 = arith.addf %15, %17 : vector<8x128xf32>
    %19 = vector.extract_strided_slice %13 {offsets = [0, 0], sizes = [8, 32], strides = [1, 1]} : vector<8x128xf32> to vector<8x32xf32>
    %20 = arith.negf %19 : vector<8x32xf32>
    %21 = math.exp %20 : vector<8x32xf32>
    %cst_18 = arith.constant 1.000000e+00 : f32
    %22 = vector.broadcast %cst_18 : f32 to vector<8x32xf32>
    %23 = arith.addf %22, %21 : vector<8x32xf32>
    %24 = arith.divf %22, %23 : vector<8x32xf32>
    %25 = vector.extract_strided_slice %13 {offsets = [0, 32], sizes = [8, 32], strides = [1, 1]} : vector<8x128xf32> to vector<8x32xf32>
    %26 = arith.negf %25 : vector<8x32xf32>
    %27 = math.exp %26 : vector<8x32xf32>
    %cst_19 = arith.constant 1.000000e+00 : f32
    %28 = vector.broadcast %cst_19 : f32 to vector<8x32xf32>
    %29 = arith.addf %28, %27 : vector<8x32xf32>
    %30 = arith.divf %28, %29 : vector<8x32xf32>
    %31 = vector.extract_strided_slice %13 {offsets = [0, 64], sizes = [8, 32], strides = [1, 1]} : vector<8x128xf32> to vector<8x32xf32>
    %32 = math.tanh %31 : vector<8x32xf32>
    %33 = vector.extract_strided_slice %13 {offsets = [0, 96], sizes = [8, 32], strides = [1, 1]} : vector<8x128xf32> to vector<8x32xf32>
    %34 = arith.negf %33 : vector<8x32xf32>
    %35 = math.exp %34 : vector<8x32xf32>
    %cst_20 = arith.constant 1.000000e+00 : f32
    %36 = vector.broadcast %cst_20 : f32 to vector<8x32xf32>
    %37 = arith.addf %36, %35 : vector<8x32xf32>
    %38 = arith.divf %36, %37 : vector<8x32xf32>
    %39 = arith.mulf %30, %4 : vector<8x32xf32>
    %40 = arith.mulf %24, %32 : vector<8x32xf32>
    %41 = arith.addf %39, %40 : vector<8x32xf32>
    %42 = math.tanh %41 : vector<8x32xf32>
    %43 = arith.mulf %38, %42 : vector<8x32xf32>
    %44 = vector.extract_strided_slice %18 {offsets = [0, 0], sizes = [8, 32], strides = [1, 1]} : vector<8x128xf32> to vector<8x32xf32>
    %45 = arith.negf %44 : vector<8x32xf32>
    %46 = math.exp %45 : vector<8x32xf32>
    %cst_21 = arith.constant 1.000000e+00 : f32
    %47 = vector.broadcast %cst_21 : f32 to vector<8x32xf32>
    %48 = arith.addf %47, %46 : vector<8x32xf32>
    %49 = arith.divf %47, %48 : vector<8x32xf32>
    %50 = vector.extract_strided_slice %18 {offsets = [0, 32], sizes = [8, 32], strides = [1, 1]} : vector<8x128xf32> to vector<8x32xf32>
    %51 = arith.negf %50 : vector<8x32xf32>
    %52 = math.exp %51 : vector<8x32xf32>
    %cst_22 = arith.constant 1.000000e+00 : f32
    %53 = vector.broadcast %cst_22 : f32 to vector<8x32xf32>
    %54 = arith.addf %53, %52 : vector<8x32xf32>
    %55 = arith.divf %53, %54 : vector<8x32xf32>
    %56 = vector.extract_strided_slice %18 {offsets = [0, 64], sizes = [8, 32], strides = [1, 1]} : vector<8x128xf32> to vector<8x32xf32>
    %57 = math.tanh %56 : vector<8x32xf32>
    %58 = vector.extract_strided_slice %18 {offsets = [0, 96], sizes = [8, 32], strides = [1, 1]} : vector<8x128xf32> to vector<8x32xf32>
    %59 = arith.negf %58 : vector<8x32xf32>
    %60 = math.exp %59 : vector<8x32xf32>
    %cst_23 = arith.constant 1.000000e+00 : f32
    %61 = vector.broadcast %cst_23 : f32 to vector<8x32xf32>
    %62 = arith.addf %61, %60 : vector<8x32xf32>
    %63 = arith.divf %61, %62 : vector<8x32xf32>
    %64 = arith.mulf %55, %6 : vector<8x32xf32>
    %65 = arith.mulf %49, %57 : vector<8x32xf32>
    %66 = arith.addf %64, %65 : vector<8x32xf32>
    %67 = math.tanh %66 : vector<8x32xf32>
    %68 = arith.mulf %63, %67 : vector<8x32xf32>
    %c8_i32 = arith.constant 8 : i32
    %69 = arith.muli %arg0, %c8_i32 : i32
    %c0_i32_24 = arith.constant 0 : i32
    %70 = arith.addi %69, %c0_i32_24 : i32
    %c15_i32 = arith.constant 15 : i32
    %71 = arith.cmpi slt, %70, %c15_i32 : i32
    %72 = arith.extui %71 : i1 to i32
    %73 = arith.sitofp %72 : i32 to f32
    %c1_i32 = arith.constant 1 : i32
    %74 = arith.subi %c1_i32, %arg0 : i32
    %c8_i32_25 = arith.constant 8 : i32
    %75 = arith.muli %74, %c8_i32_25 : i32
    %c7_i32 = arith.constant 7 : i32
    %76 = arith.addi %75, %c7_i32 : i32
    %c15_i32_26 = arith.constant 15 : i32
    %77 = arith.cmpi slt, %76, %c15_i32_26 : i32
    %78 = arith.extui %77 : i1 to i32
    %79 = arith.sitofp %78 : i32 to f32
    %80 = vector.broadcast %73 : f32 to vector<8x32xf32>
    %81 = arith.mulf %80, %43 : vector<8x32xf32>
    %cst_27 = arith.constant 1.000000e+00 : f32
    %82 = arith.subf %cst_27, %73 : f32
    %83 = vector.broadcast %82 : f32 to vector<8x32xf32>
    %84 = arith.mulf %83, %3 : vector<8x32xf32>
    %85 = arith.addf %81, %84 : vector<8x32xf32>
    %86 = vector.broadcast %73 : f32 to vector<8x32xf32>
    %87 = arith.mulf %86, %41 : vector<8x32xf32>
    %cst_28 = arith.constant 1.000000e+00 : f32
    %88 = arith.subf %cst_28, %73 : f32
    %89 = vector.broadcast %88 : f32 to vector<8x32xf32>
    %90 = arith.mulf %89, %4 : vector<8x32xf32>
    %91 = arith.addf %87, %90 : vector<8x32xf32>
    %92 = vector.broadcast %79 : f32 to vector<8x32xf32>
    %93 = arith.mulf %92, %68 : vector<8x32xf32>
    %cst_29 = arith.constant 1.000000e+00 : f32
    %94 = arith.subf %cst_29, %79 : f32
    %95 = vector.broadcast %94 : f32 to vector<8x32xf32>
    %96 = arith.mulf %95, %5 : vector<8x32xf32>
    %97 = arith.addf %93, %96 : vector<8x32xf32>
    %98 = vector.broadcast %79 : f32 to vector<8x32xf32>
    %99 = arith.mulf %98, %66 : vector<8x32xf32>
    %cst_30 = arith.constant 1.000000e+00 : f32
    %100 = arith.subf %cst_30, %79 : f32
    %101 = vector.broadcast %100 : f32 to vector<8x32xf32>
    %102 = arith.mulf %101, %6 : vector<8x32xf32>
    %103 = arith.addf %99, %102 : vector<8x32xf32>
    %c0_31 = arith.constant 0 : index
    %c0_32 = arith.constant 0 : index
    %c0_33 = arith.constant 0 : index
    %104 = vector.load %arg5[%c0_31, %c0_32, %c0_33] : memref<8x8x32xf32, #tpu.memory_space<vmem>>, vector<1x8x32xf32>
    %105 = vector.shape_cast %104 : vector<1x8x32xf32> to vector<8x32xf32>
    %106 = vector.shape_cast %85 : vector<8x32xf32> to vector<1x8x32xf32>
    tpu.vector_store %arg5[%c0_31, %c0_32, %c0_33], %106 {strides = array<i32>} : memref<8x8x32xf32, #tpu.memory_space<vmem>>, vector<1x8x32xf32>,
    %c7_34 = arith.constant 7 : index
    %c0_35 = arith.constant 0 : index
    %c0_36 = arith.constant 0 : index
    %107 = vector.load %arg6[%c7_34, %c0_35, %c0_36] : memref<8x8x32xf32, #tpu.memory_space<vmem>>, vector<1x8x32xf32>
    %108 = vector.shape_cast %107 : vector<1x8x32xf32> to vector<8x32xf32>
    %109 = vector.shape_cast %97 : vector<8x32xf32> to vector<1x8x32xf32>
    tpu.vector_store %arg6[%c7_34, %c0_35, %c0_36], %109 {strides = array<i32>} : memref<8x8x32xf32, #tpu.memory_space<vmem>>, vector<1x8x32xf32>,
    %c1 = arith.constant 1 : index
    %c0_37 = arith.constant 0 : index
    %c0_38 = arith.constant 0 : index
    %110 = vector.load %arg1[%c1, %c0_37, %c0_38] : memref<8x8x128xf32, #tpu.memory_space<vmem>>, vector<1x8x128xf32>
    %111 = vector.shape_cast %110 : vector<1x8x128xf32> to vector<8x128xf32>
    %112 = arith.truncf %85 : vector<8x32xf32> to vector<8x32xbf16>
    %cst_39 = arith.constant dense<0.000000e+00> : vector<8x128xf32>
    %113 = tpu.matmul %112, %7, %cst_39 {dimension_numbers = #tpu.dot_dimension_numbers<[1], [0], [0], [1], [0, 0, 1, 1], [], []>} : vector<8x32xbf16>, vector<32x128xbf16>, vector<8x128xf32> -> vector<8x128xf32>
    %114 = arith.addf %111, %113 : vector<8x128xf32>
    %c6 = arith.constant 6 : index
    %c0_40 = arith.constant 0 : index
    %c0_41 = arith.constant 0 : index
    %115 = vector.load %arg2[%c6, %c0_40, %c0_41] : memref<8x8x128xf32, #tpu.memory_space<vmem>>, vector<1x8x128xf32>
    %116 = vector.shape_cast %115 : vector<1x8x128xf32> to vector<8x128xf32>
    %117 = arith.truncf %97 : vector<8x32xf32> to vector<8x32xbf16>
    %cst_42 = arith.constant dense<0.000000e+00> : vector<8x128xf32>
    %118 = tpu.matmul %117, %8, %cst_42 {dimension_numbers = #tpu.dot_dimension_numbers<[1], [0], [0], [1], [0, 0, 1, 1], [], []>} : vector<8x32xbf16>, vector<32x128xbf16>, vector<8x128xf32> -> vector<8x128xf32>
    %119 = arith.addf %116, %118 : vector<8x128xf32>
    %120 = vector.extract_strided_slice %114 {offsets = [0, 0], sizes = [8, 32], strides = [1, 1]} : vector<8x128xf32> to vector<8x32xf32>
    %121 = arith.negf %120 : vector<8x32xf32>
    %122 = math.exp %121 : vector<8x32xf32>
    %cst_43 = arith.constant 1.000000e+00 : f32
    %123 = vector.broadcast %cst_43 : f32 to vector<8x32xf32>
    %124 = arith.addf %123, %122 : vector<8x32xf32>
    %125 = arith.divf %123, %124 : vector<8x32xf32>
    %126 = vector.extract_strided_slice %114 {offsets = [0, 32], sizes = [8, 32], strides = [1, 1]} : vector<8x128xf32> to vector<8x32xf32>
    %127 = arith.negf %126 : vector<8x32xf32>
    %128 = math.exp %127 : vector<8x32xf32>
    %cst_44 = arith.constant 1.000000e+00 : f32
    %129 = vector.broadcast %cst_44 : f32 to vector<8x32xf32>
    %130 = arith.addf %129, %128 : vector<8x32xf32>
    %131 = arith.divf %129, %130 : vector<8x32xf32>
    %132 = vector.extract_strided_slice %114 {offsets = [0, 64], sizes = [8, 32], strides = [1, 1]} : vector<8x128xf32> to vector<8x32xf32>
    %133 = math.tanh %132 : vector<8x32xf32>
    %134 = vector.extract_strided_slice %114 {offsets = [0, 96], sizes = [8, 32], strides = [1, 1]} : vector<8x128xf32> to vector<8x32xf32>
    %135 = arith.negf %134 : vector<8x32xf32>
    %136 = math.exp %135 : vector<8x32xf32>
    %cst_45 = arith.constant 1.000000e+00 : f32
    %137 = vector.broadcast %cst_45 : f32 to vector<8x32xf32>
    %138 = arith.addf %137, %136 : vector<8x32xf32>
    %139 = arith.divf %137, %138 : vector<8x32xf32>
    %140 = arith.mulf %131, %91 : vector<8x32xf32>
    %141 = arith.mulf %125, %133 : vector<8x32xf32>
    %142 = arith.addf %140, %141 : vector<8x32xf32>
    %143 = math.tanh %142 : vector<8x32xf32>
    %144 = arith.mulf %139, %143 : vector<8x32xf32>
    %145 = vector.extract_strided_slice %119 {offsets = [0, 0], sizes = [8, 32], strides = [1, 1]} : vector<8x128xf32> to vector<8x32xf32>
    %146 = arith.negf %145 : vector<8x32xf32>
    %147 = math.exp %146 : vector<8x32xf32>
    %cst_46 = arith.constant 1.000000e+00 : f32
    %148 = vector.broadcast %cst_46 : f32 to vector<8x32xf32>
    %149 = arith.addf %148, %147 : vector<8x32xf32>
    %150 = arith.divf %148, %149 : vector<8x32xf32>
    %151 = vector.extract_strided_slice %119 {offsets = [0, 32], sizes = [8, 32], strides = [1, 1]} : vector<8x128xf32> to vector<8x32xf32>
    %152 = arith.negf %151 : vector<8x32xf32>
    %153 = math.exp %152 : vector<8x32xf32>
    %cst_47 = arith.constant 1.000000e+00 : f32
    %154 = vector.broadcast %cst_47 : f32 to vector<8x32xf32>
    %155 = arith.addf %154, %153 : vector<8x32xf32>
    %156 = arith.divf %154, %155 : vector<8x32xf32>
    %157 = vector.extract_strided_slice %119 {offsets = [0, 64], sizes = [8, 32], strides = [1, 1]} : vector<8x128xf32> to vector<8x32xf32>
    %158 = math.tanh %157 : vector<8x32xf32>
    %159 = vector.extract_strided_slice %119 {offsets = [0, 96], sizes = [8, 32], strides = [1, 1]} : vector<8x128xf32> to vector<8x32xf32>
    %160 = arith.negf %159 : vector<8x32xf32>
    %161 = math.exp %160 : vector<8x32xf32>
    %cst_48 = arith.constant 1.000000e+00 : f32
    %162 = vector.broadcast %cst_48 : f32 to vector<8x32xf32>
    %163 = arith.addf %162, %161 : vector<8x32xf32>
    %164 = arith.divf %162, %163 : vector<8x32xf32>
    %165 = arith.mulf %156, %103 : vector<8x32xf32>
    %166 = arith.mulf %150, %158 : vector<8x32xf32>
    %167 = arith.addf %165, %166 : vector<8x32xf32>
    %168 = math.tanh %167 : vector<8x32xf32>
    %169 = arith.mulf %164, %168 : vector<8x32xf32>
    %c8_i32_49 = arith.constant 8 : i32
    %170 = arith.muli %arg0, %c8_i32_49 : i32
    %c1_i32_50 = arith.constant 1 : i32
    %171 = arith.addi %170, %c1_i32_50 : i32
    %c15_i32_51 = arith.constant 15 : i32
    %172 = arith.cmpi slt, %171, %c15_i32_51 : i32
    %173 = arith.extui %172 : i1 to i32
    %174 = arith.sitofp %173 : i32 to f32
    %c1_i32_52 = arith.constant 1 : i32
    %175 = arith.subi %c1_i32_52, %arg0 : i32
    %c8_i32_53 = arith.constant 8 : i32
    %176 = arith.muli %175, %c8_i32_53 : i32
    %c6_i32 = arith.constant 6 : i32
    %177 = arith.addi %176, %c6_i32 : i32
    %c15_i32_54 = arith.constant 15 : i32
    %178 = arith.cmpi slt, %177, %c15_i32_54 : i32
    %179 = arith.extui %178 : i1 to i32
    %180 = arith.sitofp %179 : i32 to f32
    %181 = vector.broadcast %174 : f32 to vector<8x32xf32>
    %182 = arith.mulf %181, %144 : vector<8x32xf32>
    %cst_55 = arith.constant 1.000000e+00 : f32
    %183 = arith.subf %cst_55, %174 : f32
    %184 = vector.broadcast %183 : f32 to vector<8x32xf32>
    %185 = arith.mulf %184, %85 : vector<8x32xf32>
    %186 = arith.addf %182, %185 : vector<8x32xf32>
    %187 = vector.broadcast %174 : f32 to vector<8x32xf32>
    %188 = arith.mulf %187, %142 : vector<8x32xf32>
    %cst_56 = arith.constant 1.000000e+00 : f32
    %189 = arith.subf %cst_56, %174 : f32
    %190 = vector.broadcast %189 : f32 to vector<8x32xf32>
    %191 = arith.mulf %190, %91 : vector<8x32xf32>
    %192 = arith.addf %188, %191 : vector<8x32xf32>
    %193 = vector.broadcast %180 : f32 to vector<8x32xf32>
    %194 = arith.mulf %193, %169 : vector<8x32xf32>
    %cst_57 = arith.constant 1.000000e+00 : f32
    %195 = arith.subf %cst_57, %180 : f32
    %196 = vector.broadcast %195 : f32 to vector<8x32xf32>
    %197 = arith.mulf %196, %97 : vector<8x32xf32>
    %198 = arith.addf %194, %197 : vector<8x32xf32>
    %199 = vector.broadcast %180 : f32 to vector<8x32xf32>
    %200 = arith.mulf %199, %167 : vector<8x32xf32>
    %cst_58 = arith.constant 1.000000e+00 : f32
    %201 = arith.subf %cst_58, %180 : f32
    %202 = vector.broadcast %201 : f32 to vector<8x32xf32>
    %203 = arith.mulf %202, %103 : vector<8x32xf32>
    %204 = arith.addf %200, %203 : vector<8x32xf32>
    %c1_59 = arith.constant 1 : index
    %c0_60 = arith.constant 0 : index
    %c0_61 = arith.constant 0 : index
    %205 = vector.load %arg5[%c1_59, %c0_60, %c0_61] : memref<8x8x32xf32, #tpu.memory_space<vmem>>, vector<1x8x32xf32>
    %206 = vector.shape_cast %205 : vector<1x8x32xf32> to vector<8x32xf32>
    %207 = vector.shape_cast %186 : vector<8x32xf32> to vector<1x8x32xf32>
    tpu.vector_store %arg5[%c1_59, %c0_60, %c0_61], %207 {strides = array<i32>} : memref<8x8x32xf32, #tpu.memory_space<vmem>>, vector<1x8x32xf32>,
    %c6_62 = arith.constant 6 : index
    %c0_63 = arith.constant 0 : index
    %c0_64 = arith.constant 0 : index
    %208 = vector.load %arg6[%c6_62, %c0_63, %c0_64] : memref<8x8x32xf32, #tpu.memory_space<vmem>>, vector<1x8x32xf32>
    %209 = vector.shape_cast %208 : vector<1x8x32xf32> to vector<8x32xf32>
    %210 = vector.shape_cast %198 : vector<8x32xf32> to vector<1x8x32xf32>
    tpu.vector_store %arg6[%c6_62, %c0_63, %c0_64], %210 {strides = array<i32>} : memref<8x8x32xf32, #tpu.memory_space<vmem>>, vector<1x8x32xf32>,
    %c2 = arith.constant 2 : index
    %c0_65 = arith.constant 0 : index
    %c0_66 = arith.constant 0 : index
    %211 = vector.load %arg1[%c2, %c0_65, %c0_66] : memref<8x8x128xf32, #tpu.memory_space<vmem>>, vector<1x8x128xf32>
    %212 = vector.shape_cast %211 : vector<1x8x128xf32> to vector<8x128xf32>
    %213 = arith.truncf %186 : vector<8x32xf32> to vector<8x32xbf16>
    %cst_67 = arith.constant dense<0.000000e+00> : vector<8x128xf32>
    %214 = tpu.matmul %213, %7, %cst_67 {dimension_numbers = #tpu.dot_dimension_numbers<[1], [0], [0], [1], [0, 0, 1, 1], [], []>} : vector<8x32xbf16>, vector<32x128xbf16>, vector<8x128xf32> -> vector<8x128xf32>
    %215 = arith.addf %212, %214 : vector<8x128xf32>
    %c5 = arith.constant 5 : index
    %c0_68 = arith.constant 0 : index
    %c0_69 = arith.constant 0 : index
    %216 = vector.load %arg2[%c5, %c0_68, %c0_69] : memref<8x8x128xf32, #tpu.memory_space<vmem>>, vector<1x8x128xf32>
    %217 = vector.shape_cast %216 : vector<1x8x128xf32> to vector<8x128xf32>
    %218 = arith.truncf %198 : vector<8x32xf32> to vector<8x32xbf16>
    %cst_70 = arith.constant dense<0.000000e+00> : vector<8x128xf32>
    %219 = tpu.matmul %218, %8, %cst_70 {dimension_numbers = #tpu.dot_dimension_numbers<[1], [0], [0], [1], [0, 0, 1, 1], [], []>} : vector<8x32xbf16>, vector<32x128xbf16>, vector<8x128xf32> -> vector<8x128xf32>
    %220 = arith.addf %217, %219 : vector<8x128xf32>
    %221 = vector.extract_strided_slice %215 {offsets = [0, 0], sizes = [8, 32], strides = [1, 1]} : vector<8x128xf32> to vector<8x32xf32>
    %222 = arith.negf %221 : vector<8x32xf32>
    %223 = math.exp %222 : vector<8x32xf32>
    %cst_71 = arith.constant 1.000000e+00 : f32
    %224 = vector.broadcast %cst_71 : f32 to vector<8x32xf32>
    %225 = arith.addf %224, %223 : vector<8x32xf32>
    %226 = arith.divf %224, %225 : vector<8x32xf32>
    %227 = vector.extract_strided_slice %215 {offsets = [0, 32], sizes = [8, 32], strides = [1, 1]} : vector<8x128xf32> to vector<8x32xf32>
    %228 = arith.negf %227 : vector<8x32xf32>
    %229 = math.exp %228 : vector<8x32xf32>
    %cst_72 = arith.constant 1.000000e+00 : f32
    %230 = vector.broadcast %cst_72 : f32 to vector<8x32xf32>
    %231 = arith.addf %230, %229 : vector<8x32xf32>
    %232 = arith.divf %230, %231 : vector<8x32xf32>
    %233 = vector.extract_strided_slice %215 {offsets = [0, 64], sizes = [8, 32], strides = [1, 1]} : vector<8x128xf32> to vector<8x32xf32>
    %234 = math.tanh %233 : vector<8x32xf32>
    %235 = vector.extract_strided_slice %215 {offsets = [0, 96], sizes = [8, 32], strides = [1, 1]} : vector<8x128xf32> to vector<8x32xf32>
    %236 = arith.negf %235 : vector<8x32xf32>
    %237 = math.exp %236 : vector<8x32xf32>
    %cst_73 = arith.constant 1.000000e+00 : f32
    %238 = vector.broadcast %cst_73 : f32 to vector<8x32xf32>
    %239 = arith.addf %238, %237 : vector<8x32xf32>
    %240 = arith.divf %238, %239 : vector<8x32xf32>
    %241 = arith.mulf %232, %192 : vector<8x32xf32>
    %242 = arith.mulf %226, %234 : vector<8x32xf32>
    %243 = arith.addf %241, %242 : vector<8x32xf32>
    %244 = math.tanh %243 : vector<8x32xf32>
    %245 = arith.mulf %240, %244 : vector<8x32xf32>
    %246 = vector.extract_strided_slice %220 {offsets = [0, 0], sizes = [8, 32], strides = [1, 1]} : vector<8x128xf32> to vector<8x32xf32>
    %247 = arith.negf %246 : vector<8x32xf32>
    %248 = math.exp %247 : vector<8x32xf32>
    %cst_74 = arith.constant 1.000000e+00 : f32
    %249 = vector.broadcast %cst_74 : f32 to vector<8x32xf32>
    %250 = arith.addf %249, %248 : vector<8x32xf32>
    %251 = arith.divf %249, %250 : vector<8x32xf32>
    %252 = vector.extract_strided_slice %220 {offsets = [0, 32], sizes = [8, 32], strides = [1, 1]} : vector<8x128xf32> to vector<8x32xf32>
    %253 = arith.negf %252 : vector<8x32xf32>
    %254 = math.exp %253 : vector<8x32xf32>
    %cst_75 = arith.constant 1.000000e+00 : f32
    %255 = vector.broadcast %cst_75 : f32 to vector<8x32xf32>
    %256 = arith.addf %255, %254 : vector<8x32xf32>
    %257 = arith.divf %255, %256 : vector<8x32xf32>
    %258 = vector.extract_strided_slice %220 {offsets = [0, 64], sizes = [8, 32], strides = [1, 1]} : vector<8x128xf32> to vector<8x32xf32>
    %259 = math.tanh %258 : vector<8x32xf32>
    %260 = vector.extract_strided_slice %220 {offsets = [0, 96], sizes = [8, 32], strides = [1, 1]} : vector<8x128xf32> to vector<8x32xf32>
    %261 = arith.negf %260 : vector<8x32xf32>
    %262 = math.exp %261 : vector<8x32xf32>
    %cst_76 = arith.constant 1.000000e+00 : f32
    %263 = vector.broadcast %cst_76 : f32 to vector<8x32xf32>
    %264 = arith.addf %263, %262 : vector<8x32xf32>
    %265 = arith.divf %263, %264 : vector<8x32xf32>
    %266 = arith.mulf %257, %204 : vector<8x32xf32>
    %267 = arith.mulf %251, %259 : vector<8x32xf32>
    %268 = arith.addf %266, %267 : vector<8x32xf32>
    %269 = math.tanh %268 : vector<8x32xf32>
    %270 = arith.mulf %265, %269 : vector<8x32xf32>
    %c8_i32_77 = arith.constant 8 : i32
    %271 = arith.muli %arg0, %c8_i32_77 : i32
    %c2_i32 = arith.constant 2 : i32
    %272 = arith.addi %271, %c2_i32 : i32
    %c15_i32_78 = arith.constant 15 : i32
    %273 = arith.cmpi slt, %272, %c15_i32_78 : i32
    %274 = arith.extui %273 : i1 to i32
    %275 = arith.sitofp %274 : i32 to f32
    %c1_i32_79 = arith.constant 1 : i32
    %276 = arith.subi %c1_i32_79, %arg0 : i32
    %c8_i32_80 = arith.constant 8 : i32
    %277 = arith.muli %276, %c8_i32_80 : i32
    %c5_i32 = arith.constant 5 : i32
    %278 = arith.addi %277, %c5_i32 : i32
    %c15_i32_81 = arith.constant 15 : i32
    %279 = arith.cmpi slt, %278, %c15_i32_81 : i32
    %280 = arith.extui %279 : i1 to i32
    %281 = arith.sitofp %280 : i32 to f32
    %282 = vector.broadcast %275 : f32 to vector<8x32xf32>
    %283 = arith.mulf %282, %245 : vector<8x32xf32>
    %cst_82 = arith.constant 1.000000e+00 : f32
    %284 = arith.subf %cst_82, %275 : f32
    %285 = vector.broadcast %284 : f32 to vector<8x32xf32>
    %286 = arith.mulf %285, %186 : vector<8x32xf32>
    %287 = arith.addf %283, %286 : vector<8x32xf32>
    %288 = vector.broadcast %275 : f32 to vector<8x32xf32>
    %289 = arith.mulf %288, %243 : vector<8x32xf32>
    %cst_83 = arith.constant 1.000000e+00 : f32
    %290 = arith.subf %cst_83, %275 : f32
    %291 = vector.broadcast %290 : f32 to vector<8x32xf32>
    %292 = arith.mulf %291, %192 : vector<8x32xf32>
    %293 = arith.addf %289, %292 : vector<8x32xf32>
    %294 = vector.broadcast %281 : f32 to vector<8x32xf32>
    %295 = arith.mulf %294, %270 : vector<8x32xf32>
    %cst_84 = arith.constant 1.000000e+00 : f32
    %296 = arith.subf %cst_84, %281 : f32
    %297 = vector.broadcast %296 : f32 to vector<8x32xf32>
    %298 = arith.mulf %297, %198 : vector<8x32xf32>
    %299 = arith.addf %295, %298 : vector<8x32xf32>
    %300 = vector.broadcast %281 : f32 to vector<8x32xf32>
    %301 = arith.mulf %300, %268 : vector<8x32xf32>
    %cst_85 = arith.constant 1.000000e+00 : f32
    %302 = arith.subf %cst_85, %281 : f32
    %303 = vector.broadcast %302 : f32 to vector<8x32xf32>
    %304 = arith.mulf %303, %204 : vector<8x32xf32>
    %305 = arith.addf %301, %304 : vector<8x32xf32>
    %c2_86 = arith.constant 2 : index
    %c0_87 = arith.constant 0 : index
    %c0_88 = arith.constant 0 : index
    %306 = vector.load %arg5[%c2_86, %c0_87, %c0_88] : memref<8x8x32xf32, #tpu.memory_space<vmem>>, vector<1x8x32xf32>
    %307 = vector.shape_cast %306 : vector<1x8x32xf32> to vector<8x32xf32>
    %308 = vector.shape_cast %287 : vector<8x32xf32> to vector<1x8x32xf32>
    tpu.vector_store %arg5[%c2_86, %c0_87, %c0_88], %308 {strides = array<i32>} : memref<8x8x32xf32, #tpu.memory_space<vmem>>, vector<1x8x32xf32>,
    %c5_89 = arith.constant 5 : index
    %c0_90 = arith.constant 0 : index
    %c0_91 = arith.constant 0 : index
    %309 = vector.load %arg6[%c5_89, %c0_90, %c0_91] : memref<8x8x32xf32, #tpu.memory_space<vmem>>, vector<1x8x32xf32>
    %310 = vector.shape_cast %309 : vector<1x8x32xf32> to vector<8x32xf32>
    %311 = vector.shape_cast %299 : vector<8x32xf32> to vector<1x8x32xf32>
    tpu.vector_store %arg6[%c5_89, %c0_90, %c0_91], %311 {strides = array<i32>} : memref<8x8x32xf32, #tpu.memory_space<vmem>>, vector<1x8x32xf32>,
    %c3 = arith.constant 3 : index
    %c0_92 = arith.constant 0 : index
    %c0_93 = arith.constant 0 : index
    %312 = vector.load %arg1[%c3, %c0_92, %c0_93] : memref<8x8x128xf32, #tpu.memory_space<vmem>>, vector<1x8x128xf32>
    %313 = vector.shape_cast %312 : vector<1x8x128xf32> to vector<8x128xf32>
    %314 = arith.truncf %287 : vector<8x32xf32> to vector<8x32xbf16>
    %cst_94 = arith.constant dense<0.000000e+00> : vector<8x128xf32>
    %315 = tpu.matmul %314, %7, %cst_94 {dimension_numbers = #tpu.dot_dimension_numbers<[1], [0], [0], [1], [0, 0, 1, 1], [], []>} : vector<8x32xbf16>, vector<32x128xbf16>, vector<8x128xf32> -> vector<8x128xf32>
    %316 = arith.addf %313, %315 : vector<8x128xf32>
    %c4 = arith.constant 4 : index
    %c0_95 = arith.constant 0 : index
    %c0_96 = arith.constant 0 : index
    %317 = vector.load %arg2[%c4, %c0_95, %c0_96] : memref<8x8x128xf32, #tpu.memory_space<vmem>>, vector<1x8x128xf32>
    %318 = vector.shape_cast %317 : vector<1x8x128xf32> to vector<8x128xf32>
    %319 = arith.truncf %299 : vector<8x32xf32> to vector<8x32xbf16>
    %cst_97 = arith.constant dense<0.000000e+00> : vector<8x128xf32>
    %320 = tpu.matmul %319, %8, %cst_97 {dimension_numbers = #tpu.dot_dimension_numbers<[1], [0], [0], [1], [0, 0, 1, 1], [], []>} : vector<8x32xbf16>, vector<32x128xbf16>, vector<8x128xf32> -> vector<8x128xf32>
    %321 = arith.addf %318, %320 : vector<8x128xf32>
    %322 = vector.extract_strided_slice %316 {offsets = [0, 0], sizes = [8, 32], strides = [1, 1]} : vector<8x128xf32> to vector<8x32xf32>
    %323 = arith.negf %322 : vector<8x32xf32>
    %324 = math.exp %323 : vector<8x32xf32>
    %cst_98 = arith.constant 1.000000e+00 : f32
    %325 = vector.broadcast %cst_98 : f32 to vector<8x32xf32>
    %326 = arith.addf %325, %324 : vector<8x32xf32>
    %327 = arith.divf %325, %326 : vector<8x32xf32>
    %328 = vector.extract_strided_slice %316 {offsets = [0, 32], sizes = [8, 32], strides = [1, 1]} : vector<8x128xf32> to vector<8x32xf32>
    %329 = arith.negf %328 : vector<8x32xf32>
    %330 = math.exp %329 : vector<8x32xf32>
    %cst_99 = arith.constant 1.000000e+00 : f32
    %331 = vector.broadcast %cst_99 : f32 to vector<8x32xf32>
    %332 = arith.addf %331, %330 : vector<8x32xf32>
    %333 = arith.divf %331, %332 : vector<8x32xf32>
    %334 = vector.extract_strided_slice %316 {offsets = [0, 64], sizes = [8, 32], strides = [1, 1]} : vector<8x128xf32> to vector<8x32xf32>
    %335 = math.tanh %334 : vector<8x32xf32>
    %336 = vector.extract_strided_slice %316 {offsets = [0, 96], sizes = [8, 32], strides = [1, 1]} : vector<8x128xf32> to vector<8x32xf32>
    %337 = arith.negf %336 : vector<8x32xf32>
    %338 = math.exp %337 : vector<8x32xf32>
    %cst_100 = arith.constant 1.000000e+00 : f32
    %339 = vector.broadcast %cst_100 : f32 to vector<8x32xf32>
    %340 = arith.addf %339, %338 : vector<8x32xf32>
    %341 = arith.divf %339, %340 : vector<8x32xf32>
    %342 = arith.mulf %333, %293 : vector<8x32xf32>
    %343 = arith.mulf %327, %335 : vector<8x32xf32>
    %344 = arith.addf %342, %343 : vector<8x32xf32>
    %345 = math.tanh %344 : vector<8x32xf32>
    %346 = arith.mulf %341, %345 : vector<8x32xf32>
    %347 = vector.extract_strided_slice %321 {offsets = [0, 0], sizes = [8, 32], strides = [1, 1]} : vector<8x128xf32> to vector<8x32xf32>
    %348 = arith.negf %347 : vector<8x32xf32>
    %349 = math.exp %348 : vector<8x32xf32>
    %cst_101 = arith.constant 1.000000e+00 : f32
    %350 = vector.broadcast %cst_101 : f32 to vector<8x32xf32>
    %351 = arith.addf %350, %349 : vector<8x32xf32>
    %352 = arith.divf %350, %351 : vector<8x32xf32>
    %353 = vector.extract_strided_slice %321 {offsets = [0, 32], sizes = [8, 32], strides = [1, 1]} : vector<8x128xf32> to vector<8x32xf32>
    %354 = arith.negf %353 : vector<8x32xf32>
    %355 = math.exp %354 : vector<8x32xf32>
    %cst_102 = arith.constant 1.000000e+00 : f32
    %356 = vector.broadcast %cst_102 : f32 to vector<8x32xf32>
    %357 = arith.addf %356, %355 : vector<8x32xf32>
    %358 = arith.divf %356, %357 : vector<8x32xf32>
    %359 = vector.extract_strided_slice %321 {offsets = [0, 64], sizes = [8, 32], strides = [1, 1]} : vector<8x128xf32> to vector<8x32xf32>
    %360 = math.tanh %359 : vector<8x32xf32>
    %361 = vector.extract_strided_slice %321 {offsets = [0, 96], sizes = [8, 32], strides = [1, 1]} : vector<8x128xf32> to vector<8x32xf32>
    %362 = arith.negf %361 : vector<8x32xf32>
    %363 = math.exp %362 : vector<8x32xf32>
    %cst_103 = arith.constant 1.000000e+00 : f32
    %364 = vector.broadcast %cst_103 : f32 to vector<8x32xf32>
    %365 = arith.addf %364, %363 : vector<8x32xf32>
    %366 = arith.divf %364, %365 : vector<8x32xf32>
    %367 = arith.mulf %358, %305 : vector<8x32xf32>
    %368 = arith.mulf %352, %360 : vector<8x32xf32>
    %369 = arith.addf %367, %368 : vector<8x32xf32>
    %370 = math.tanh %369 : vector<8x32xf32>
    %371 = arith.mulf %366, %370 : vector<8x32xf32>
    %c8_i32_104 = arith.constant 8 : i32
    %372 = arith.muli %arg0, %c8_i32_104 : i32
    %c3_i32 = arith.constant 3 : i32
    %373 = arith.addi %372, %c3_i32 : i32
    %c15_i32_105 = arith.constant 15 : i32
    %374 = arith.cmpi slt, %373, %c15_i32_105 : i32
    %375 = arith.extui %374 : i1 to i32
    %376 = arith.sitofp %375 : i32 to f32
    %c1_i32_106 = arith.constant 1 : i32
    %377 = arith.subi %c1_i32_106, %arg0 : i32
    %c8_i32_107 = arith.constant 8 : i32
    %378 = arith.muli %377, %c8_i32_107 : i32
    %c4_i32 = arith.constant 4 : i32
    %379 = arith.addi %378, %c4_i32 : i32
    %c15_i32_108 = arith.constant 15 : i32
    %380 = arith.cmpi slt, %379, %c15_i32_108 : i32
    %381 = arith.extui %380 : i1 to i32
    %382 = arith.sitofp %381 : i32 to f32
    %383 = vector.broadcast %376 : f32 to vector<8x32xf32>
    %384 = arith.mulf %383, %346 : vector<8x32xf32>
    %cst_109 = arith.constant 1.000000e+00 : f32
    %385 = arith.subf %cst_109, %376 : f32
    %386 = vector.broadcast %385 : f32 to vector<8x32xf32>
    %387 = arith.mulf %386, %287 : vector<8x32xf32>
    %388 = arith.addf %384, %387 : vector<8x32xf32>
    %389 = vector.broadcast %376 : f32 to vector<8x32xf32>
    %390 = arith.mulf %389, %344 : vector<8x32xf32>
    %cst_110 = arith.constant 1.000000e+00 : f32
    %391 = arith.subf %cst_110, %376 : f32
    %392 = vector.broadcast %391 : f32 to vector<8x32xf32>
    %393 = arith.mulf %392, %293 : vector<8x32xf32>
    %394 = arith.addf %390, %393 : vector<8x32xf32>
    %395 = vector.broadcast %382 : f32 to vector<8x32xf32>
    %396 = arith.mulf %395, %371 : vector<8x32xf32>
    %cst_111 = arith.constant 1.000000e+00 : f32
    %397 = arith.subf %cst_111, %382 : f32
    %398 = vector.broadcast %397 : f32 to vector<8x32xf32>
    %399 = arith.mulf %398, %299 : vector<8x32xf32>
    %400 = arith.addf %396, %399 : vector<8x32xf32>
    %401 = vector.broadcast %382 : f32 to vector<8x32xf32>
    %402 = arith.mulf %401, %369 : vector<8x32xf32>
    %cst_112 = arith.constant 1.000000e+00 : f32
    %403 = arith.subf %cst_112, %382 : f32
    %404 = vector.broadcast %403 : f32 to vector<8x32xf32>
    %405 = arith.mulf %404, %305 : vector<8x32xf32>
    %406 = arith.addf %402, %405 : vector<8x32xf32>
    %c3_113 = arith.constant 3 : index
    %c0_114 = arith.constant 0 : index
    %c0_115 = arith.constant 0 : index
    %407 = vector.load %arg5[%c3_113, %c0_114, %c0_115] : memref<8x8x32xf32, #tpu.memory_space<vmem>>, vector<1x8x32xf32>
    %408 = vector.shape_cast %407 : vector<1x8x32xf32> to vector<8x32xf32>
    %409 = vector.shape_cast %388 : vector<8x32xf32> to vector<1x8x32xf32>
    tpu.vector_store %arg5[%c3_113, %c0_114, %c0_115], %409 {strides = array<i32>} : memref<8x8x32xf32, #tpu.memory_space<vmem>>, vector<1x8x32xf32>,
    %c4_116 = arith.constant 4 : index
    %c0_117 = arith.constant 0 : index
    %c0_118 = arith.constant 0 : index
    %410 = vector.load %arg6[%c4_116, %c0_117, %c0_118] : memref<8x8x32xf32, #tpu.memory_space<vmem>>, vector<1x8x32xf32>
    %411 = vector.shape_cast %410 : vector<1x8x32xf32> to vector<8x32xf32>
    %412 = vector.shape_cast %400 : vector<8x32xf32> to vector<1x8x32xf32>
    tpu.vector_store %arg6[%c4_116, %c0_117, %c0_118], %412 {strides = array<i32>} : memref<8x8x32xf32, #tpu.memory_space<vmem>>, vector<1x8x32xf32>,
    %c4_119 = arith.constant 4 : index
    %c0_120 = arith.constant 0 : index
    %c0_121 = arith.constant 0 : index
    %413 = vector.load %arg1[%c4_119, %c0_120, %c0_121] : memref<8x8x128xf32, #tpu.memory_space<vmem>>, vector<1x8x128xf32>
    %414 = vector.shape_cast %413 : vector<1x8x128xf32> to vector<8x128xf32>
    %415 = arith.truncf %388 : vector<8x32xf32> to vector<8x32xbf16>
    %cst_122 = arith.constant dense<0.000000e+00> : vector<8x128xf32>
    %416 = tpu.matmul %415, %7, %cst_122 {dimension_numbers = #tpu.dot_dimension_numbers<[1], [0], [0], [1], [0, 0, 1, 1], [], []>} : vector<8x32xbf16>, vector<32x128xbf16>, vector<8x128xf32> -> vector<8x128xf32>
    %417 = arith.addf %414, %416 : vector<8x128xf32>
    %c3_123 = arith.constant 3 : index
    %c0_124 = arith.constant 0 : index
    %c0_125 = arith.constant 0 : index
    %418 = vector.load %arg2[%c3_123, %c0_124, %c0_125] : memref<8x8x128xf32, #tpu.memory_space<vmem>>, vector<1x8x128xf32>
    %419 = vector.shape_cast %418 : vector<1x8x128xf32> to vector<8x128xf32>
    %420 = arith.truncf %400 : vector<8x32xf32> to vector<8x32xbf16>
    %cst_126 = arith.constant dense<0.000000e+00> : vector<8x128xf32>
    %421 = tpu.matmul %420, %8, %cst_126 {dimension_numbers = #tpu.dot_dimension_numbers<[1], [0], [0], [1], [0, 0, 1, 1], [], []>} : vector<8x32xbf16>, vector<32x128xbf16>, vector<8x128xf32> -> vector<8x128xf32>
    %422 = arith.addf %419, %421 : vector<8x128xf32>
    %423 = vector.extract_strided_slice %417 {offsets = [0, 0], sizes = [8, 32], strides = [1, 1]} : vector<8x128xf32> to vector<8x32xf32>
    %424 = arith.negf %423 : vector<8x32xf32>
    %425 = math.exp %424 : vector<8x32xf32>
    %cst_127 = arith.constant 1.000000e+00 : f32
    %426 = vector.broadcast %cst_127 : f32 to vector<8x32xf32>
    %427 = arith.addf %426, %425 : vector<8x32xf32>
    %428 = arith.divf %426, %427 : vector<8x32xf32>
    %429 = vector.extract_strided_slice %417 {offsets = [0, 32], sizes = [8, 32], strides = [1, 1]} : vector<8x128xf32> to vector<8x32xf32>
    %430 = arith.negf %429 : vector<8x32xf32>
    %431 = math.exp %430 : vector<8x32xf32>
    %cst_128 = arith.constant 1.000000e+00 : f32
    %432 = vector.broadcast %cst_128 : f32 to vector<8x32xf32>
    %433 = arith.addf %432, %431 : vector<8x32xf32>
    %434 = arith.divf %432, %433 : vector<8x32xf32>
    %435 = vector.extract_strided_slice %417 {offsets = [0, 64], sizes = [8, 32], strides = [1, 1]} : vector<8x128xf32> to vector<8x32xf32>
    %436 = math.tanh %435 : vector<8x32xf32>
    %437 = vector.extract_strided_slice %417 {offsets = [0, 96], sizes = [8, 32], strides = [1, 1]} : vector<8x128xf32> to vector<8x32xf32>
    %438 = arith.negf %437 : vector<8x32xf32>
    %439 = math.exp %438 : vector<8x32xf32>
    %cst_129 = arith.constant 1.000000e+00 : f32
    %440 = vector.broadcast %cst_129 : f32 to vector<8x32xf32>
    %441 = arith.addf %440, %439 : vector<8x32xf32>
    %442 = arith.divf %440, %441 : vector<8x32xf32>
    %443 = arith.mulf %434, %394 : vector<8x32xf32>
    %444 = arith.mulf %428, %436 : vector<8x32xf32>
    %445 = arith.addf %443, %444 : vector<8x32xf32>
    %446 = math.tanh %445 : vector<8x32xf32>
    %447 = arith.mulf %442, %446 : vector<8x32xf32>
    %448 = vector.extract_strided_slice %422 {offsets = [0, 0], sizes = [8, 32], strides = [1, 1]} : vector<8x128xf32> to vector<8x32xf32>
    %449 = arith.negf %448 : vector<8x32xf32>
    %450 = math.exp %449 : vector<8x32xf32>
    %cst_130 = arith.constant 1.000000e+00 : f32
    %451 = vector.broadcast %cst_130 : f32 to vector<8x32xf32>
    %452 = arith.addf %451, %450 : vector<8x32xf32>
    %453 = arith.divf %451, %452 : vector<8x32xf32>
    %454 = vector.extract_strided_slice %422 {offsets = [0, 32], sizes = [8, 32], strides = [1, 1]} : vector<8x128xf32> to vector<8x32xf32>
    %455 = arith.negf %454 : vector<8x32xf32>
    %456 = math.exp %455 : vector<8x32xf32>
    %cst_131 = arith.constant 1.000000e+00 : f32
    %457 = vector.broadcast %cst_131 : f32 to vector<8x32xf32>
    %458 = arith.addf %457, %456 : vector<8x32xf32>
    %459 = arith.divf %457, %458 : vector<8x32xf32>
    %460 = vector.extract_strided_slice %422 {offsets = [0, 64], sizes = [8, 32], strides = [1, 1]} : vector<8x128xf32> to vector<8x32xf32>
    %461 = math.tanh %460 : vector<8x32xf32>
    %462 = vector.extract_strided_slice %422 {offsets = [0, 96], sizes = [8, 32], strides = [1, 1]} : vector<8x128xf32> to vector<8x32xf32>
    %463 = arith.negf %462 : vector<8x32xf32>
    %464 = math.exp %463 : vector<8x32xf32>
    %cst_132 = arith.constant 1.000000e+00 : f32
    %465 = vector.broadcast %cst_132 : f32 to vector<8x32xf32>
    %466 = arith.addf %465, %464 : vector<8x32xf32>
    %467 = arith.divf %465, %466 : vector<8x32xf32>
    %468 = arith.mulf %459, %406 : vector<8x32xf32>
    %469 = arith.mulf %453, %461 : vector<8x32xf32>
    %470 = arith.addf %468, %469 : vector<8x32xf32>
    %471 = math.tanh %470 : vector<8x32xf32>
    %472 = arith.mulf %467, %471 : vector<8x32xf32>
    %c8_i32_133 = arith.constant 8 : i32
    %473 = arith.muli %arg0, %c8_i32_133 : i32
    %c4_i32_134 = arith.constant 4 : i32
    %474 = arith.addi %473, %c4_i32_134 : i32
    %c15_i32_135 = arith.constant 15 : i32
    %475 = arith.cmpi slt, %474, %c15_i32_135 : i32
    %476 = arith.extui %475 : i1 to i32
    %477 = arith.sitofp %476 : i32 to f32
    %c1_i32_136 = arith.constant 1 : i32
    %478 = arith.subi %c1_i32_136, %arg0 : i32
    %c8_i32_137 = arith.constant 8 : i32
    %479 = arith.muli %478, %c8_i32_137 : i32
    %c3_i32_138 = arith.constant 3 : i32
    %480 = arith.addi %479, %c3_i32_138 : i32
    %c15_i32_139 = arith.constant 15 : i32
    %481 = arith.cmpi slt, %480, %c15_i32_139 : i32
    %482 = arith.extui %481 : i1 to i32
    %483 = arith.sitofp %482 : i32 to f32
    %484 = vector.broadcast %477 : f32 to vector<8x32xf32>
    %485 = arith.mulf %484, %447 : vector<8x32xf32>
    %cst_140 = arith.constant 1.000000e+00 : f32
    %486 = arith.subf %cst_140, %477 : f32
    %487 = vector.broadcast %486 : f32 to vector<8x32xf32>
    %488 = arith.mulf %487, %388 : vector<8x32xf32>
    %489 = arith.addf %485, %488 : vector<8x32xf32>
    %490 = vector.broadcast %477 : f32 to vector<8x32xf32>
    %491 = arith.mulf %490, %445 : vector<8x32xf32>
    %cst_141 = arith.constant 1.000000e+00 : f32
    %492 = arith.subf %cst_141, %477 : f32
    %493 = vector.broadcast %492 : f32 to vector<8x32xf32>
    %494 = arith.mulf %493, %394 : vector<8x32xf32>
    %495 = arith.addf %491, %494 : vector<8x32xf32>
    %496 = vector.broadcast %483 : f32 to vector<8x32xf32>
    %497 = arith.mulf %496, %472 : vector<8x32xf32>
    %cst_142 = arith.constant 1.000000e+00 : f32
    %498 = arith.subf %cst_142, %483 : f32
    %499 = vector.broadcast %498 : f32 to vector<8x32xf32>
    %500 = arith.mulf %499, %400 : vector<8x32xf32>
    %501 = arith.addf %497, %500 : vector<8x32xf32>
    %502 = vector.broadcast %483 : f32 to vector<8x32xf32>
    %503 = arith.mulf %502, %470 : vector<8x32xf32>
    %cst_143 = arith.constant 1.000000e+00 : f32
    %504 = arith.subf %cst_143, %483 : f32
    %505 = vector.broadcast %504 : f32 to vector<8x32xf32>
    %506 = arith.mulf %505, %406 : vector<8x32xf32>
    %507 = arith.addf %503, %506 : vector<8x32xf32>
    %c4_144 = arith.constant 4 : index
    %c0_145 = arith.constant 0 : index
    %c0_146 = arith.constant 0 : index
    %508 = vector.load %arg5[%c4_144, %c0_145, %c0_146] : memref<8x8x32xf32, #tpu.memory_space<vmem>>, vector<1x8x32xf32>
    %509 = vector.shape_cast %508 : vector<1x8x32xf32> to vector<8x32xf32>
    %510 = vector.shape_cast %489 : vector<8x32xf32> to vector<1x8x32xf32>
    tpu.vector_store %arg5[%c4_144, %c0_145, %c0_146], %510 {strides = array<i32>} : memref<8x8x32xf32, #tpu.memory_space<vmem>>, vector<1x8x32xf32>,
    %c3_147 = arith.constant 3 : index
    %c0_148 = arith.constant 0 : index
    %c0_149 = arith.constant 0 : index
    %511 = vector.load %arg6[%c3_147, %c0_148, %c0_149] : memref<8x8x32xf32, #tpu.memory_space<vmem>>, vector<1x8x32xf32>
    %512 = vector.shape_cast %511 : vector<1x8x32xf32> to vector<8x32xf32>
    %513 = vector.shape_cast %501 : vector<8x32xf32> to vector<1x8x32xf32>
    tpu.vector_store %arg6[%c3_147, %c0_148, %c0_149], %513 {strides = array<i32>} : memref<8x8x32xf32, #tpu.memory_space<vmem>>, vector<1x8x32xf32>,
    %c5_150 = arith.constant 5 : index
    %c0_151 = arith.constant 0 : index
    %c0_152 = arith.constant 0 : index
    %514 = vector.load %arg1[%c5_150, %c0_151, %c0_152] : memref<8x8x128xf32, #tpu.memory_space<vmem>>, vector<1x8x128xf32>
    %515 = vector.shape_cast %514 : vector<1x8x128xf32> to vector<8x128xf32>
    %516 = arith.truncf %489 : vector<8x32xf32> to vector<8x32xbf16>
    %cst_153 = arith.constant dense<0.000000e+00> : vector<8x128xf32>
    %517 = tpu.matmul %516, %7, %cst_153 {dimension_numbers = #tpu.dot_dimension_numbers<[1], [0], [0], [1], [0, 0, 1, 1], [], []>} : vector<8x32xbf16>, vector<32x128xbf16>, vector<8x128xf32> -> vector<8x128xf32>
    %518 = arith.addf %515, %517 : vector<8x128xf32>
    %c2_154 = arith.constant 2 : index
    %c0_155 = arith.constant 0 : index
    %c0_156 = arith.constant 0 : index
    %519 = vector.load %arg2[%c2_154, %c0_155, %c0_156] : memref<8x8x128xf32, #tpu.memory_space<vmem>>, vector<1x8x128xf32>
    %520 = vector.shape_cast %519 : vector<1x8x128xf32> to vector<8x128xf32>
    %521 = arith.truncf %501 : vector<8x32xf32> to vector<8x32xbf16>
    %cst_157 = arith.constant dense<0.000000e+00> : vector<8x128xf32>
    %522 = tpu.matmul %521, %8, %cst_157 {dimension_numbers = #tpu.dot_dimension_numbers<[1], [0], [0], [1], [0, 0, 1, 1], [], []>} : vector<8x32xbf16>, vector<32x128xbf16>, vector<8x128xf32> -> vector<8x128xf32>
    %523 = arith.addf %520, %522 : vector<8x128xf32>
    %524 = vector.extract_strided_slice %518 {offsets = [0, 0], sizes = [8, 32], strides = [1, 1]} : vector<8x128xf32> to vector<8x32xf32>
    %525 = arith.negf %524 : vector<8x32xf32>
    %526 = math.exp %525 : vector<8x32xf32>
    %cst_158 = arith.constant 1.000000e+00 : f32
    %527 = vector.broadcast %cst_158 : f32 to vector<8x32xf32>
    %528 = arith.addf %527, %526 : vector<8x32xf32>
    %529 = arith.divf %527, %528 : vector<8x32xf32>
    %530 = vector.extract_strided_slice %518 {offsets = [0, 32], sizes = [8, 32], strides = [1, 1]} : vector<8x128xf32> to vector<8x32xf32>
    %531 = arith.negf %530 : vector<8x32xf32>
    %532 = math.exp %531 : vector<8x32xf32>
    %cst_159 = arith.constant 1.000000e+00 : f32
    %533 = vector.broadcast %cst_159 : f32 to vector<8x32xf32>
    %534 = arith.addf %533, %532 : vector<8x32xf32>
    %535 = arith.divf %533, %534 : vector<8x32xf32>
    %536 = vector.extract_strided_slice %518 {offsets = [0, 64], sizes = [8, 32], strides = [1, 1]} : vector<8x128xf32> to vector<8x32xf32>
    %537 = math.tanh %536 : vector<8x32xf32>
    %538 = vector.extract_strided_slice %518 {offsets = [0, 96], sizes = [8, 32], strides = [1, 1]} : vector<8x128xf32> to vector<8x32xf32>
    %539 = arith.negf %538 : vector<8x32xf32>
    %540 = math.exp %539 : vector<8x32xf32>
    %cst_160 = arith.constant 1.000000e+00 : f32
    %541 = vector.broadcast %cst_160 : f32 to vector<8x32xf32>
    %542 = arith.addf %541, %540 : vector<8x32xf32>
    %543 = arith.divf %541, %542 : vector<8x32xf32>
    %544 = arith.mulf %535, %495 : vector<8x32xf32>
    %545 = arith.mulf %529, %537 : vector<8x32xf32>
    %546 = arith.addf %544, %545 : vector<8x32xf32>
    %547 = math.tanh %546 : vector<8x32xf32>
    %548 = arith.mulf %543, %547 : vector<8x32xf32>
    %549 = vector.extract_strided_slice %523 {offsets = [0, 0], sizes = [8, 32], strides = [1, 1]} : vector<8x128xf32> to vector<8x32xf32>
    %550 = arith.negf %549 : vector<8x32xf32>
    %551 = math.exp %550 : vector<8x32xf32>
    %cst_161 = arith.constant 1.000000e+00 : f32
    %552 = vector.broadcast %cst_161 : f32 to vector<8x32xf32>
    %553 = arith.addf %552, %551 : vector<8x32xf32>
    %554 = arith.divf %552, %553 : vector<8x32xf32>
    %555 = vector.extract_strided_slice %523 {offsets = [0, 32], sizes = [8, 32], strides = [1, 1]} : vector<8x128xf32> to vector<8x32xf32>
    %556 = arith.negf %555 : vector<8x32xf32>
    %557 = math.exp %556 : vector<8x32xf32>
    %cst_162 = arith.constant 1.000000e+00 : f32
    %558 = vector.broadcast %cst_162 : f32 to vector<8x32xf32>
    %559 = arith.addf %558, %557 : vector<8x32xf32>
    %560 = arith.divf %558, %559 : vector<8x32xf32>
    %561 = vector.extract_strided_slice %523 {offsets = [0, 64], sizes = [8, 32], strides = [1, 1]} : vector<8x128xf32> to vector<8x32xf32>
    %562 = math.tanh %561 : vector<8x32xf32>
    %563 = vector.extract_strided_slice %523 {offsets = [0, 96], sizes = [8, 32], strides = [1, 1]} : vector<8x128xf32> to vector<8x32xf32>
    %564 = arith.negf %563 : vector<8x32xf32>
    %565 = math.exp %564 : vector<8x32xf32>
    %cst_163 = arith.constant 1.000000e+00 : f32
    %566 = vector.broadcast %cst_163 : f32 to vector<8x32xf32>
    %567 = arith.addf %566, %565 : vector<8x32xf32>
    %568 = arith.divf %566, %567 : vector<8x32xf32>
    %569 = arith.mulf %560, %507 : vector<8x32xf32>
    %570 = arith.mulf %554, %562 : vector<8x32xf32>
    %571 = arith.addf %569, %570 : vector<8x32xf32>
    %572 = math.tanh %571 : vector<8x32xf32>
    %573 = arith.mulf %568, %572 : vector<8x32xf32>
    %c8_i32_164 = arith.constant 8 : i32
    %574 = arith.muli %arg0, %c8_i32_164 : i32
    %c5_i32_165 = arith.constant 5 : i32
    %575 = arith.addi %574, %c5_i32_165 : i32
    %c15_i32_166 = arith.constant 15 : i32
    %576 = arith.cmpi slt, %575, %c15_i32_166 : i32
    %577 = arith.extui %576 : i1 to i32
    %578 = arith.sitofp %577 : i32 to f32
    %c1_i32_167 = arith.constant 1 : i32
    %579 = arith.subi %c1_i32_167, %arg0 : i32
    %c8_i32_168 = arith.constant 8 : i32
    %580 = arith.muli %579, %c8_i32_168 : i32
    %c2_i32_169 = arith.constant 2 : i32
    %581 = arith.addi %580, %c2_i32_169 : i32
    %c15_i32_170 = arith.constant 15 : i32
    %582 = arith.cmpi slt, %581, %c15_i32_170 : i32
    %583 = arith.extui %582 : i1 to i32
    %584 = arith.sitofp %583 : i32 to f32
    %585 = vector.broadcast %578 : f32 to vector<8x32xf32>
    %586 = arith.mulf %585, %548 : vector<8x32xf32>
    %cst_171 = arith.constant 1.000000e+00 : f32
    %587 = arith.subf %cst_171, %578 : f32
    %588 = vector.broadcast %587 : f32 to vector<8x32xf32>
    %589 = arith.mulf %588, %489 : vector<8x32xf32>
    %590 = arith.addf %586, %589 : vector<8x32xf32>
    %591 = vector.broadcast %578 : f32 to vector<8x32xf32>
    %592 = arith.mulf %591, %546 : vector<8x32xf32>
    %cst_172 = arith.constant 1.000000e+00 : f32
    %593 = arith.subf %cst_172, %578 : f32
    %594 = vector.broadcast %593 : f32 to vector<8x32xf32>
    %595 = arith.mulf %594, %495 : vector<8x32xf32>
    %596 = arith.addf %592, %595 : vector<8x32xf32>
    %597 = vector.broadcast %584 : f32 to vector<8x32xf32>
    %598 = arith.mulf %597, %573 : vector<8x32xf32>
    %cst_173 = arith.constant 1.000000e+00 : f32
    %599 = arith.subf %cst_173, %584 : f32
    %600 = vector.broadcast %599 : f32 to vector<8x32xf32>
    %601 = arith.mulf %600, %501 : vector<8x32xf32>
    %602 = arith.addf %598, %601 : vector<8x32xf32>
    %603 = vector.broadcast %584 : f32 to vector<8x32xf32>
    %604 = arith.mulf %603, %571 : vector<8x32xf32>
    %cst_174 = arith.constant 1.000000e+00 : f32
    %605 = arith.subf %cst_174, %584 : f32
    %606 = vector.broadcast %605 : f32 to vector<8x32xf32>
    %607 = arith.mulf %606, %507 : vector<8x32xf32>
    %608 = arith.addf %604, %607 : vector<8x32xf32>
    %c5_175 = arith.constant 5 : index
    %c0_176 = arith.constant 0 : index
    %c0_177 = arith.constant 0 : index
    %609 = vector.load %arg5[%c5_175, %c0_176, %c0_177] : memref<8x8x32xf32, #tpu.memory_space<vmem>>, vector<1x8x32xf32>
    %610 = vector.shape_cast %609 : vector<1x8x32xf32> to vector<8x32xf32>
    %611 = vector.shape_cast %590 : vector<8x32xf32> to vector<1x8x32xf32>
    tpu.vector_store %arg5[%c5_175, %c0_176, %c0_177], %611 {strides = array<i32>} : memref<8x8x32xf32, #tpu.memory_space<vmem>>, vector<1x8x32xf32>,
    %c2_178 = arith.constant 2 : index
    %c0_179 = arith.constant 0 : index
    %c0_180 = arith.constant 0 : index
    %612 = vector.load %arg6[%c2_178, %c0_179, %c0_180] : memref<8x8x32xf32, #tpu.memory_space<vmem>>, vector<1x8x32xf32>
    %613 = vector.shape_cast %612 : vector<1x8x32xf32> to vector<8x32xf32>
    %614 = vector.shape_cast %602 : vector<8x32xf32> to vector<1x8x32xf32>
    tpu.vector_store %arg6[%c2_178, %c0_179, %c0_180], %614 {strides = array<i32>} : memref<8x8x32xf32, #tpu.memory_space<vmem>>, vector<1x8x32xf32>,
    %c6_181 = arith.constant 6 : index
    %c0_182 = arith.constant 0 : index
    %c0_183 = arith.constant 0 : index
    %615 = vector.load %arg1[%c6_181, %c0_182, %c0_183] : memref<8x8x128xf32, #tpu.memory_space<vmem>>, vector<1x8x128xf32>
    %616 = vector.shape_cast %615 : vector<1x8x128xf32> to vector<8x128xf32>
    %617 = arith.truncf %590 : vector<8x32xf32> to vector<8x32xbf16>
    %cst_184 = arith.constant dense<0.000000e+00> : vector<8x128xf32>
    %618 = tpu.matmul %617, %7, %cst_184 {dimension_numbers = #tpu.dot_dimension_numbers<[1], [0], [0], [1], [0, 0, 1, 1], [], []>} : vector<8x32xbf16>, vector<32x128xbf16>, vector<8x128xf32> -> vector<8x128xf32>
    %619 = arith.addf %616, %618 : vector<8x128xf32>
    %c1_185 = arith.constant 1 : index
    %c0_186 = arith.constant 0 : index
    %c0_187 = arith.constant 0 : index
    %620 = vector.load %arg2[%c1_185, %c0_186, %c0_187] : memref<8x8x128xf32, #tpu.memory_space<vmem>>, vector<1x8x128xf32>
    %621 = vector.shape_cast %620 : vector<1x8x128xf32> to vector<8x128xf32>
    %622 = arith.truncf %602 : vector<8x32xf32> to vector<8x32xbf16>
    %cst_188 = arith.constant dense<0.000000e+00> : vector<8x128xf32>
    %623 = tpu.matmul %622, %8, %cst_188 {dimension_numbers = #tpu.dot_dimension_numbers<[1], [0], [0], [1], [0, 0, 1, 1], [], []>} : vector<8x32xbf16>, vector<32x128xbf16>, vector<8x128xf32> -> vector<8x128xf32>
    %624 = arith.addf %621, %623 : vector<8x128xf32>
    %625 = vector.extract_strided_slice %619 {offsets = [0, 0], sizes = [8, 32], strides = [1, 1]} : vector<8x128xf32> to vector<8x32xf32>
    %626 = arith.negf %625 : vector<8x32xf32>
    %627 = math.exp %626 : vector<8x32xf32>
    %cst_189 = arith.constant 1.000000e+00 : f32
    %628 = vector.broadcast %cst_189 : f32 to vector<8x32xf32>
    %629 = arith.addf %628, %627 : vector<8x32xf32>
    %630 = arith.divf %628, %629 : vector<8x32xf32>
    %631 = vector.extract_strided_slice %619 {offsets = [0, 32], sizes = [8, 32], strides = [1, 1]} : vector<8x128xf32> to vector<8x32xf32>
    %632 = arith.negf %631 : vector<8x32xf32>
    %633 = math.exp %632 : vector<8x32xf32>
    %cst_190 = arith.constant 1.000000e+00 : f32
    %634 = vector.broadcast %cst_190 : f32 to vector<8x32xf32>
    %635 = arith.addf %634, %633 : vector<8x32xf32>
    %636 = arith.divf %634, %635 : vector<8x32xf32>
    %637 = vector.extract_strided_slice %619 {offsets = [0, 64], sizes = [8, 32], strides = [1, 1]} : vector<8x128xf32> to vector<8x32xf32>
    %638 = math.tanh %637 : vector<8x32xf32>
    %639 = vector.extract_strided_slice %619 {offsets = [0, 96], sizes = [8, 32], strides = [1, 1]} : vector<8x128xf32> to vector<8x32xf32>
    %640 = arith.negf %639 : vector<8x32xf32>
    %641 = math.exp %640 : vector<8x32xf32>
    %cst_191 = arith.constant 1.000000e+00 : f32
    %642 = vector.broadcast %cst_191 : f32 to vector<8x32xf32>
    %643 = arith.addf %642, %641 : vector<8x32xf32>
    %644 = arith.divf %642, %643 : vector<8x32xf32>
    %645 = arith.mulf %636, %596 : vector<8x32xf32>
    %646 = arith.mulf %630, %638 : vector<8x32xf32>
    %647 = arith.addf %645, %646 : vector<8x32xf32>
    %648 = math.tanh %647 : vector<8x32xf32>
    %649 = arith.mulf %644, %648 : vector<8x32xf32>
    %650 = vector.extract_strided_slice %624 {offsets = [0, 0], sizes = [8, 32], strides = [1, 1]} : vector<8x128xf32> to vector<8x32xf32>
    %651 = arith.negf %650 : vector<8x32xf32>
    %652 = math.exp %651 : vector<8x32xf32>
    %cst_192 = arith.constant 1.000000e+00 : f32
    %653 = vector.broadcast %cst_192 : f32 to vector<8x32xf32>
    %654 = arith.addf %653, %652 : vector<8x32xf32>
    %655 = arith.divf %653, %654 : vector<8x32xf32>
    %656 = vector.extract_strided_slice %624 {offsets = [0, 32], sizes = [8, 32], strides = [1, 1]} : vector<8x128xf32> to vector<8x32xf32>
    %657 = arith.negf %656 : vector<8x32xf32>
    %658 = math.exp %657 : vector<8x32xf32>
    %cst_193 = arith.constant 1.000000e+00 : f32
    %659 = vector.broadcast %cst_193 : f32 to vector<8x32xf32>
    %660 = arith.addf %659, %658 : vector<8x32xf32>
    %661 = arith.divf %659, %660 : vector<8x32xf32>
    %662 = vector.extract_strided_slice %624 {offsets = [0, 64], sizes = [8, 32], strides = [1, 1]} : vector<8x128xf32> to vector<8x32xf32>
    %663 = math.tanh %662 : vector<8x32xf32>
    %664 = vector.extract_strided_slice %624 {offsets = [0, 96], sizes = [8, 32], strides = [1, 1]} : vector<8x128xf32> to vector<8x32xf32>
    %665 = arith.negf %664 : vector<8x32xf32>
    %666 = math.exp %665 : vector<8x32xf32>
    %cst_194 = arith.constant 1.000000e+00 : f32
    %667 = vector.broadcast %cst_194 : f32 to vector<8x32xf32>
    %668 = arith.addf %667, %666 : vector<8x32xf32>
    %669 = arith.divf %667, %668 : vector<8x32xf32>
    %670 = arith.mulf %661, %608 : vector<8x32xf32>
    %671 = arith.mulf %655, %663 : vector<8x32xf32>
    %672 = arith.addf %670, %671 : vector<8x32xf32>
    %673 = math.tanh %672 : vector<8x32xf32>
    %674 = arith.mulf %669, %673 : vector<8x32xf32>
    %c8_i32_195 = arith.constant 8 : i32
    %675 = arith.muli %arg0, %c8_i32_195 : i32
    %c6_i32_196 = arith.constant 6 : i32
    %676 = arith.addi %675, %c6_i32_196 : i32
    %c15_i32_197 = arith.constant 15 : i32
    %677 = arith.cmpi slt, %676, %c15_i32_197 : i32
    %678 = arith.extui %677 : i1 to i32
    %679 = arith.sitofp %678 : i32 to f32
    %c1_i32_198 = arith.constant 1 : i32
    %680 = arith.subi %c1_i32_198, %arg0 : i32
    %c8_i32_199 = arith.constant 8 : i32
    %681 = arith.muli %680, %c8_i32_199 : i32
    %c1_i32_200 = arith.constant 1 : i32
    %682 = arith.addi %681, %c1_i32_200 : i32
    %c15_i32_201 = arith.constant 15 : i32
    %683 = arith.cmpi slt, %682, %c15_i32_201 : i32
    %684 = arith.extui %683 : i1 to i32
    %685 = arith.sitofp %684 : i32 to f32
    %686 = vector.broadcast %679 : f32 to vector<8x32xf32>
    %687 = arith.mulf %686, %649 : vector<8x32xf32>
    %cst_202 = arith.constant 1.000000e+00 : f32
    %688 = arith.subf %cst_202, %679 : f32
    %689 = vector.broadcast %688 : f32 to vector<8x32xf32>
    %690 = arith.mulf %689, %590 : vector<8x32xf32>
    %691 = arith.addf %687, %690 : vector<8x32xf32>
    %692 = vector.broadcast %679 : f32 to vector<8x32xf32>
    %693 = arith.mulf %692, %647 : vector<8x32xf32>
    %cst_203 = arith.constant 1.000000e+00 : f32
    %694 = arith.subf %cst_203, %679 : f32
    %695 = vector.broadcast %694 : f32 to vector<8x32xf32>
    %696 = arith.mulf %695, %596 : vector<8x32xf32>
    %697 = arith.addf %693, %696 : vector<8x32xf32>
    %698 = vector.broadcast %685 : f32 to vector<8x32xf32>
    %699 = arith.mulf %698, %674 : vector<8x32xf32>
    %cst_204 = arith.constant 1.000000e+00 : f32
    %700 = arith.subf %cst_204, %685 : f32
    %701 = vector.broadcast %700 : f32 to vector<8x32xf32>
    %702 = arith.mulf %701, %602 : vector<8x32xf32>
    %703 = arith.addf %699, %702 : vector<8x32xf32>
    %704 = vector.broadcast %685 : f32 to vector<8x32xf32>
    %705 = arith.mulf %704, %672 : vector<8x32xf32>
    %cst_205 = arith.constant 1.000000e+00 : f32
    %706 = arith.subf %cst_205, %685 : f32
    %707 = vector.broadcast %706 : f32 to vector<8x32xf32>
    %708 = arith.mulf %707, %608 : vector<8x32xf32>
    %709 = arith.addf %705, %708 : vector<8x32xf32>
    %c6_206 = arith.constant 6 : index
    %c0_207 = arith.constant 0 : index
    %c0_208 = arith.constant 0 : index
    %710 = vector.load %arg5[%c6_206, %c0_207, %c0_208] : memref<8x8x32xf32, #tpu.memory_space<vmem>>, vector<1x8x32xf32>
    %711 = vector.shape_cast %710 : vector<1x8x32xf32> to vector<8x32xf32>
    %712 = vector.shape_cast %691 : vector<8x32xf32> to vector<1x8x32xf32>
    tpu.vector_store %arg5[%c6_206, %c0_207, %c0_208], %712 {strides = array<i32>} : memref<8x8x32xf32, #tpu.memory_space<vmem>>, vector<1x8x32xf32>,
    %c1_209 = arith.constant 1 : index
    %c0_210 = arith.constant 0 : index
    %c0_211 = arith.constant 0 : index
    %713 = vector.load %arg6[%c1_209, %c0_210, %c0_211] : memref<8x8x32xf32, #tpu.memory_space<vmem>>, vector<1x8x32xf32>
    %714 = vector.shape_cast %713 : vector<1x8x32xf32> to vector<8x32xf32>
    %715 = vector.shape_cast %703 : vector<8x32xf32> to vector<1x8x32xf32>
    tpu.vector_store %arg6[%c1_209, %c0_210, %c0_211], %715 {strides = array<i32>} : memref<8x8x32xf32, #tpu.memory_space<vmem>>, vector<1x8x32xf32>,
    %c7_212 = arith.constant 7 : index
    %c0_213 = arith.constant 0 : index
    %c0_214 = arith.constant 0 : index
    %716 = vector.load %arg1[%c7_212, %c0_213, %c0_214] : memref<8x8x128xf32, #tpu.memory_space<vmem>>, vector<1x8x128xf32>
    %717 = vector.shape_cast %716 : vector<1x8x128xf32> to vector<8x128xf32>
    %718 = arith.truncf %691 : vector<8x32xf32> to vector<8x32xbf16>
    %cst_215 = arith.constant dense<0.000000e+00> : vector<8x128xf32>
    %719 = tpu.matmul %718, %7, %cst_215 {dimension_numbers = #tpu.dot_dimension_numbers<[1], [0], [0], [1], [0, 0, 1, 1], [], []>} : vector<8x32xbf16>, vector<32x128xbf16>, vector<8x128xf32> -> vector<8x128xf32>
    %720 = arith.addf %717, %719 : vector<8x128xf32>
    %c0_216 = arith.constant 0 : index
    %c0_217 = arith.constant 0 : index
    %c0_218 = arith.constant 0 : index
    %721 = vector.load %arg2[%c0_216, %c0_217, %c0_218] : memref<8x8x128xf32, #tpu.memory_space<vmem>>, vector<1x8x128xf32>
    %722 = vector.shape_cast %721 : vector<1x8x128xf32> to vector<8x128xf32>
    %723 = arith.truncf %703 : vector<8x32xf32> to vector<8x32xbf16>
    %cst_219 = arith.constant dense<0.000000e+00> : vector<8x128xf32>
    %724 = tpu.matmul %723, %8, %cst_219 {dimension_numbers = #tpu.dot_dimension_numbers<[1], [0], [0], [1], [0, 0, 1, 1], [], []>} : vector<8x32xbf16>, vector<32x128xbf16>, vector<8x128xf32> -> vector<8x128xf32>
    %725 = arith.addf %722, %724 : vector<8x128xf32>
    %726 = vector.extract_strided_slice %720 {offsets = [0, 0], sizes = [8, 32], strides = [1, 1]} : vector<8x128xf32> to vector<8x32xf32>
    %727 = arith.negf %726 : vector<8x32xf32>
    %728 = math.exp %727 : vector<8x32xf32>
    %cst_220 = arith.constant 1.000000e+00 : f32
    %729 = vector.broadcast %cst_220 : f32 to vector<8x32xf32>
    %730 = arith.addf %729, %728 : vector<8x32xf32>
    %731 = arith.divf %729, %730 : vector<8x32xf32>
    %732 = vector.extract_strided_slice %720 {offsets = [0, 32], sizes = [8, 32], strides = [1, 1]} : vector<8x128xf32> to vector<8x32xf32>
    %733 = arith.negf %732 : vector<8x32xf32>
    %734 = math.exp %733 : vector<8x32xf32>
    %cst_221 = arith.constant 1.000000e+00 : f32
    %735 = vector.broadcast %cst_221 : f32 to vector<8x32xf32>
    %736 = arith.addf %735, %734 : vector<8x32xf32>
    %737 = arith.divf %735, %736 : vector<8x32xf32>
    %738 = vector.extract_strided_slice %720 {offsets = [0, 64], sizes = [8, 32], strides = [1, 1]} : vector<8x128xf32> to vector<8x32xf32>
    %739 = math.tanh %738 : vector<8x32xf32>
    %740 = vector.extract_strided_slice %720 {offsets = [0, 96], sizes = [8, 32], strides = [1, 1]} : vector<8x128xf32> to vector<8x32xf32>
    %741 = arith.negf %740 : vector<8x32xf32>
    %742 = math.exp %741 : vector<8x32xf32>
    %cst_222 = arith.constant 1.000000e+00 : f32
    %743 = vector.broadcast %cst_222 : f32 to vector<8x32xf32>
    %744 = arith.addf %743, %742 : vector<8x32xf32>
    %745 = arith.divf %743, %744 : vector<8x32xf32>
    %746 = arith.mulf %737, %697 : vector<8x32xf32>
    %747 = arith.mulf %731, %739 : vector<8x32xf32>
    %748 = arith.addf %746, %747 : vector<8x32xf32>
    %749 = math.tanh %748 : vector<8x32xf32>
    %750 = arith.mulf %745, %749 : vector<8x32xf32>
    %751 = vector.extract_strided_slice %725 {offsets = [0, 0], sizes = [8, 32], strides = [1, 1]} : vector<8x128xf32> to vector<8x32xf32>
    %752 = arith.negf %751 : vector<8x32xf32>
    %753 = math.exp %752 : vector<8x32xf32>
    %cst_223 = arith.constant 1.000000e+00 : f32
    %754 = vector.broadcast %cst_223 : f32 to vector<8x32xf32>
    %755 = arith.addf %754, %753 : vector<8x32xf32>
    %756 = arith.divf %754, %755 : vector<8x32xf32>
    %757 = vector.extract_strided_slice %725 {offsets = [0, 32], sizes = [8, 32], strides = [1, 1]} : vector<8x128xf32> to vector<8x32xf32>
    %758 = arith.negf %757 : vector<8x32xf32>
    %759 = math.exp %758 : vector<8x32xf32>
    %cst_224 = arith.constant 1.000000e+00 : f32
    %760 = vector.broadcast %cst_224 : f32 to vector<8x32xf32>
    %761 = arith.addf %760, %759 : vector<8x32xf32>
    %762 = arith.divf %760, %761 : vector<8x32xf32>
    %763 = vector.extract_strided_slice %725 {offsets = [0, 64], sizes = [8, 32], strides = [1, 1]} : vector<8x128xf32> to vector<8x32xf32>
    %764 = math.tanh %763 : vector<8x32xf32>
    %765 = vector.extract_strided_slice %725 {offsets = [0, 96], sizes = [8, 32], strides = [1, 1]} : vector<8x128xf32> to vector<8x32xf32>
    %766 = arith.negf %765 : vector<8x32xf32>
    %767 = math.exp %766 : vector<8x32xf32>
    %cst_225 = arith.constant 1.000000e+00 : f32
    %768 = vector.broadcast %cst_225 : f32 to vector<8x32xf32>
    %769 = arith.addf %768, %767 : vector<8x32xf32>
    %770 = arith.divf %768, %769 : vector<8x32xf32>
    %771 = arith.mulf %762, %709 : vector<8x32xf32>
    %772 = arith.mulf %756, %764 : vector<8x32xf32>
    %773 = arith.addf %771, %772 : vector<8x32xf32>
    %774 = math.tanh %773 : vector<8x32xf32>
    %775 = arith.mulf %770, %774 : vector<8x32xf32>
    %c8_i32_226 = arith.constant 8 : i32
    %776 = arith.muli %arg0, %c8_i32_226 : i32
    %c7_i32_227 = arith.constant 7 : i32
    %777 = arith.addi %776, %c7_i32_227 : i32
    %c15_i32_228 = arith.constant 15 : i32
    %778 = arith.cmpi slt, %777, %c15_i32_228 : i32
    %779 = arith.extui %778 : i1 to i32
    %780 = arith.sitofp %779 : i32 to f32
    %c1_i32_229 = arith.constant 1 : i32
    %781 = arith.subi %c1_i32_229, %arg0 : i32
    %c8_i32_230 = arith.constant 8 : i32
    %782 = arith.muli %781, %c8_i32_230 : i32
    %c0_i32_231 = arith.constant 0 : i32
    %783 = arith.addi %782, %c0_i32_231 : i32
    %c15_i32_232 = arith.constant 15 : i32
    %784 = arith.cmpi slt, %783, %c15_i32_232 : i32
    %785 = arith.extui %784 : i1 to i32
    %786 = arith.sitofp %785 : i32 to f32
    %787 = vector.broadcast %780 : f32 to vector<8x32xf32>
    %788 = arith.mulf %787, %750 : vector<8x32xf32>
    %cst_233 = arith.constant 1.000000e+00 : f32
    %789 = arith.subf %cst_233, %780 : f32
    %790 = vector.broadcast %789 : f32 to vector<8x32xf32>
    %791 = arith.mulf %790, %691 : vector<8x32xf32>
    %792 = arith.addf %788, %791 : vector<8x32xf32>
    %793 = vector.broadcast %780 : f32 to vector<8x32xf32>
    %794 = arith.mulf %793, %748 : vector<8x32xf32>
    %cst_234 = arith.constant 1.000000e+00 : f32
    %795 = arith.subf %cst_234, %780 : f32
    %796 = vector.broadcast %795 : f32 to vector<8x32xf32>
    %797 = arith.mulf %796, %697 : vector<8x32xf32>
    %798 = arith.addf %794, %797 : vector<8x32xf32>
    %799 = vector.broadcast %786 : f32 to vector<8x32xf32>
    %800 = arith.mulf %799, %775 : vector<8x32xf32>
    %cst_235 = arith.constant 1.000000e+00 : f32
    %801 = arith.subf %cst_235, %786 : f32
    %802 = vector.broadcast %801 : f32 to vector<8x32xf32>
    %803 = arith.mulf %802, %703 : vector<8x32xf32>
    %804 = arith.addf %800, %803 : vector<8x32xf32>
    %805 = vector.broadcast %786 : f32 to vector<8x32xf32>
    %806 = arith.mulf %805, %773 : vector<8x32xf32>
    %cst_236 = arith.constant 1.000000e+00 : f32
    %807 = arith.subf %cst_236, %786 : f32
    %808 = vector.broadcast %807 : f32 to vector<8x32xf32>
    %809 = arith.mulf %808, %709 : vector<8x32xf32>
    %810 = arith.addf %806, %809 : vector<8x32xf32>
    %c7_237 = arith.constant 7 : index
    %c0_238 = arith.constant 0 : index
    %c0_239 = arith.constant 0 : index
    %811 = vector.load %arg5[%c7_237, %c0_238, %c0_239] : memref<8x8x32xf32, #tpu.memory_space<vmem>>, vector<1x8x32xf32>
    %812 = vector.shape_cast %811 : vector<1x8x32xf32> to vector<8x32xf32>
    %813 = vector.shape_cast %792 : vector<8x32xf32> to vector<1x8x32xf32>
    tpu.vector_store %arg5[%c7_237, %c0_238, %c0_239], %813 {strides = array<i32>} : memref<8x8x32xf32, #tpu.memory_space<vmem>>, vector<1x8x32xf32>,
    %c0_240 = arith.constant 0 : index
    %c0_241 = arith.constant 0 : index
    %c0_242 = arith.constant 0 : index
    %814 = vector.load %arg6[%c0_240, %c0_241, %c0_242] : memref<8x8x32xf32, #tpu.memory_space<vmem>>, vector<1x8x32xf32>
    %815 = vector.shape_cast %814 : vector<1x8x32xf32> to vector<8x32xf32>
    %816 = vector.shape_cast %804 : vector<8x32xf32> to vector<1x8x32xf32>
    tpu.vector_store %arg6[%c0_240, %c0_241, %c0_242], %816 {strides = array<i32>} : memref<8x8x32xf32, #tpu.memory_space<vmem>>, vector<1x8x32xf32>,
    %c0_243 = arith.constant 0 : index
    %c0_244 = arith.constant 0 : index
    %817 = vector.load %arg9[%c0_243, %c0_244] : memref<8x32xf32, #tpu.memory_space<vmem>>, vector<8x32xf32>
    tpu.vector_store %arg9[%c0_243, %c0_244], %792 {strides = array<i32>} : memref<8x32xf32, #tpu.memory_space<vmem>>, vector<8x32xf32>,
    %c0_245 = arith.constant 0 : index
    %c0_246 = arith.constant 0 : index
    %818 = vector.load %arg10[%c0_245, %c0_246] : memref<8x32xf32, #tpu.memory_space<vmem>>, vector<8x32xf32>
    tpu.vector_store %arg10[%c0_245, %c0_246], %798 {strides = array<i32>} : memref<8x32xf32, #tpu.memory_space<vmem>>, vector<8x32xf32>,
    %c0_247 = arith.constant 0 : index
    %c0_248 = arith.constant 0 : index
    %819 = vector.load %arg11[%c0_247, %c0_248] : memref<8x32xf32, #tpu.memory_space<vmem>>, vector<8x32xf32>
    tpu.vector_store %arg11[%c0_247, %c0_248], %804 {strides = array<i32>} : memref<8x32xf32, #tpu.memory_space<vmem>>, vector<8x32xf32>,
    %c0_249 = arith.constant 0 : index
    %c0_250 = arith.constant 0 : index
    %820 = vector.load %arg12[%c0_249, %c0_250] : memref<8x32xf32, #tpu.memory_space<vmem>>, vector<8x32xf32>
    tpu.vector_store %arg12[%c0_249, %c0_250], %810 {strides = array<i32>} : memref<8x32xf32, #tpu.memory_space<vmem>>, vector<8x32xf32>,
    %c1_i32_251 = arith.constant 1 : i32
    %821 = arith.cmpi eq, %arg0, %c1_i32_251 : i32
    %822 = arith.extui %821 : i1 to i32
    %c0_i32_252 = arith.constant 0 : i32
    %823 = arith.cmpi ne, %822, %c0_i32_252 : i32
    scf.if %823 {
      %c0_253 = arith.constant 0 : index
      %c0_254 = arith.constant 0 : index
      %c0_255 = arith.constant 0 : index
      %824 = vector.load %arg7[%c0_253, %c0_254, %c0_255] : memref<2x8x32xf32, #tpu.memory_space<vmem>>, vector<1x8x32xf32>
      %825 = vector.shape_cast %824 : vector<1x8x32xf32> to vector<8x32xf32>
      %826 = vector.shape_cast %792 : vector<8x32xf32> to vector<1x8x32xf32>
      tpu.vector_store %arg7[%c0_253, %c0_254, %c0_255], %826 {strides = array<i32>} : memref<2x8x32xf32, #tpu.memory_space<vmem>>, vector<1x8x32xf32>,
      %c1_256 = arith.constant 1 : index
      %c0_257 = arith.constant 0 : index
      %c0_258 = arith.constant 0 : index
      %827 = vector.load %arg7[%c1_256, %c0_257, %c0_258] : memref<2x8x32xf32, #tpu.memory_space<vmem>>, vector<1x8x32xf32>
      %828 = vector.shape_cast %827 : vector<1x8x32xf32> to vector<8x32xf32>
      %829 = vector.shape_cast %804 : vector<8x32xf32> to vector<1x8x32xf32>
      tpu.vector_store %arg7[%c1_256, %c0_257, %c0_258], %829 {strides = array<i32>} : memref<2x8x32xf32, #tpu.memory_space<vmem>>, vector<1x8x32xf32>,
      %c0_259 = arith.constant 0 : index
      %c0_260 = arith.constant 0 : index
      %c0_261 = arith.constant 0 : index
      %830 = vector.load %arg8[%c0_259, %c0_260, %c0_261] : memref<2x8x32xf32, #tpu.memory_space<vmem>>, vector<1x8x32xf32>
      %831 = vector.shape_cast %830 : vector<1x8x32xf32> to vector<8x32xf32>
      %832 = vector.shape_cast %798 : vector<8x32xf32> to vector<1x8x32xf32>
      tpu.vector_store %arg8[%c0_259, %c0_260, %c0_261], %832 {strides = array<i32>} : memref<2x8x32xf32, #tpu.memory_space<vmem>>, vector<1x8x32xf32>,
      %c1_262 = arith.constant 1 : index
      %c0_263 = arith.constant 0 : index
      %c0_264 = arith.constant 0 : index
      %833 = vector.load %arg8[%c1_262, %c0_263, %c0_264] : memref<2x8x32xf32, #tpu.memory_space<vmem>>, vector<1x8x32xf32>
      %834 = vector.shape_cast %833 : vector<1x8x32xf32> to vector<8x32xf32>
      %835 = vector.shape_cast %810 : vector<8x32xf32> to vector<1x8x32xf32>
      tpu.vector_store %arg8[%c1_262, %c0_263, %c0_264], %835 {strides = array<i32>} : memref<2x8x32xf32, #tpu.memory_space<vmem>>, vector<1x8x32xf32>,
    } else {
    }
    return
  }
  func.func @transform_0(%arg0: i32) -> (i32, i32, i32) {
    %c0_i32 = arith.constant 0 : i32
    %c0_i32_0 = arith.constant 0 : i32
    %c0_i32_1 = arith.constant 0 : i32
    return %arg0, %c0_i32, %c0_i32_0 : i32, i32, i32
  }
  func.func @transform_1(%arg0: i32) -> (i32, i32, i32) {
    %c1_i32 = arith.constant 1 : i32
    %0 = arith.subi %c1_i32, %arg0 : i32
    %c0_i32 = arith.constant 0 : i32
    %c0_i32_0 = arith.constant 0 : i32
    %c0_i32_1 = arith.constant 0 : i32
    return %0, %c0_i32, %c0_i32_0 : i32, i32, i32
  }
  func.func @transform_2(%arg0: i32) -> (i32, i32) {
    %c0_i32 = arith.constant 0 : i32
    %c0_i32_0 = arith.constant 0 : i32
    %c0_i32_1 = arith.constant 0 : i32
    return %c0_i32, %c0_i32_0 : i32, i32
  }
  func.func @transform_3(%arg0: i32) -> (i32, i32) {
    %c0_i32 = arith.constant 0 : i32
    %c0_i32_0 = arith.constant 0 : i32
    %c0_i32_1 = arith.constant 0 : i32
    return %c0_i32, %c0_i32_0 : i32, i32
  }
  func.func @transform_4(%arg0: i32) -> (i32, i32, i32) {
    %c0_i32 = arith.constant 0 : i32
    %c0_i32_0 = arith.constant 0 : i32
    %c0_i32_1 = arith.constant 0 : i32
    return %arg0, %c0_i32, %c0_i32_0 : i32, i32, i32
  }
  func.func @transform_5(%arg0: i32) -> (i32, i32, i32) {
    %c1_i32 = arith.constant 1 : i32
    %0 = arith.subi %c1_i32, %arg0 : i32
    %c0_i32 = arith.constant 0 : i32
    %c0_i32_0 = arith.constant 0 : i32
    %c0_i32_1 = arith.constant 0 : i32
    return %0, %c0_i32, %c0_i32_0 : i32, i32, i32
  }
  func.func @transform_6(%arg0: i32) -> (i32, i32, i32) {
    %c0_i32 = arith.constant 0 : i32
    %c0_i32_0 = arith.constant 0 : i32
    %c0_i32_1 = arith.constant 0 : i32
    %c0_i32_2 = arith.constant 0 : i32
    return %c0_i32, %c0_i32_0, %c0_i32_1 : i32, i32, i32
  }
  func.func @transform_7(%arg0: i32) -> (i32, i32, i32) {
    %c0_i32 = arith.constant 0 : i32
    %c0_i32_0 = arith.constant 0 : i32
    %c0_i32_1 = arith.constant 0 : i32
    %c0_i32_2 = arith.constant 0 : i32
    return %c0_i32, %c0_i32_0, %c0_i32_1 : i32, i32, i32
  }
}

</mosaic_0001>

<bundles_post_ra>
// kernel: pblstm_forward.2
= control target key start
LH: loop header
LB: loop body
LE: loop exit
PB: predicated region body
PF: predicated region fallthrough
CT: control target
= control target key end

     0   :  { %vm71_vm0 = vcmask 261120   ;;  %s522_s1 = inlined_call_operand.vmem [shape: bf16[32,256], index: 1, kind: input, shape index: {}]   ;;  %s523_s0 = inlined_call_operand.vmem [shape: f32[128,32], index: 0, kind: input, shape index: {}]   ;;  %s524_s2 = inlined_call_operand.vmem [shape: f32[1,256], index: 2, kind: input, shape index: {}]   ;;  %s525_s3 = inlined_call_operand.vmem [shape: f32[128,128], index: 3, kind: output, shape index: {0}]   ;;  %s526_s4 = inlined_call_operand.vmem [shape: f32[128,128], index: 4, kind: output, shape index: {1}]  }
   0x1   :  { %v244_v0 = vld [vmem:[%s522_s1 + $0x10] sm:$0xf]  ;;  %v269_v1 = vld [vmem:[%s522_s1 + $0x14] sm:$0xf0]  ;;  %v268_v2 = vld [vmem:[%s522_s1 + $0x14] sm:$0xf] }
   0x2   :  { %v245_v3 = vor.u32 %v269_v1, %v244_v0  ;;  %v246_v4 = vld [vmem:[%s522_s1 + $0x18] sm:$0xf0]  ;;  %v236_v5 = vld [vmem:[%s522_s1] sm:$0xf]  ;;  %v267_v6 = vld [vmem:[%s522_s1 + $0x4] sm:$0xf0] }
   0x3   :  { %v249_v7 = vor.u32 %v268_v2, %v246_v4  ;;  %v266_v8 = vld [vmem:[%s522_s1 + $0x4] sm:$0xf]  ;;  %v238_v9 = vld [vmem:[%s522_s1 + $0x8] sm:$0xf0]  ;;  %v237_v11 = vor.u32 %v267_v6, %v236_v5  ;;  %v19_v18 = vld [vmem:[%s523_s0 + $0x10] sm:$0xff] }
   0x4   :  { %v17_v10 = vld [vmem:[%s523_s0] sm:$0xff]  ;;  %102 = vmatpush.bf16.msra.mxu0 %v245_v3  ;;  %270 = vmatpush.bf16.msra.mxu2 %v245_v3  ;;  %v18_v12 = vld [vmem:[%s523_s0 + $0x8] sm:$0xff]  ;;  %v241_v15 = vor.u32 %v266_v8, %v238_v9  ;;  %v20_v19 = vld [vmem:[%s523_s0 + $0x18] sm:$0xff] }
   0x5   :  { %v25_v13 = vld [vmem:[%s523_s0 + $0x40] sm:$0xff]  ;;  %v26_v14 = vld [vmem:[%s523_s0 + $0x48] sm:$0xff]  ;;  %151 = vmatpush.bf16.msra.mxu1 %v249_v7  ;;  %272 = vmatpush.bf16.msra.mxu3 %v249_v7  ;;  %v33_v16 = vpack.c.bf16 %v18_v12, %v17_v10  ;;  %v27_v20 = vld [vmem:[%s523_s0 + $0x50] sm:$0xff]  ;;  %v34_v22 = vpack.c.bf16 %v20_v19, %v19_v18 }
   0x6   :  { %v37_v17 = vpack.c.bf16 %v26_v14, %v25_v13  ;;  %v28_v21 = vld [vmem:[%s523_s0 + $0x58] sm:$0xff]  ;;  %v21_v24 = vld [vmem:[%s523_s0 + $0x20] sm:$0xff]  ;;  %v22_v25 = vld [vmem:[%s523_s0 + $0x28] sm:$0xff] }
   0x7   :  { %v38_v23 = vpack.c.bf16 %v28_v21, %v27_v20  ;;  %v29_v26 = vld [vmem:[%s523_s0 + $0x60] sm:$0xff]  ;;  %v30_v27 = vld [vmem:[%s523_s0 + $0x68] sm:$0xff]  ;;  %v35_v28 = vpack.c.bf16 %v22_v25, %v21_v24  ;;  %v23_v30 = vld [vmem:[%s523_s0 + $0x30] sm:$0xff] }
   0x8   :  { %103 = vmatpush.bf16.msra.mxu0 %v237_v11  ;;  %271 = vmatpush.bf16.msra.mxu2 %v237_v11  ;;  %v39_v29 = vpack.c.bf16 %v30_v27, %v29_v26  ;;  %v24_v31 = vld [vmem:[%s523_s0 + $0x38] sm:$0xff]  ;;  %v31_v32 = vld [vmem:[%s523_s0 + $0x70] sm:$0xff]  ;;  %v45_v36 = vld [vmem:[%s524_s2] sm:$0x3] }
   0x9   :  { %152 = vmatpush.bf16.msra.mxu1 %v241_v15  ;;  %273 = vmatpush.bf16.msra.mxu3 %v241_v15  ;;  %v32_v33 = vld [vmem:[%s523_s0 + $0x78] sm:$0xff]  ;;  %v36_v34 = vpack.c.bf16 %v24_v31, %v23_v30  ;;  %v390_v37 = vperm.slane %v45_v36, 0  ;;  %v392_v38 = vperm.slane %v45_v36, 1 }
   0xa   :  { %v40_v35 = vpack.c.bf16 %v32_v33, %v31_v32 }
   0xb   :  { %250 = vmatmul.msk.bf16.vlgmr.msra.gmra.mxu0 %vm71_vm0, %v33_v16  ;;  %254 = vmatmul.msk.bf16.vlgmr.msra.gmra.mxu2 %vm71_vm0, %v37_v17 }
   0xc   :  { %258 = vmatmul.msk.bf16.vlgmr.msra.gmra.mxu1 %vm71_vm0, %v33_v16  ;;  %262 = vmatmul.msk.bf16.vlgmr.msra.gmra.mxu3 %vm71_vm0, %v37_v17 }
  0x1b   :  { %251 = vmatmul.msk.bf16.gmra.mxu0 %vm71_vm0, %v34_v22  ;;  %255 = vmatmul.msk.bf16.gmra.mxu2 %vm71_vm0, %v38_v23 }
  0x1c   :  { %259 = vmatmul.msk.bf16.gmra.mxu1 %vm71_vm0, %v34_v22  ;;  %263 = vmatmul.msk.bf16.gmra.mxu3 %vm71_vm0, %v38_v23 }
  0x2b   :  { %252 = vmatmul.msk.bf16.gmra.mxu0 %vm71_vm0, %v35_v28  ;;  %256 = vmatmul.msk.bf16.gmra.mxu2 %vm71_vm0, %v39_v29 }
  0x2c   :  { %260 = vmatmul.msk.bf16.gmra.mxu1 %vm71_vm0, %v35_v28  ;;  %264 = vmatmul.msk.bf16.gmra.mxu3 %vm71_vm0, %v39_v29 }
  0x3b   :  { %253 = vmatmul.msk.bf16.gmra.mxu0 %vm71_vm0, %v36_v34  ;;  %257 = vmatmul.msk.bf16.gmra.mxu2 %vm71_vm0, %v40_v35 }
  0x3c   :  { %261 = vmatmul.msk.bf16.gmra.mxu1 %vm71_vm0, %v36_v34  ;;  %265 = vmatmul.msk.bf16.gmra.mxu3 %vm71_vm0, %v40_v35 }
  0x88   :  { %v105_v39 = vpop.f32.mrf.mxu0 }
  0x89   :  { %v106_v40 = vadd.f32 %v105_v39, %v390_v37  ;;  %v154_v41 = vpop.f32.mrf.mxu1 }
  0x8a   :  { %v155_v42 = vadd.f32 %v154_v41, %v392_v38 }
  0x8b   :  { %194 = vst [vmem:[%s525_s3] sm:$0xff] %v106_v40 }
  0x8c   :  { %210 = vst [vmem:[%s526_s4] sm:$0xff] %v155_v42 }
  0x8e   :  { %v125_v43 = vpop.f32.mrf.mxu2 }
  0x8f   :  { %v126_v44 = vadd.f32 %v125_v43, %v390_v37  ;;  %v174_v45 = vpop.f32.mrf.mxu3 }
  0x90   :  { %v175_v46 = vadd.f32 %v174_v45, %v392_v38  ;;  %v107_v47 = vpop.f32.mrf.mxu0 }
  0x91   :  { %202 = vst [vmem:[%s525_s3 + $0x40] sm:$0xff] %v126_v44  ;;  %v108_v48 = vadd.f32 %v107_v47, %v390_v37  ;;  %v156_v49 = vpop.f32.mrf.mxu1 }
  0x92   :  { %218 = vst [vmem:[%s526_s4 + $0x40] sm:$0xff] %v175_v46  ;;  %v157_v50 = vadd.f32 %v156_v49, %v392_v38 }
  0x93   :  { %195 = vst [vmem:[%s525_s3 + $0x8] sm:$0xff] %v108_v48 }
  0x94   :  { %211 = vst [vmem:[%s526_s4 + $0x8] sm:$0xff] %v157_v50 }
  0x96   :  { %v127_v51 = vpop.f32.mrf.mxu2 }
  0x97   :  { %v128_v52 = vadd.f32 %v127_v51, %v390_v37  ;;  %v176_v53 = vpop.f32.mrf.mxu3 }
  0x98   :  { %v177_v54 = vadd.f32 %v176_v53, %v392_v38  ;;  %v110_v55 = vpop.f32.mrf.mxu0 }
  0x99   :  { %203 = vst [vmem:[%s525_s3 + $0x48] sm:$0xff] %v128_v52  ;;  %v111_v56 = vadd.f32 %v110_v55, %v390_v37  ;;  %v159_v57 = vpop.f32.mrf.mxu1 }
  0x9a   :  { %219 = vst [vmem:[%s526_s4 + $0x48] sm:$0xff] %v177_v54  ;;  %v160_v58 = vadd.f32 %v159_v57, %v392_v38 }
  0x9b   :  { %196 = vst [vmem:[%s525_s3 + $0x10] sm:$0xff] %v111_v56 }
  0x9c   :  { %212 = vst [vmem:[%s526_s4 + $0x10] sm:$0xff] %v160_v58 }
  0x9e   :  { %v130_v59 = vpop.f32.mrf.mxu2 }
  0x9f   :  { %v131_v60 = vadd.f32 %v130_v59, %v390_v37  ;;  %v179_v61 = vpop.f32.mrf.mxu3 }
  0xa0   :  { %v180_v62 = vadd.f32 %v179_v61, %v392_v38  ;;  %v112_v63 = vpop.f32.mrf.mxu0 }
  0xa1   :  { %204 = vst [vmem:[%s525_s3 + $0x50] sm:$0xff] %v131_v60  ;;  %v113_v0 = vadd.f32 %v112_v63, %v390_v37  ;;  %v161_v1 = vpop.f32.mrf.mxu1 }
  0xa2   :  { %220 = vst [vmem:[%s526_s4 + $0x50] sm:$0xff] %v180_v62  ;;  %v162_v2 = vadd.f32 %v161_v1, %v392_v38 }
  0xa3   :  { %197 = vst [vmem:[%s525_s3 + $0x18] sm:$0xff] %v113_v0 }
  0xa4   :  { %213 = vst [vmem:[%s526_s4 + $0x18] sm:$0xff] %v162_v2 }
  0xa6   :  { %v132_v3 = vpop.f32.mrf.mxu2 }
  0xa7   :  { %v133_v4 = vadd.f32 %v132_v3, %v390_v37  ;;  %v181_v5 = vpop.f32.mrf.mxu3 }
  0xa8   :  { %v182_v6 = vadd.f32 %v181_v5, %v392_v38  ;;  %v115_v7 = vpop.f32.mrf.mxu0 }
  0xa9   :  { %205 = vst [vmem:[%s525_s3 + $0x58] sm:$0xff] %v133_v4  ;;  %v116_v8 = vadd.f32 %v115_v7, %v390_v37  ;;  %v164_v9 = vpop.f32.mrf.mxu1 }
  0xaa   :  { %221 = vst [vmem:[%s526_s4 + $0x58] sm:$0xff] %v182_v6  ;;  %v165_v10 = vadd.f32 %v164_v9, %v392_v38 }
  0xab   :  { %198 = vst [vmem:[%s525_s3 + $0x20] sm:$0xff] %v116_v8 }
  0xac   :  { %214 = vst [vmem:[%s526_s4 + $0x20] sm:$0xff] %v165_v10 }
  0xae   :  { %v135_v11 = vpop.f32.mrf.mxu2 }
  0xaf   :  { %v136_v12 = vadd.f32 %v135_v11, %v390_v37  ;;  %v184_v13 = vpop.f32.mrf.mxu3 }
  0xb0   :  { %v185_v14 = vadd.f32 %v184_v13, %v392_v38  ;;  %v117_v15 = vpop.f32.mrf.mxu0 }
  0xb1   :  { %206 = vst [vmem:[%s525_s3 + $0x60] sm:$0xff] %v136_v12  ;;  %v118_v16 = vadd.f32 %v117_v15, %v390_v37  ;;  %v166_v17 = vpop.f32.mrf.mxu1 }
  0xb2   :  { %222 = vst [vmem:[%s526_s4 + $0x60] sm:$0xff] %v185_v14  ;;  %v167_v18 = vadd.f32 %v166_v17, %v392_v38 }
  0xb3   :  { %199 = vst [vmem:[%s525_s3 + $0x28] sm:$0xff] %v118_v16 }
  0xb4   :  { %215 = vst [vmem:[%s526_s4 + $0x28] sm:$0xff] %v167_v18 }
  0xb6   :  { %v137_v19 = vpop.f32.mrf.mxu2 }
  0xb7   :  { %v138_v20 = vadd.f32 %v137_v19, %v390_v37  ;;  %v186_v21 = vpop.f32.mrf.mxu3 }
  0xb8   :  { %v187_v22 = vadd.f32 %v186_v21, %v392_v38  ;;  %v120_v23 = vpop.f32.mrf.mxu0 }
  0xb9   :  { %207 = vst [vmem:[%s525_s3 + $0x68] sm:$0xff] %v138_v20  ;;  %v121_v24 = vadd.f32 %v120_v23, %v390_v37  ;;  %v169_v25 = vpop.f32.mrf.mxu1 }
  0xba   :  { %223 = vst [vmem:[%s526_s4 + $0x68] sm:$0xff] %v187_v22  ;;  %v170_v26 = vadd.f32 %v169_v25, %v392_v38 }
  0xbb   :  { %200 = vst [vmem:[%s525_s3 + $0x30] sm:$0xff] %v121_v24 }
  0xbc   :  { %216 = vst [vmem:[%s526_s4 + $0x30] sm:$0xff] %v170_v26 }
  0xbe   :  { %v140_v27 = vpop.f32.mrf.mxu2 }
  0xbf   :  { %v141_v28 = vadd.f32 %v140_v27, %v390_v37  ;;  %v189_v29 = vpop.f32.mrf.mxu3 }
  0xc0   :  { %v190_v30 = vadd.f32 %v189_v29, %v392_v38  ;;  %v122_v31 = vpop.f32.mrf.mxu0 }
  0xc1   :  { %208 = vst [vmem:[%s525_s3 + $0x70] sm:$0xff] %v141_v28  ;;  %v123_v32 = vadd.f32 %v122_v31, %v390_v37  ;;  %v171_v33 = vpop.f32.mrf.mxu1 }
  0xc2   :  { %224 = vst [vmem:[%s526_s4 + $0x70] sm:$0xff] %v190_v30  ;;  %v172_v34 = vadd.f32 %v171_v33, %v392_v38 }
  0xc3   :  { %201 = vst [vmem:[%s525_s3 + $0x38] sm:$0xff] %v123_v32 }
  0xc4   :  { %217 = vst [vmem:[%s526_s4 + $0x38] sm:$0xff] %v172_v34 }
  0xc6   :  { %v142_v35 = vpop.f32.mrf.mxu2 }
  0xc7   :  { %v143_v36 = vadd.f32 %v142_v35, %v390_v37  ;;  %v191_v39 = vpop.f32.mrf.mxu3 }
  0xc8   :  { %v192_v40 = vadd.f32 %v191_v39, %v392_v38 }
  0xc9   :  { %209 = vst [vmem:[%s525_s3 + $0x78] sm:$0xff] %v143_v36 }
  0xca   :  { %225 = vst [vmem:[%s526_s4 + $0x78] sm:$0xff] %v192_v40 }

// kernel: pblstm_forward.3
= control target key start
LH: loop header
LB: loop body
LE: loop exit
PB: predicated region body
PF: predicated region fallthrough
CT: control target
= control target key end

     0   :  { %s2082_s24 = smov 0   ;;  %s2737_s0 = inlined_call_operand.vmem [shape: f32[16,8,128], index: 0, kind: input, shape index: {}]   ;;  %s2738_s1 = inlined_call_operand.vmem [shape: f32[16,8,128], index: 1, kind: input, shape index: {}]   ;;  %s2739_s2 = inlined_call_operand.vmem [shape: bf16[32,128], index: 2, kind: input, shape index: {}]   ;;  %s2740_s3 = inlined_call_operand.vmem [shape: bf16[32,128], index: 3, kind: input, shape index: {}]   ;;  %s2741_s4 = inlined_call_operand.vmem [shape: f32[16,8,32], index: 4, kind: output, shape index: {0}]   ;;  %s2742_s5 = inlined_call_operand.vmem [shape: f32[16,8,32], index: 5, kind: output, shape index: {1}]   ;;  %s2743_s6 = inlined_call_operand.vmem [shape: f32[2,8,32], index: 6, kind: output, shape index: {2}]   ;;  %s2744_s7 = inlined_call_operand.vmem [shape: f32[2,8,32], index: 7, kind: output, shape index: {3}]  }
   0x1 LB: > { %s2088_s25 = sadd.s32 4294967295, %s2036_s24   ;;  %p1793_p0 = scmp.ge.s32.totalorder %s2036_s24, 1  ;;  %s2036_s24 = sphi %s2082_s24, %s18_s24  }
   0x2   : > { %p252_p1 = scmp.lt.s32.totalorder %s2036_s24, 3 }
   0x4   : > { %p253_p2 = pnand %p1793_p0, %p252_p1 }
   0x5   : > { %s2093_s26 = sshll.u32 (!%p253_p2), %s2088_s25, 3  ;;  %s302_s27 = ssub.s32 (!%p253_p2), 1, %s2088_s25 }
   0x6   : > { %256 = sbr.rel (%p253_p2) target bundleno = 4762 (0x129a), region = 36  ;;  %p297_p3 = scmp.lt.s32.totalorder (!%p253_p2), %s2093_s26, 15 }
   0x7   : > { %s2097_s28 = sshll.u32 (!%p253_p2), %s302_s27, 3  ;;  %p1802_p5 = scmp.ne.s32.totalorder (!%p253_p2), %s2088_s25, 0 }
   0x8   : > { %p304_p4 = scmp.lt.s32.totalorder (!%p253_p2), %s2097_s28, 15 }
   0xb   : > { %s298_s29 = scalar_select %p297_p3, %s2093_s26, 15 }
   0xc   : > { %s305_s30 = scalar_select %p304_p4, %s2097_s28, 15 }
   0xd   : > { %s1795_s8 = sshll.u32 %s298_s29, 3  ;;  %328 = sbr.rel (%p1802_p5) target bundleno = 23 (0x17), region = 40 }
   0xe   : > { %s2109_s11 = scalar_lea.vmem %s2737_s0, %s1795_s8  ;;  %s1797_s12 = sshll.u32 %s305_s30, 3 }
   0xf   : > { %s2114_s15 = scalar_lea.vmem %s2738_s1, %s1797_s12  ;;  %s2119_s18 = scalar_lea.vmem %s2741_s4, %s1795_s8 }
  0x10   : > { %s2124_s21 = scalar_lea.vmem %s2742_s5, %s1797_s12 }
  0x12   : > { %vm329_vm0 = vcmask 261120   ;;  %v2038_v0 = vmov 0.0  }
  0x13   : > { %330 = vst.msk [vmem:[#allocation2] sm:$0xff] %vm329_vm0, %v2038_v0 }
  0x14   : > { %331 = vst.msk [vmem:[#allocation3] sm:$0xff] %vm329_vm0, %v2038_v0 }
  0x15   : > { %332 = vst.msk [vmem:[#allocation4] sm:$0xff] %vm329_vm0, %v2038_v0 }
  0x16   : > { %333 = vst.msk [vmem:[#allocation5] sm:$0xff] %vm329_vm0, %v2038_v0 }
  0x17 PF: > { %v2130_v1 = vld [vmem:[%s2739_s2 + $0x8] sm:$0xff]  ;;  %v2141_v3 = vld [vmem:[%s2739_s2] sm:$0xff]  ;;  %s2039_s12 = smov 32   ;;  %vm360_vm1 = vcmask 261120   ;;  %v1812_v15 = vld [vmem:[%s2114_s15 + $0x38] sm:$0xff]  ;;  %s2040_s13 = smov 64  }
  0x18   : > { %v2135_v2 = vld [vmem:[%s2740_s3 + $0x8] sm:$0xff]  ;;  %370 = vmatpush.bf16.msra.mxu0 %v2130_v1  ;;  %562 = vmatpush.bf16.msra.mxu2 %v2130_v1  ;;  %v2152_v6 = vld [vmem:[%s2740_s3] sm:$0xff]  ;;  %s2193_s14 = scalar_select %p297_p3, 1, 0 }
  0x19   : > { %402 = vmatpush.bf16.msra.mxu1 %v2135_v2  ;;  %585 = vmatpush.bf16.msra.mxu3 %v2135_v2  ;;  %v346_v11 = vld [vmem:[%s2109_s11] sm:$0xff]  ;;  %s2041_s19 = smov 96   ;;  %s498_s20 = sadd.s32 7, %s2097_s28 }
  0x1a   : > { %v2143_v4 = vld [vmem:[#allocation2] sm:$0xff]  ;;  %s495_s16 = scvt.s32.f32 %s2193_s14  ;;  %p499_p6 = scmp.lt.s32.totalorder %s498_s20, 15 }
  0x1b   : > { %v2145_v5 = vld [vmem:[#allocation3] sm:$0xff]  ;;  %v347_v8 = vpack.c.bf16 %v2143_v4, %v2143_v4  ;;  %s671_s29 = sadd.s32 6, %s2097_s28  ;;  %s667_s10 = sadd.s32 1, %s2093_s26 }
  0x1c   : > { %v2154_v7 = vld [vmem:[#allocation4] sm:$0xff]  ;;  %431 = vrot.lane.b32.xlu1 %v2145_v5, %s2039_s12  ;;  %371 = vmatpush.bf16.msra.mxu0 %v2141_v3  ;;  %s2196_s17 = ssub.f32 1.0, %s495_s16  ;;  %p672_p7 = scmp.lt.s32.totalorder %s671_s29, 15 }
  0x1d   : > { %v380_v9 = vpack.c.bf16 %v2154_v7, %v2154_v7  ;;  %563 = vmatpush.bf16.msra.mxu2 %v2141_v3  ;;  %403 = vmatpush.bf16.msra.mxu1 %v2152_v6  ;;  %v2167_v10 = vld [vmem:[#allocation5] sm:$0xff]  ;;  %s500_s22 = scalar_select %p499_p6, 1, 0 }
  0x1e   : > { %586 = vmatpush.bf16.msra.mxu3 %v2152_v6  ;;  %v505_v51 = vstv %s2196_s17  ;;  %s673_s30 = scalar_select %p672_p7, 1, 0 }
  0x1f   : > { %1811 = vmatmul.msk.bf16.vlgmr.msra.gmra.mxu0 %vm360_vm1, %v347_v8  ;;  %v506_v52 = vmul.f32 %v505_v51, %v2143_v4  ;;  %s2205_s23 = scvt.s32.f32 %s500_s22  ;;  %p668_p8 = scmp.lt.s32.totalorder %s667_s10, 15 }
  0x20   : > { %720 = vmatpush.bf16.msrb.mxu0 %v2130_v1  ;;  %1821 = vmatmul.msk.bf16.vlgmr.msra.gmra.mxu1 %vm360_vm1, %v380_v9  ;;  %v2215_v9 = vstv %s495_s16  ;;  %s674_s8 = scvt.s32.f32 %s673_s30  ;;  %s829_s20 = sadd.s32 5, %s2097_s28 }
  0x21   : > { %743 = vmatpush.bf16.msrb.mxu1 %v2135_v2  ;;  %878 = vmatpush.bf16.msrb.mxu2 %v2130_v1  ;;  %s521_s27 = ssub.f32 1.0, %s2205_s23  ;;  %p830_p9 = scmp.lt.s32.totalorder %s829_s20, 15 }
  0x22   : > { %901 = vmatpush.bf16.msrb.mxu3 %v2135_v2  ;;  %s686_s9 = ssub.f32 1.0, %s674_s8  ;;  %s825_s29 = sadd.s32 2, %s2093_s26 }
  0x23   : > { %v522_v62 = vstv %s521_s27  ;;  %s669_s14 = scalar_select %p668_p8, 1, 0 }
  0x24   : > { %472 = vrot.lane.b32.xlu1 %v2167_v10, %s2039_s12  ;;  %721 = vmatpush.bf16.msrb.mxu0 %v2141_v3  ;;  %v523_v63 = vmul.f32 %v522_v62, %v2154_v7  ;;  %s831_s22 = scalar_select %p830_p9, 1, 0 }
  0x25   : > { %744 = vmatpush.bf16.msrb.mxu1 %v2152_v6  ;;  %879 = vmatpush.bf16.msrb.mxu2 %v2141_v3  ;;  %s2270_s16 = scvt.s32.f32 %s669_s14  ;;  %p826_p10 = scmp.lt.s32.totalorder %s825_s29, 15 }
  0x26   : > { %902 = vmatpush.bf16.msrb.mxu3 %v2152_v6  ;;  %s987_s10 = sadd.s32 4, %s2097_s28  ;;  %s983_s20 = sadd.s32 3, %s2093_s26 }
  0x27   : > { %s677_s17 = ssub.f32 1.0, %s2270_s16  ;;  %p988_p11 = scmp.lt.s32.totalorder %s987_s10, 15 }
  0x28   : > { %1036 = vmatpush.bf16.msra.mxu0 %v2130_v1  ;;  %s827_s30 = scalar_select %p826_p10, 1, 0 }
  0x29   : > { %1059 = vmatpush.bf16.msra.mxu1 %v2135_v2  ;;  %s989_s14 = scalar_select %p988_p11, 1, 0 }
  0x2a   : > { %p984_p12 = scmp.lt.s32.totalorder %s983_s20, 15  ;;  %s1145_s29 = sadd.s32 3, %s2097_s28 }
  0x2b   : > { %p1146_p13 = scmp.lt.s32.totalorder %s1145_s29, 15  ;;  %s1141_s10 = sadd.s32 4, %s2093_s26 }
  0x2c   : > { %1037 = vmatpush.bf16.msra.mxu0 %v2141_v3  ;;  %p1142_p0 = scmp.lt.s32.totalorder %s1141_s10, 15  ;;  %s1303_s20 = sadd.s32 2, %s2097_s28 }
  0x2d   : > { %1060 = vmatpush.bf16.msra.mxu1 %v2152_v6  ;;  %p1304_p1 = scmp.lt.s32.totalorder %s1303_s20, 15  ;;  %s1299_s29 = sadd.s32 5, %s2093_s26 }
  0x2e   : > { %p1300_p2 = scmp.lt.s32.totalorder %s1299_s29, 15  ;;  %s1461_s10 = sadd.s32 1, %s2097_s28 }
  0x2f   : > { %p1462_p3 = scmp.lt.s32.totalorder %s1461_s10, 15  ;;  %s1457_s20 = sadd.s32 6, %s2093_s26 }
  0x30   : > { %p1458_p5 = scmp.lt.s32.totalorder %s1457_s20, 15 }
  0x8e   : > { %v432_v53 = vpop.permute.xlu1 %431 }
  0x96   : > { %v473_v57 = vpop.permute.xlu1 %472 }
  0x9c   : > { %v373_v12 = vpop.f32.mrf.mxu0 }
  0x9d   : > { %v377_v13 = vadd.f32 %v373_v12, %v346_v11  ;;  %v405_v14 = vpop.f32.mrf.mxu1 }
  0x9e   : > { %v409_v16 = vadd.f32 %v1812_v15, %v405_v14 }
  0x9f   : > { %1902 = vtanh.f32 %v377_v13  ;;  %v1822_v21 = vmul.f32 -1.442695, %v377_v13 }
  0xa0   : > { %1904 = vtanh.f32 %v409_v16  ;;  %v1823_v22 = vmul.f32 -1.442695, %v409_v16  ;;  %v519_v16 = vstv %s2205_s23  ;;  %s2315_s23 = scvt.s32.f32 %s831_s22 }
  0xa1   : > { %1906 = vpow2.f32 %v1822_v21  ;;  %v513_v21 = vmul.f32 %v505_v51, %v2145_v5  ;;  %s985_s22 = scalar_select %p984_p12, 1, 0 }
  0xa2   : > { %1908 = vpow2.f32 %v1823_v22  ;;  %s844_s27 = ssub.f32 1.0, %s2315_s23 }
  0xa4   : > { %v375_v17 = vpop.f32.mrf.mxu0 }
  0xa5   : > { %v1903_v18 = vpop.eup %1902  ;;  %v407_v19 = vpop.f32.mrf.mxu1 }
  0xa6   : > { %436 = vrot.lane.b32.xlu0 %v1903_v18, %s2040_s13  ;;  %v1905_v20 = vpop.eup %1904 }
  0xa7   : > { %v1907_v23 = vpop.eup %1906 }
  0xa8   : > { %v413_v24 = vadd.f32 1.0, %v1907_v23  ;;  %v1909_v25 = vpop.eup %1908 }
  0xa9   : > { %v454_v26 = vadd.f32 1.0, %v1909_v25 }
  0xaa   : > { %1910 = vrcp.f32 %v413_v24  ;;  %v425_v35 = vand.u32 2147483648, %v413_v24  ;;  %vm419_vm3 = vweird.f32 %v413_v24  ;;  %v423_v36 = vand.u32 2147483647, %v413_v24 }
  0xab   : > { %1912 = vrcp.f32 %v454_v26  ;;  %vm460_vm6 = vweird.f32 %v454_v26  ;;  %v466_v41 = vand.u32 2147483648, %v454_v26  ;;  %v464_v44 = vand.u32 2147483647, %v454_v26 }
  0xac   : > { %v426_v39 = vor.u32 1.1754944e-38, %v425_v35  ;;  %vm424_vm5 = vcmp.eq.f32.partialorder %v423_v36, 8.507059e+37 }
  0xad   : > { %v467_v46 = vor.u32 1.1754944e-38, %v466_v41  ;;  %vm465_vm9 = vcmp.eq.f32.partialorder %v464_v44, 8.507059e+37 }
  0xae   : > { %477 = vrot.lane.b32.xlu0 %v1905_v20, %s2040_s13 }
  0xb0   : > { %v1911_v27 = vpop.eup %1910 }
  0xb1   : > { %v415_v28 = vmul.f32 %v1911_v27, %v413_v24  ;;  %v1913_v30 = vpop.eup %1912  ;;  %vm420_vm2 = vweird.f32 %v1911_v27  ;;  %v1829_v24 = vld [vmem:[%s2114_s15 + $0x30] sm:$0xff] }
  0xb2   : > { %v456_v32 = vmul.f32 %v1913_v30, %v454_v26  ;;  %vm421_vm4 = vmor %vm419_vm3, %vm420_vm2  ;;  %vm461_vm7 = vweird.f32 %v1913_v30 }
  0xb3   : > { %v416_v29 = vsub.f32 1.0, %v415_v28  ;;  %vm462_vm8 = vmor %vm460_vm6, %vm461_vm7  ;;  %v1827_v28 = vld [vmem:[%s2109_s11 + $0x8] sm:$0xff] }
  0xb4   : > { %v457_v34 = vsub.f32 1.0, %v456_v32 }
  0xb5   : > { %v417_v31 = vmul.f32 %v1911_v27, %v416_v29 }
  0xb6   : > { %v458_v38 = vmul.f32 %v1913_v30, %v457_v34 }
  0xb7   : > { %v418_v33 = vadd.f32 %v1911_v27, %v417_v31 }
  0xb8   : > { %v459_v43 = vadd.f32 %v1913_v30, %v458_v38 }
  0xb9   : > { %v422_v37 = vsel %vm421_vm4, %v1911_v27, %v418_v33  ;;  %v530_v33 = vmul.f32 %v522_v62, %v2167_v10 }
  0xba   : > { %v427_v40 = vsel %vm424_vm5, %v426_v39, %v422_v37  ;;  %v463_v47 = vsel %vm462_vm8, %v1913_v30, %v459_v43 }
  0xbb   : > { %v468_v48 = vsel %vm465_vm9, %v467_v46, %v463_v47  ;;  %v434_v54 = vmul.f32 %v432_v53, %v427_v40 }
  0xbc   : > { %v475_v58 = vmul.f32 %v473_v57, %v468_v48 }
 0x118   : > { %v437_v42 = vpop.permute.xlu0 %436 }
 0x119   : > { %v439_v45 = vmul.f32 %v437_v42, %v427_v40 }
 0x11b   : > { %441 = vrot.lane.b32.xlu2 %v439_v45, %s2039_s12 }
 0x120   : > { %v478_v49 = vpop.permute.xlu0 %477 }
 0x121   : > { %v480_v50 = vmul.f32 %v478_v49, %v468_v48 }
 0x123   : > { %482 = vrot.lane.b32.xlu2 %v480_v50, %s2039_s12 }
 0x12b   : > { %508 = vrot.lane.b32.xlu2 %v506_v52, %s2041_s19 }
 0x175   : > { %v442_v55 = vpop.permute.xlu2 %441 }
 0x176   : > { %v2202_v56 = vadd.f32 %v442_v55, %v434_v54 }
 0x178   : > { %1914 = vtanh.f32 %v2202_v56 }
 0x17d   : > { %v483_v59 = vpop.permute.xlu2 %482 }
 0x17e   : > { %v1915_v60 = vpop.eup %1914  ;;  %v2208_v61 = vadd.f32 %v483_v59, %v475_v58 }
 0x17f   : > { %447 = vrot.lane.b32.xlu0 %v1915_v60, %s2040_s13 }
 0x180   : > { %1916 = vtanh.f32 %v2208_v61 }
 0x185   : > { %v509_v11 = vpop.permute.xlu2 %508 }
 0x186   : > { %v1917_v0 = vpop.eup %1916 }
 0x187   : > { %488 = vrot.lane.b32.xlu1 %v1917_v0, %s2040_s13  ;;  %525 = vrot.lane.b32.xlu0 %v523_v63, %s2041_s19 }
 0x1f1   : > { %v448_v4 = vpop.permute.xlu0 %447 }
 0x1f2   : > { %v450_v8 = vmul.f32 %v448_v4, %v427_v40 }
 0x1f4   : > { %v503_v12 = vmul.f32 %v2215_v9, %v450_v8 }
 0x1f6   : > { %v2218_v13 = vadd.f32 %v509_v11, %v503_v12  ;;  %v529_v11 = vmul.f32 %v519_v16, %v2208_v61  ;;  %v512_v61 = vmul.f32 %v2215_v9, %v2202_v56  ;;  %v2273_v9 = vstv %s677_s17 }
 0x1f8   : > { %v549_v14 = vpack.c.bf16 %v2218_v13, %v2218_v13 }
 0x1f9   : > { %v489_v15 = vpop.permute.xlu1 %488  ;;  %v526_v17 = vpop.permute.xlu0 %525 }
 0x1fa   : > { %v491_v7 = vmul.f32 %v489_v15, %v468_v48  ;;  %551 = vrot.lane.b32.xlu1 %v549_v14, %s2039_s12  ;;  %v684_v15 = vstv %s674_s8  ;;  %s2331_s8 = scvt.s32.f32 %s827_s30 }
 0x1fb   : > { %s1147_s30 = scalar_select %p1146_p13, 1, 0 }
 0x1fc   : > { %v520_v18 = vmul.f32 %v519_v16, %v491_v7 }
 0x1fe   : > { %v2226_v19 = vadd.f32 %v526_v17, %v520_v18  ;;  %v687_v18 = vstv %s686_s9  ;;  %s835_s9 = ssub.f32 1.0, %s2331_s8 }
 0x200   : > { %v572_v20 = vpack.c.bf16 %v2226_v19, %v2226_v19 }
 0x202   : > { %574 = vrot.lane.b32.xlu2 %v572_v20, %s2039_s12 }
 0x20a   : > { %515 = vrot.lane.b32.xlu2 %v513_v21, %s2039_s12 }
 0x25c   : > { %v575_v22 = vpop.permute.xlu2 %574 }
 0x25d   : > { %1830 = vmatmul.msk.bf16.vlgmr.msra.gmra.mxu3 %vm360_vm1, %v575_v22 }
 0x25e   : > { %1217 = vmatpush.bf16.msra.mxu3 %v2135_v2 }
 0x262   : > { %1218 = vmatpush.bf16.msra.mxu3 %v2152_v6 }
 0x264   : > { %v516_v4 = vpop.permute.xlu2 %515 }
 0x265   : > { %v2256_v16 = vadd.f32 %v516_v4, %v512_v61 }
 0x26c   : > { %v552_v23 = vpop.permute.xlu1 %551 }
 0x26d   : > { %1828 = vmatmul.msk.bf16.vlgmr.msra.gmra.mxu2 %vm360_vm1, %v552_v23 }
 0x26e   : > { %1194 = vmatpush.bf16.msra.mxu2 %v2130_v1 }
 0x272   : > { %1195 = vmatpush.bf16.msra.mxu2 %v2141_v3 }
 0x2e0   : > { %v588_v25 = vpop.f32.mrf.mxu3 }
 0x2e1   : > { %v592_v5 = vadd.f32 %v1829_v24, %v588_v25 }
 0x2e3   : > { %1918 = vtanh.f32 %v592_v5  ;;  %v1832_v34 = vmul.f32 -1.442695, %v592_v5 }
 0x2e8   : > { %v590_v26 = vpop.f32.mrf.mxu3 }
 0x2e9   : > { %v1919_v27 = vpop.eup %1918 }
 0x2ea   : > { %652 = vrot.lane.b32.xlu1 %v1919_v27, %s2040_s13 }
 0x2f0   : > { %v565_v29 = vpop.f32.mrf.mxu2 }
 0x2f1   : > { %v569_v30 = vadd.f32 %v1827_v28, %v565_v29  ;;  %v688_v29 = vmul.f32 %v687_v18, %v2226_v19 }
 0x2f3   : > { %1920 = vtanh.f32 %v569_v30  ;;  %v1831_v37 = vmul.f32 -1.442695, %v569_v30 }
 0x2f4   : > { %1922 = vpow2.f32 %v1832_v34  ;;  %v675_v34 = vstv %s2270_s16  ;;  %s2383_s16 = scvt.s32.f32 %s989_s14 }
 0x2f5   : > { %s1143_s14 = scalar_select %p1142_p0, 1, 0 }
 0x2f6   : > { %s1002_s17 = ssub.f32 1.0, %s2383_s16 }
 0x2f8   : > { %v567_v31 = vpop.f32.mrf.mxu2 }
 0x2f9   : > { %v1921_v32 = vpop.eup %1920 }
 0x2fa   : > { %615 = vrot.lane.b32.xlu0 %v1921_v32, %s2040_s13  ;;  %v1923_v35 = vpop.eup %1922 }
 0x2fb   : > { %v633_v36 = vadd.f32 1.0, %v1923_v35  ;;  %v679_v35 = vmul.f32 %v2273_v9, %v2218_v13 }
 0x2fd   : > { %1924 = vrcp.f32 %v633_v36  ;;  %v645_v10 = vand.u32 2147483648, %v633_v36  ;;  %vm639_vm11 = vweird.f32 %v633_v36  ;;  %v643_v46 = vand.u32 2147483647, %v633_v36 }
 0x2fe   : > { %1926 = vpow2.f32 %v1831_v37 }
 0x2ff   : > { %v646_v49 = vor.u32 1.1754944e-38, %v645_v10  ;;  %vm644_vm13 = vcmp.eq.f32.partialorder %v643_v46, 8.507059e+37  ;;  %v1835_v10 = vld [vmem:[%s2109_s11 + $0x10] sm:$0xff] }
 0x302   : > { %532 = vrot.lane.b32.xlu0 %v530_v33, %s2039_s12 }
 0x303   : > { %v1925_v38 = vpop.eup %1924 }
 0x304   : > { %v1927_v39 = vpop.eup %1926  ;;  %v635_v40 = vmul.f32 %v1925_v38, %v633_v36  ;;  %vm640_vm10 = vweird.f32 %v1925_v38 }
 0x305   : > { %v596_v41 = vadd.f32 1.0, %v1927_v39  ;;  %vm641_vm12 = vmor %vm639_vm11, %vm640_vm10 }
 0x306   : > { %v636_v42 = vsub.f32 1.0, %v635_v40 }
 0x307   : > { %1928 = vrcp.f32 %v596_v41  ;;  %v608_v57 = vand.u32 2147483648, %v596_v41  ;;  %vm602_vm15 = vweird.f32 %v596_v41  ;;  %v606_v58 = vand.u32 2147483647, %v596_v41 }
 0x308   : > { %v637_v43 = vmul.f32 %v1925_v38, %v636_v42 }
 0x309   : > { %v609_v60 = vor.u32 1.1754944e-38, %v608_v57  ;;  %vm607_vm2 = vcmp.eq.f32.partialorder %v606_v58, 8.507059e+37 }
 0x30a   : > { %v638_v44 = vadd.f32 %v1925_v38, %v637_v43 }
 0x30c   : > { %v642_v47 = vsel %vm641_vm12, %v1925_v38, %v638_v44 }
 0x30d   : > { %v1929_v45 = vpop.eup %1928  ;;  %v647_v51 = vsel %vm644_vm13, %v646_v49, %v642_v47 }
 0x30e   : > { %v598_v48 = vmul.f32 %v1929_v45, %v596_v41  ;;  %vm603_vm14 = vweird.f32 %v1929_v45  ;;  %v1837_v41 = vld [vmem:[%s2114_s15 + $0x28] sm:$0xff] }
 0x30f   : > { %vm604_vm0 = vmor %vm602_vm15, %vm603_vm14 }
 0x310   : > { %v599_v53 = vsub.f32 1.0, %v598_v48 }
 0x312   : > { %v600_v54 = vmul.f32 %v1929_v45, %v599_v53 }
 0x314   : > { %v601_v55 = vadd.f32 %v1929_v45, %v600_v54 }
 0x316   : > { %v605_v59 = vsel %vm604_vm0, %v1929_v45, %v601_v55 }
 0x317   : > { %v610_v62 = vsel %vm607_vm2, %v609_v60, %v605_v59 }
 0x318   : > { %v613_v24 = vmul.f32 %v610_v62, %v2256_v16 }
 0x35c   : > { %v653_v50 = vpop.permute.xlu1 %652 }
 0x35d   : > { %v655_v52 = vmul.f32 %v653_v50, %v647_v51 }
 0x35f   : > { %657 = vrot.lane.b32.xlu2 %v655_v52, %s2039_s12 }
 0x36c   : > { %v616_v63 = vpop.permute.xlu0 %615 }
 0x36d   : > { %v618_v0 = vmul.f32 %v616_v63, %v610_v62 }
 0x36f   : > { %620 = vrot.lane.b32.xlu1 %v618_v0, %s2039_s12 }
 0x374   : > { %v533_v8 = vpop.permute.xlu0 %532 }
 0x375   : > { %v535_v12 = vadd.f32 %v533_v8, %v529_v11 }
 0x377   : > { %v650_v14 = vmul.f32 %v647_v51, %v535_v12  ;;  %v691_v20 = vmul.f32 %v687_v18, %v535_v12 }
 0x3b9   : > { %v658_v7 = vpop.permute.xlu2 %657 }
 0x3ba   : > { %v660_v17 = vadd.f32 %v658_v7, %v650_v14 }
 0x3bc   : > { %1930 = vtanh.f32 %v660_v17  ;;  %v690_v21 = vmul.f32 %v684_v15, %v660_v17 }
 0x3be   : > { %v2251_v22 = vadd.f32 %v691_v20, %v690_v21 }
 0x3c2   : > { %v1931_v23 = vpop.eup %1930 }
 0x3c3   : > { %663 = vrot.lane.b32.xlu1 %v1931_v23, %s2040_s13 }
 0x3e1   : > { %v621_v25 = vpop.permute.xlu1 %620 }
 0x3e2   : > { %v2259_v5 = vadd.f32 %v621_v25, %v613_v24 }
 0x3e4   : > { %1932 = vtanh.f32 %v2259_v5 }
 0x3ea   : > { %v1933_v26 = vpop.eup %1932 }
 0x3eb   : > { %626 = vrot.lane.b32.xlu0 %v1933_v26, %s2040_s13 }
 0x435   : > { %v664_v27 = vpop.permute.xlu1 %663 }
 0x436   : > { %v666_v28 = vmul.f32 %v664_v27, %v647_v51 }
 0x438   : > { %v685_v30 = vmul.f32 %v684_v15, %v666_v28 }
 0x43a   : > { %v2264_v31 = vadd.f32 %v688_v29, %v685_v30 }
 0x43c   : > { %v730_v56 = vpack.c.bf16 %v2264_v31, %v2264_v31 }
 0x43e   : > { %732 = vrot.lane.b32.xlu0 %v730_v56, %s2039_s12 }
 0x45d   : > { %v627_v32 = vpop.permute.xlu0 %626 }
 0x45e   : > { %v629_v33 = vmul.f32 %v627_v32, %v610_v62  ;;  %v681_v32 = vmul.f32 %v675_v34, %v2259_v5 }
 0x460   : > { %v676_v36 = vmul.f32 %v675_v34, %v629_v33  ;;  %v682_v33 = vmul.f32 %v2273_v9, %v2256_v16  ;;  %v842_v9 = vstv %s2315_s23  ;;  %v2320_v34 = vstv %s844_s27  ;;  %s2399_s23 = scvt.s32.f32 %s985_s22 }
 0x461   : > { %s1305_s22 = scalar_select %p1304_p1, 1, 0 }
 0x462   : > { %v2280_v37 = vadd.f32 %v679_v35, %v676_v36  ;;  %v2307_v35 = vadd.f32 %v682_v33, %v681_v32  ;;  %s993_s27 = ssub.f32 1.0, %s2399_s23 }
 0x464   : > { %v707_v38 = vpack.c.bf16 %v2280_v37, %v2280_v37 }
 0x466   : > { %709 = vrot.lane.b32.xlu2 %v707_v38, %s2039_s12 }
 0x4b0   : > { %v733_v39 = vpop.permute.xlu0 %732 }
 0x4b1   : > { %1838 = vmatmul.msk.bf16.vlgmr.msrb.gmra.mxu1 %vm360_vm1, %v733_v39 }
 0x4b2   : > { %1375 = vmatpush.bf16.msrb.mxu1 %v2135_v2 }
 0x4b6   : > { %1376 = vmatpush.bf16.msrb.mxu1 %v2152_v6 }
 0x4c0   : > { %v710_v40 = vpop.permute.xlu2 %709 }
 0x4c1   : > { %1836 = vmatmul.msk.bf16.vlgmr.msrb.gmra.mxu0 %vm360_vm1, %v710_v40 }
 0x4c2   : > { %1352 = vmatpush.bf16.msrb.mxu0 %v2130_v1 }
 0x4c6   : > { %1353 = vmatpush.bf16.msrb.mxu0 %v2141_v3 }
 0x52e   : > { %v746_v42 = vpop.f32.mrf.mxu1 }
 0x52f   : > { %v750_v43 = vadd.f32 %v1837_v41, %v746_v42  ;;  %v846_v41 = vmul.f32 %v2320_v34, %v2264_v31 }
 0x531   : > { %1934 = vtanh.f32 %v750_v43  ;;  %v1840_v50 = vmul.f32 -1.442695, %v750_v43 }
 0x536   : > { %v748_v44 = vpop.f32.mrf.mxu1 }
 0x537   : > { %v1935_v45 = vpop.eup %1934 }
 0x538   : > { %810 = vrot.lane.b32.xlu2 %v1935_v45, %s2040_s13 }
 0x53e   : > { %v723_v46 = vpop.f32.mrf.mxu0 }
 0x53f   : > { %v727_v47 = vadd.f32 %v1835_v10, %v723_v46  ;;  %v833_v46 = vstv %s2331_s8  ;;  %s2447_s8 = scvt.s32.f32 %s1147_s30 }
 0x540   : > { %s1301_s30 = scalar_select %p1300_p2, 1, 0 }
 0x541   : > { %1936 = vtanh.f32 %v727_v47  ;;  %v1839_v60 = vmul.f32 -1.442695, %v727_v47  ;;  %v2335_v47 = vstv %s835_s9  ;;  %s1160_s9 = ssub.f32 1.0, %s2447_s8 }
 0x542   : > { %1938 = vpow2.f32 %v1840_v50 }
 0x546   : > { %v725_v48 = vpop.f32.mrf.mxu0 }
 0x547   : > { %v1937_v49 = vpop.eup %1936  ;;  %v837_v48 = vmul.f32 %v2335_v47, %v2280_v37 }
 0x548   : > { %773 = vrot.lane.b32.xlu1 %v1937_v49, %s2040_s13  ;;  %v1939_v51 = vpop.eup %1938 }
 0x549   : > { %v791_v52 = vadd.f32 1.0, %v1939_v51 }
 0x54b   : > { %1940 = vrcp.f32 %v791_v52  ;;  %v803_v59 = vand.u32 2147483648, %v791_v52  ;;  %vm797_vm4 = vweird.f32 %v791_v52  ;;  %v801_v62 = vand.u32 2147483647, %v791_v52 }
 0x54c   : > { %1942 = vpow2.f32 %v1839_v60  ;;  %v1843_v60 = vld [vmem:[%s2109_s11 + $0x18] sm:$0xff] }
 0x54d   : > { %v804_v0 = vor.u32 1.1754944e-38, %v803_v59  ;;  %vm802_vm6 = vcmp.eq.f32.partialorder %v801_v62, 8.507059e+37 }
 0x551   : > { %v1941_v53 = vpop.eup %1940 }
 0x552   : > { %v793_v54 = vmul.f32 %v1941_v53, %v791_v52  ;;  %vm798_vm3 = vweird.f32 %v1941_v53  ;;  %v1943_v12 = vpop.eup %1942 }
 0x553   : > { %vm799_vm5 = vmor %vm797_vm4, %vm798_vm3  ;;  %v754_v14 = vadd.f32 1.0, %v1943_v12 }
 0x554   : > { %v794_v55 = vsub.f32 1.0, %v793_v54  ;;  %v1845_v54 = vld [vmem:[%s2114_s15 + $0x20] sm:$0xff] }
 0x555   : > { %1944 = vrcp.f32 %v754_v14  ;;  %v766_v21 = vand.u32 2147483648, %v754_v14  ;;  %vm760_vm8 = vweird.f32 %v754_v14  ;;  %v764_v23 = vand.u32 2147483647, %v754_v14 }
 0x556   : > { %v795_v57 = vmul.f32 %v1941_v53, %v794_v55 }
 0x557   : > { %v767_v24 = vor.u32 1.1754944e-38, %v766_v21  ;;  %vm765_vm10 = vcmp.eq.f32.partialorder %v764_v23, 8.507059e+37 }
 0x558   : > { %v796_v58 = vadd.f32 %v1941_v53, %v795_v57 }
 0x55a   : > { %v800_v63 = vsel %vm799_vm5, %v1941_v53, %v796_v58 }
 0x55b   : > { %v805_v8 = vsel %vm802_vm6, %v804_v0, %v800_v63  ;;  %v1945_v15 = vpop.eup %1944 }
 0x55c   : > { %v756_v7 = vmul.f32 %v1945_v15, %v754_v14  ;;  %vm761_vm7 = vweird.f32 %v1945_v15  ;;  %v808_v28 = vmul.f32 %v805_v8, %v2251_v22 }
 0x55d   : > { %vm762_vm9 = vmor %vm760_vm8, %vm761_vm7 }
 0x55e   : > { %v757_v17 = vsub.f32 1.0, %v756_v7 }
 0x560   : > { %v758_v18 = vmul.f32 %v1945_v15, %v757_v17 }
 0x562   : > { %v759_v20 = vadd.f32 %v1945_v15, %v758_v18 }
 0x564   : > { %v763_v61 = vsel %vm762_vm9, %v1945_v15, %v759_v20 }
 0x565   : > { %v768_v26 = vsel %vm765_vm10, %v767_v24, %v763_v61 }
 0x566   : > { %v771_v36 = vmul.f32 %v768_v26, %v2307_v35 }
 0x592   : > { %v811_v4 = vpop.permute.xlu2 %810 }
 0x593   : > { %v813_v11 = vmul.f32 %v811_v4, %v805_v8 }
 0x595   : > { %815 = vrot.lane.b32.xlu1 %v813_v11, %s2039_s12 }
 0x5ba   : > { %v774_v25 = vpop.permute.xlu1 %773 }
 0x5bb   : > { %v776_v27 = vmul.f32 %v774_v25, %v768_v26 }
 0x5bd   : > { %778 = vrot.lane.b32.xlu0 %v776_v27, %s2039_s12 }
 0x607   : > { %v816_v29 = vpop.permute.xlu1 %815 }
 0x608   : > { %v2298_v30 = vadd.f32 %v816_v29, %v808_v28 }
 0x60a   : > { %1946 = vtanh.f32 %v2298_v30 }
 0x610   : > { %v1947_v56 = vpop.eup %1946 }
 0x611   : > { %821 = vrot.lane.b32.xlu0 %v1947_v56, %s2040_s13 }
 0x62f   : > { %v779_v38 = vpop.permute.xlu0 %778 }
 0x630   : > { %v2310_v39 = vadd.f32 %v779_v38, %v771_v36 }
 0x632   : > { %1948 = vtanh.f32 %v2310_v39 }
 0x638   : > { %v1949_v40 = vpop.eup %1948 }
 0x639   : > { %784 = vrot.lane.b32.xlu2 %v1949_v40, %s2040_s13 }
 0x683   : > { %v822_v16 = vpop.permute.xlu0 %821 }
 0x684   : > { %v824_v5 = vmul.f32 %v822_v16, %v805_v8 }
 0x686   : > { %v843_v42 = vmul.f32 %v842_v9, %v824_v5 }
 0x688   : > { %v2326_v43 = vadd.f32 %v846_v41, %v843_v42  ;;  %v848_v41 = vmul.f32 %v842_v9, %v2298_v30  ;;  %v849_v42 = vmul.f32 %v2320_v34, %v2251_v22  ;;  %v840_v30 = vmul.f32 %v2335_v47, %v2307_v35 }
 0x689   : > { %v2387_v47 = vstv %s1002_s17 }
 0x68a   : > { %v888_v44 = vpack.c.bf16 %v2326_v43, %v2326_v43 }
 0x68c   : > { %890 = vrot.lane.b32.xlu2 %v888_v44, %s2039_s12  ;;  %v2363_v44 = vadd.f32 %v849_v42, %v848_v41 }
 0x693   : > { %v785_v45 = vpop.permute.xlu2 %784 }
 0x694   : > { %v787_v10 = vmul.f32 %v785_v45, %v768_v26 }
 0x696   : > { %v834_v49 = vmul.f32 %v833_v46, %v787_v10 }
 0x698   : > { %v2341_v50 = vadd.f32 %v837_v48, %v834_v49 }
 0x69a   : > { %v865_v51 = vpack.c.bf16 %v2341_v50, %v2341_v50 }
 0x69c   : > { %867 = vrot.lane.b32.xlu1 %v865_v51, %s2039_s12  ;;  %v839_v51 = vmul.f32 %v833_v46, %v2310_v39  ;;  %v1000_v46 = vstv %s2383_s16  ;;  %s2463_s16 = scvt.s32.f32 %s1143_s14 }
 0x69d   : > { %s1463_s14 = scalar_select %p1462_p3, 1, 0 }
 0x69e   : > { %v2375_v22 = vadd.f32 %v840_v30, %v839_v51  ;;  %s1151_s17 = ssub.f32 1.0, %s2463_s16 }
 0x6e6   : > { %v891_v52 = vpop.permute.xlu2 %890 }
 0x6e7   : > { %1846 = vmatmul.msk.bf16.vlgmr.msrb.gmra.mxu3 %vm360_vm1, %v891_v52 }
 0x6e8   : > { %1532 = vmatpush.bf16.msrb.mxu3 %v2135_v2 }
 0x6ec   : > { %1533 = vmatpush.bf16.msrb.mxu3 %v2152_v6 }
 0x70e   : > { %v868_v53 = vpop.permute.xlu1 %867 }
 0x70f   : > { %1844 = vmatmul.msk.bf16.vlgmr.msrb.gmra.mxu2 %vm360_vm1, %v868_v53 }
 0x710   : > { %1510 = vmatpush.bf16.msrb.mxu2 %v2130_v1 }
 0x714   : > { %1511 = vmatpush.bf16.msrb.mxu2 %v2141_v3 }
 0x76a   : > { %v904_v55 = vpop.f32.mrf.mxu3 }
 0x76b   : > { %v908_v57 = vadd.f32 %v1845_v54, %v904_v55  ;;  %v1004_v54 = vmul.f32 %v2387_v47, %v2326_v43 }
 0x76d   : > { %1950 = vtanh.f32 %v908_v57  ;;  %v1848_v0 = vmul.f32 -1.442695, %v908_v57 }
 0x772   : > { %v906_v58 = vpop.f32.mrf.mxu3 }
 0x773   : > { %v1951_v59 = vpop.eup %1950 }
 0x774   : > { %968 = vrot.lane.b32.xlu1 %v1951_v59, %s2040_s13 }
 0x792   : > { %v881_v62 = vpop.f32.mrf.mxu2 }
 0x793   : > { %v885_v2 = vadd.f32 %v1843_v60, %v881_v62  ;;  %v991_v62 = vstv %s2399_s23  ;;  %s2511_s23 = scvt.s32.f32 %s1305_s22 }
 0x794   : > { %s1459_s22 = scalar_select %p1458_p5, 1, 0 }
 0x795   : > { %1952 = vtanh.f32 %v885_v2  ;;  %v1847_v7 = vmul.f32 -1.442695, %v885_v2  ;;  %v2403_v2 = vstv %s993_s27  ;;  %s1318_s27 = ssub.f32 1.0, %s2511_s23 }
 0x796   : > { %1954 = vpow2.f32 %v1848_v0 }
 0x79a   : > { %v883_v6 = vpop.f32.mrf.mxu2 }
 0x79b   : > { %v1953_v63 = vpop.eup %1952  ;;  %v995_v6 = vmul.f32 %v2403_v2, %v2341_v50 }
 0x79c   : > { %931 = vrot.lane.b32.xlu0 %v1953_v63, %s2040_s13  ;;  %v1955_v1 = vpop.eup %1954 }
 0x79d   : > { %v949_v3 = vadd.f32 1.0, %v1955_v1 }
 0x79f   : > { %1956 = vrcp.f32 %v949_v3  ;;  %v961_v15 = vand.u32 2147483648, %v949_v3  ;;  %vm955_vm12 = vweird.f32 %v949_v3  ;;  %v959_v17 = vand.u32 2147483647, %v949_v3 }
 0x7a0   : > { %1958 = vpow2.f32 %v1847_v7  ;;  %v1851_v7 = vld [vmem:[%s2109_s11 + $0x20] sm:$0xff] }
 0x7a1   : > { %v962_v20 = vor.u32 1.1754944e-38, %v961_v15  ;;  %vm960_vm14 = vcmp.eq.f32.partialorder %v959_v17, 8.507059e+37 }
 0x7a5   : > { %v1957_v4 = vpop.eup %1956 }
 0x7a6   : > { %v951_v8 = vmul.f32 %v1957_v4, %v949_v3  ;;  %vm956_vm11 = vweird.f32 %v1957_v4  ;;  %v1959_v24 = vpop.eup %1958 }
 0x7a7   : > { %vm957_vm13 = vmor %vm955_vm12, %vm956_vm11  ;;  %v912_v25 = vadd.f32 1.0, %v1959_v24 }
 0x7a8   : > { %v952_v11 = vsub.f32 1.0, %v951_v8  ;;  %v1853_v8 = vld [vmem:[%s2114_s15 + $0x18] sm:$0xff] }
 0x7a9   : > { %1960 = vrcp.f32 %v912_v25  ;;  %v924_v32 = vand.u32 2147483648, %v912_v25  ;;  %vm918_vm0 = vweird.f32 %v912_v25  ;;  %v922_v33 = vand.u32 2147483647, %v912_v25 }
 0x7aa   : > { %v953_v12 = vmul.f32 %v1957_v4, %v952_v11 }
 0x7ab   : > { %v925_v38 = vor.u32 1.1754944e-38, %v924_v32  ;;  %vm923_vm3 = vcmp.eq.f32.partialorder %v922_v33, 8.507059e+37 }
 0x7ac   : > { %v954_v14 = vadd.f32 %v1957_v4, %v953_v12 }
 0x7ae   : > { %v958_v18 = vsel %vm957_vm13, %v1957_v4, %v954_v14 }
 0x7af   : > { %v963_v23 = vsel %vm960_vm14, %v962_v20, %v958_v18  ;;  %v1961_v26 = vpop.eup %1960 }
 0x7b0   : > { %v914_v27 = vmul.f32 %v1961_v26, %v912_v25  ;;  %vm919_vm15 = vweird.f32 %v1961_v26  ;;  %v966_v45 = vmul.f32 %v963_v23, %v2363_v44 }
 0x7b1   : > { %vm920_vm2 = vmor %vm918_vm0, %vm919_vm15 }
 0x7b2   : > { %v915_v28 = vsub.f32 1.0, %v914_v27 }
 0x7b4   : > { %v916_v29 = vmul.f32 %v1961_v26, %v915_v28 }
 0x7b6   : > { %v917_v56 = vadd.f32 %v1961_v26, %v916_v29 }
 0x7b8   : > { %v921_v36 = vsel %vm920_vm2, %v1961_v26, %v917_v56 }
 0x7b9   : > { %v926_v16 = vsel %vm923_vm3, %v925_v38, %v921_v36 }
 0x7ba   : > { %v929_v9 = vmul.f32 %v926_v16, %v2375_v22 }
 0x7e6   : > { %v969_v21 = vpop.permute.xlu1 %968 }
 0x7e7   : > { %v971_v61 = vmul.f32 %v969_v21, %v963_v23 }
 0x7e9   : > { %973 = vrot.lane.b32.xlu0 %v971_v61, %s2039_s12 }
 0x80e   : > { %v932_v40 = vpop.permute.xlu0 %931 }
 0x80f   : > { %v934_v5 = vmul.f32 %v932_v40, %v926_v16 }
 0x811   : > { %936 = vrot.lane.b32.xlu2 %v934_v5, %s2039_s12 }
 0x85b   : > { %v974_v10 = vpop.permute.xlu0 %973 }
 0x85c   : > { %v2366_v48 = vadd.f32 %v974_v10, %v966_v45 }
 0x85e   : > { %1962 = vtanh.f32 %v2366_v48 }
 0x864   : > { %v1963_v49 = vpop.eup %1962 }
 0x865   : > { %979 = vrot.lane.b32.xlu2 %v1963_v49, %s2040_s13 }
 0x86b   : > { %v937_v34 = vpop.permute.xlu2 %936 }
 0x86c   : > { %v2378_v52 = vadd.f32 %v937_v34, %v929_v9 }
 0x86e   : > { %1964 = vtanh.f32 %v2378_v52 }
 0x874   : > { %v1965_v53 = vpop.eup %1964 }
 0x875   : > { %942 = vrot.lane.b32.xlu1 %v1965_v53, %s2040_s13 }
 0x8bf   : > { %v980_v35 = vpop.permute.xlu2 %979 }
 0x8c0   : > { %v982_v39 = vmul.f32 %v980_v35, %v963_v23 }
 0x8c2   : > { %v1001_v55 = vmul.f32 %v1000_v46, %v982_v39 }
 0x8c4   : > { %v2393_v57 = vadd.f32 %v1004_v54, %v1001_v55 }
 0x8c6   : > { %v1046_v58 = vpack.c.bf16 %v2393_v57, %v2393_v57 }
 0x8c8   : > { %1048 = vrot.lane.b32.xlu1 %v1046_v58, %s2039_s12  ;;  %v1006_v58 = vmul.f32 %v1000_v46, %v2366_v48  ;;  %v998_v48 = vmul.f32 %v2403_v2, %v2375_v22  ;;  %v2451_v2 = vstv %s1160_s9 }
 0x8e7   : > { %v943_v59 = vpop.permute.xlu1 %942 }
 0x8e8   : > { %v945_v60 = vmul.f32 %v943_v59, %v926_v16  ;;  %v1007_v59 = vmul.f32 %v2387_v47, %v2363_v44 }
 0x8ea   : > { %v992_v63 = vmul.f32 %v991_v62, %v945_v60  ;;  %v2427_v60 = vadd.f32 %v1007_v59, %v1006_v58 }
 0x8ec   : > { %v2409_v0 = vadd.f32 %v995_v6, %v992_v63 }
 0x8ee   : > { %v1023_v1 = vpack.c.bf16 %v2409_v0, %v2409_v0 }
 0x8f0   : > { %1025 = vrot.lane.b32.xlu0 %v1023_v1, %s2039_s12 }
 0x93a   : > { %v1049_v3 = vpop.permute.xlu1 %1048 }
 0x93b   : > { %1854 = vmatmul.msk.bf16.vlgmr.msra.gmra.mxu1 %vm360_vm1, %v1049_v3 }
 0x962   : > { %v1026_v4 = vpop.permute.xlu0 %1025 }
 0x963   : > { %1852 = vmatmul.msk.bf16.vlgmr.msra.gmra.mxu0 %vm360_vm1, %v1026_v4  ;;  %v997_v4 = vmul.f32 %v991_v62, %v2378_v52  ;;  %v1158_v62 = vstv %s2447_s8  ;;  %s2527_s8 = scvt.s32.f32 %s1301_s30 }
 0x965   : > { %v2439_v44 = vadd.f32 %v998_v48, %v997_v4  ;;  %s1309_s9 = ssub.f32 1.0, %s2527_s8 }
 0x9b8   : > { %v1062_v11 = vpop.f32.mrf.mxu1 }
 0x9b9   : > { %v1066_v12 = vadd.f32 %v1853_v8, %v1062_v11 }
 0x9bb   : > { %1966 = vtanh.f32 %v1066_v12  ;;  %v1856_v23 = vmul.f32 -1.442695, %v1066_v12  ;;  %v1162_v12 = vmul.f32 %v2451_v2, %v2393_v57 }
 0x9c0   : > { %v1064_v14 = vpop.f32.mrf.mxu1 }
 0x9c1   : > { %v1967_v15 = vpop.eup %1966 }
 0x9c2   : > { %1126 = vrot.lane.b32.xlu0 %v1967_v15, %s2040_s13 }
 0x9e0   : > { %v1039_v17 = vpop.f32.mrf.mxu0 }
 0x9e1   : > { %v1043_v18 = vadd.f32 %v1851_v7, %v1039_v17 }
 0x9e3   : > { %1968 = vtanh.f32 %v1043_v18  ;;  %v1855_v25 = vmul.f32 -1.442695, %v1043_v18 }
 0x9e4   : > { %1970 = vpow2.f32 %v1856_v23 }
 0x9e8   : > { %v1041_v20 = vpop.f32.mrf.mxu0 }
 0x9e9   : > { %v1969_v21 = vpop.eup %1968  ;;  %v1149_v20 = vstv %s2463_s16  ;;  %s2575_s16 = scvt.s32.f32 %s1463_s14 }
 0x9ea   : > { %1089 = vrot.lane.b32.xlu2 %v1969_v21, %s2040_s13  ;;  %v1971_v61 = vpop.eup %1970  ;;  %v2467_v21 = vstv %s1151_s17 }
 0x9eb   : > { %v1107_v24 = vadd.f32 1.0, %v1971_v61  ;;  %v1153_v23 = vmul.f32 %v2467_v21, %v2409_v0  ;;  %s1476_s17 = ssub.f32 1.0, %s2575_s16 }
 0x9ed   : > { %1972 = vrcp.f32 %v1107_v24  ;;  %v1119_v38 = vand.u32 2147483648, %v1107_v24  ;;  %vm1113_vm5 = vweird.f32 %v1107_v24  ;;  %v1117_v40 = vand.u32 2147483647, %v1107_v24 }
 0x9ee   : > { %1974 = vpow2.f32 %v1855_v25 }
 0x9ef   : > { %v1120_v41 = vor.u32 1.1754944e-38, %v1119_v38  ;;  %vm1118_vm7 = vcmp.eq.f32.partialorder %v1117_v40, 8.507059e+37 }
 0x9f3   : > { %v1973_v26 = vpop.eup %1972 }
 0x9f4   : > { %v1975_v27 = vpop.eup %1974  ;;  %v1109_v28 = vmul.f32 %v1973_v26, %v1107_v24  ;;  %vm1114_vm4 = vweird.f32 %v1973_v26 }
 0x9f5   : > { %v1070_v29 = vadd.f32 1.0, %v1975_v27  ;;  %vm1115_vm6 = vmor %vm1113_vm5, %vm1114_vm4 }
 0x9f6   : > { %v1110_v56 = vsub.f32 1.0, %v1109_v28  ;;  %v1861_v28 = vld [vmem:[%s2114_s15 + $0x10] sm:$0xff] }
 0x9f7   : > { %1976 = vrcp.f32 %v1070_v29  ;;  %v1082_v9 = vand.u32 2147483648, %v1070_v29  ;;  %vm1076_vm9 = vweird.f32 %v1070_v29  ;;  %v1080_v34 = vand.u32 2147483647, %v1070_v29 }
 0x9f8   : > { %v1111_v32 = vmul.f32 %v1973_v26, %v1110_v56 }
 0x9f9   : > { %v1083_v35 = vor.u32 1.1754944e-38, %v1082_v9  ;;  %vm1081_vm11 = vcmp.eq.f32.partialorder %v1080_v34, 8.507059e+37 }
 0x9fa   : > { %v1112_v33 = vadd.f32 %v1973_v26, %v1111_v32 }
 0x9fc   : > { %v1116_v16 = vsel %vm1115_vm6, %v1973_v26, %v1112_v33 }
 0x9fd   : > { %v1977_v36 = vpop.eup %1976  ;;  %v1121_v45 = vsel %vm1118_vm7, %v1120_v41, %v1116_v16 }
 0x9fe   : > { %v1072_v5 = vmul.f32 %v1977_v36, %v1070_v29  ;;  %vm1077_vm8 = vweird.f32 %v1977_v36  ;;  %v1124_v6 = vmul.f32 %v1121_v45, %v2427_v60 }
 0x9ff   : > { %vm1078_vm10 = vmor %vm1076_vm9, %vm1077_vm8 }
 0xa00   : > { %v1073_v49 = vsub.f32 1.0, %v1072_v5 }
 0xa02   : > { %v1074_v51 = vmul.f32 %v1977_v36, %v1073_v49 }
 0xa04   : > { %v1075_v30 = vadd.f32 %v1977_v36, %v1074_v51 }
 0xa06   : > { %v1079_v53 = vsel %vm1078_vm10, %v1977_v36, %v1075_v30  ;;  %v1859_v36 = vld [vmem:[%s2109_s11 + $0x28] sm:$0xff] }
 0xa07   : > { %v1084_v54 = vsel %vm1081_vm11, %v1083_v35, %v1079_v53 }
 0xa08   : > { %v1087_v46 = vmul.f32 %v1084_v54, %v2439_v44 }
 0xa34   : > { %v1127_v42 = vpop.permute.xlu0 %1126 }
 0xa35   : > { %v1129_v10 = vmul.f32 %v1127_v42, %v1121_v45 }
 0xa37   : > { %1131 = vrot.lane.b32.xlu2 %v1129_v10, %s2039_s12 }
 0xa44   : > { %v1090_v39 = vpop.permute.xlu2 %1089 }
 0xa45   : > { %v1092_v55 = vmul.f32 %v1090_v39, %v1084_v54 }
 0xa47   : > { %1094 = vrot.lane.b32.xlu1 %v1092_v55, %s2039_s12 }
 0xa91   : > { %v1132_v63 = vpop.permute.xlu2 %1131 }
 0xa92   : > { %v2430_v1 = vadd.f32 %v1132_v63, %v1124_v6 }
 0xa94   : > { %1978 = vtanh.f32 %v2430_v1 }
 0xa9a   : > { %v1979_v3 = vpop.eup %1978 }
 0xa9b   : > { %1137 = vrot.lane.b32.xlu1 %v1979_v3, %s2040_s13 }
 0xab9   : > { %v1095_v47 = vpop.permute.xlu1 %1094 }
 0xaba   : > { %v2442_v8 = vadd.f32 %v1095_v47, %v1087_v46 }
 0xabc   : > { %1980 = vtanh.f32 %v2442_v8 }
 0xac2   : > { %v1981_v11 = vpop.eup %1980 }
 0xac3   : > { %1100 = vrot.lane.b32.xlu0 %v1981_v11, %s2040_s13 }
 0xb0d   : > { %v1138_v22 = vpop.permute.xlu1 %1137 }
 0xb0e   : > { %v1140_v52 = vmul.f32 %v1138_v22, %v1121_v45 }
 0xb10   : > { %v1159_v14 = vmul.f32 %v1158_v62, %v1140_v52 }
 0xb12   : > { %v2457_v15 = vadd.f32 %v1162_v12, %v1159_v14 }
 0xb14   : > { %v1204_v7 = vpack.c.bf16 %v2457_v15, %v2457_v15 }
 0xb16   : > { %1206 = vrot.lane.b32.xlu0 %v1204_v7, %s2039_s12 }
 0xb35   : > { %v1101_v17 = vpop.permute.xlu0 %1100 }
 0xb36   : > { %v1103_v18 = vmul.f32 %v1101_v17, %v1084_v54 }
 0xb38   : > { %v1150_v61 = vmul.f32 %v1149_v20, %v1103_v18  ;;  %v1164_v18 = vmul.f32 %v1158_v62, %v2430_v1  ;;  %v1155_v1 = vmul.f32 %v1149_v20, %v2442_v8  ;;  %v1316_v20 = vstv %s2511_s23  ;;  %s2591_s23 = scvt.s32.f32 %s1459_s22 }
 0xb3a   : > { %v2473_v24 = vadd.f32 %v1153_v23, %v1150_v61  ;;  %v1165_v23 = vmul.f32 %v2451_v2, %v2427_v60  ;;  %v1156_v60 = vmul.f32 %v2467_v21, %v2439_v44  ;;  %v2516_v21 = vstv %s1318_s27  ;;  %s1467_s27 = ssub.f32 1.0, %s2591_s23 }
 0xb3c   : > { %v1181_v25 = vpack.c.bf16 %v2473_v24, %v2473_v24  ;;  %v2491_v61 = vadd.f32 %v1165_v23, %v1164_v18  ;;  %v2503_v62 = vadd.f32 %v1156_v60, %v1155_v1 }
 0xb3e   : > { %1183 = vrot.lane.b32.xlu2 %v1181_v25, %s2039_s12 }
 0xb88   : > { %v1207_v26 = vpop.permute.xlu0 %1206 }
 0xb89   : > { %1862 = vmatmul.msk.bf16.vlgmr.msra.gmra.mxu3 %vm360_vm1, %v1207_v26 }
 0xb98   : > { %v1184_v27 = vpop.permute.xlu2 %1183 }
 0xb99   : > { %1860 = vmatmul.msk.bf16.vlgmr.msra.gmra.mxu2 %vm360_vm1, %v1184_v27 }
 0xc0c   : > { %v1220_v29 = vpop.f32.mrf.mxu3 }
 0xc0d   : > { %v1224_v56 = vadd.f32 %v1861_v28, %v1220_v29 }
 0xc0f   : > { %1982 = vtanh.f32 %v1224_v56  ;;  %v1864_v41 = vmul.f32 -1.442695, %v1224_v56 }
 0xc14   : > { %v1222_v32 = vpop.f32.mrf.mxu3 }
 0xc15   : > { %v1983_v33 = vpop.eup %1982 }
 0xc16   : > { %1284 = vrot.lane.b32.xlu2 %v1983_v33, %s2040_s13  ;;  %v1320_v33 = vmul.f32 %v2516_v21, %v2457_v15 }
 0xc1c   : > { %v1197_v38 = vpop.f32.mrf.mxu2 }
 0xc1d   : > { %v1201_v40 = vadd.f32 %v1859_v36, %v1197_v38 }
 0xc1f   : > { %1984 = vtanh.f32 %v1201_v40  ;;  %v1863_v53 = vmul.f32 -1.442695, %v1201_v40 }
 0xc20   : > { %1986 = vpow2.f32 %v1864_v41  ;;  %v1307_v41 = vstv %s2527_s8 }
 0xc24   : > { %v1199_v16 = vpop.f32.mrf.mxu2 }
 0xc25   : > { %v1985_v5 = vpop.eup %1984 }
 0xc26   : > { %1247 = vrot.lane.b32.xlu1 %v1985_v5, %s2040_s13  ;;  %v1987_v42 = vpop.eup %1986 }
 0xc27   : > { %v1265_v45 = vadd.f32 1.0, %v1987_v42  ;;  %v2531_v42 = vstv %s1309_s9 }
 0xc29   : > { %1988 = vrcp.f32 %v1265_v45  ;;  %v1277_v34 = vand.u32 2147483648, %v1265_v45  ;;  %vm1271_vm13 = vweird.f32 %v1265_v45  ;;  %v1275_v35 = vand.u32 2147483647, %v1265_v45 }
 0xc2a   : > { %1990 = vpow2.f32 %v1863_v53 }
 0xc2b   : > { %v1278_v54 = vor.u32 1.1754944e-38, %v1277_v34  ;;  %vm1276_vm15 = vcmp.eq.f32.partialorder %v1275_v35, 8.507059e+37  ;;  %v1869_v34 = vld [vmem:[%s2114_s15 + $0x8] sm:$0xff] }
 0xc2f   : > { %v1989_v10 = vpop.eup %1988 }
 0xc30   : > { %v1267_v49 = vmul.f32 %v1989_v10, %v1265_v45  ;;  %vm1272_vm12 = vweird.f32 %v1989_v10  ;;  %v1991_v6 = vpop.eup %1990  ;;  %v1311_v45 = vmul.f32 %v2531_v42, %v2473_v24 }
 0xc31   : > { %vm1273_vm14 = vmor %vm1271_vm13, %vm1272_vm12  ;;  %v1228_v63 = vadd.f32 1.0, %v1991_v6 }
 0xc32   : > { %v1268_v51 = vsub.f32 1.0, %v1267_v49 }
 0xc33   : > { %1992 = vrcp.f32 %v1228_v63  ;;  %v1240_v11 = vand.u32 2147483648, %v1228_v63  ;;  %vm1234_vm2 = vweird.f32 %v1228_v63  ;;  %v1238_v22 = vand.u32 2147483647, %v1228_v63 }
 0xc34   : > { %v1269_v30 = vmul.f32 %v1989_v10, %v1268_v51 }
 0xc35   : > { %v1241_v12 = vor.u32 1.1754944e-38, %v1240_v11  ;;  %vm1239_vm4 = vcmp.eq.f32.partialorder %v1238_v22, 8.507059e+37 }
 0xc36   : > { %v1270_v9 = vadd.f32 %v1989_v10, %v1269_v30 }
 0xc38   : > { %v1274_v39 = vsel %vm1273_vm14, %v1989_v10, %v1270_v9 }
 0xc39   : > { %v1279_v58 = vsel %vm1276_vm15, %v1278_v54, %v1274_v39  ;;  %v1993_v3 = vpop.eup %1992 }
 0xc3a   : > { %v1230_v4 = vmul.f32 %v1993_v3, %v1228_v63  ;;  %vm1235_vm0 = vweird.f32 %v1993_v3  ;;  %v1282_v25 = vmul.f32 %v1279_v58, %v2491_v61 }
 0xc3b   : > { %vm1236_vm3 = vmor %vm1234_vm2, %vm1235_vm0 }
 0xc3c   : > { %v1231_v48 = vsub.f32 1.0, %v1230_v4 }
 0xc3e   : > { %v1232_v46 = vmul.f32 %v1993_v3, %v1231_v48 }
 0xc40   : > { %v1233_v47 = vadd.f32 %v1993_v3, %v1232_v46 }
 0xc42   : > { %v1237_v52 = vsel %vm1236_vm3, %v1993_v3, %v1233_v47 }
 0xc43   : > { %v1242_v7 = vsel %vm1239_vm4, %v1241_v12, %v1237_v52 }
 0xc44   : > { %v1245_v2 = vmul.f32 %v1242_v7, %v2503_v62 }
 0xc70   : > { %v1285_v55 = vpop.permute.xlu2 %1284 }
 0xc71   : > { %v1287_v59 = vmul.f32 %v1285_v55, %v1279_v58  ;;  %v1867_v55 = vld [vmem:[%s2109_s11 + $0x30] sm:$0xff] }
 0xc73   : > { %1289 = vrot.lane.b32.xlu1 %v1287_v59, %s2039_s12 }
 0xc98   : > { %v1248_v14 = vpop.permute.xlu1 %1247 }
 0xc99   : > { %v1250_v17 = vmul.f32 %v1248_v14, %v1242_v7 }
 0xc9b   : > { %1252 = vrot.lane.b32.xlu0 %v1250_v17, %s2039_s12 }
 0xce5   : > { %v1290_v26 = vpop.permute.xlu1 %1289 }
 0xce6   : > { %v2494_v27 = vadd.f32 %v1290_v26, %v1282_v25 }
 0xce8   : > { %1994 = vtanh.f32 %v2494_v27 }
 0xcee   : > { %v1995_v28 = vpop.eup %1994 }
 0xcef   : > { %1295 = vrot.lane.b32.xlu0 %v1995_v28, %s2040_s13 }
 0xd0d   : > { %v1253_v29 = vpop.permute.xlu0 %1252 }
 0xd0e   : > { %v2506_v56 = vadd.f32 %v1253_v29, %v1245_v2 }
 0xd10   : > { %1996 = vtanh.f32 %v2506_v56 }
 0xd16   : > { %v1997_v32 = vpop.eup %1996 }
 0xd17   : > { %1258 = vrot.lane.b32.xlu2 %v1997_v32, %s2040_s13 }
 0xd61   : > { %v1296_v44 = vpop.permute.xlu0 %1295 }
 0xd62   : > { %v1298_v8 = vmul.f32 %v1296_v44, %v1279_v58 }
 0xd64   : > { %v1317_v36 = vmul.f32 %v1316_v20, %v1298_v8 }
 0xd66   : > { %v2522_v38 = vadd.f32 %v1320_v33, %v1317_v36 }
 0xd68   : > { %v1362_v40 = vpack.c.bf16 %v2522_v38, %v2522_v38 }
 0xd6a   : > { %1364 = vrot.lane.b32.xlu2 %v1362_v40, %s2039_s12 }
 0xd71   : > { %v1259_v16 = vpop.permute.xlu2 %1258 }
 0xd72   : > { %v1261_v5 = vmul.f32 %v1259_v16, %v1242_v7 }
 0xd74   : > { %v1308_v10 = vmul.f32 %v1307_v41, %v1261_v5 }
 0xd76   : > { %v2537_v49 = vadd.f32 %v1311_v45, %v1308_v10  ;;  %v1322_v10 = vmul.f32 %v1316_v20, %v2494_v27  ;;  %v1314_v27 = vmul.f32 %v2531_v42, %v2503_v62  ;;  %v2579_v42 = vstv %s1476_s17 }
 0xd78   : > { %v1339_v51 = vpack.c.bf16 %v2537_v49, %v2537_v49 }
 0xd7a   : > { %1341 = vrot.lane.b32.xlu1 %v1339_v51, %s2039_s12  ;;  %v1323_v51 = vmul.f32 %v2516_v21, %v2491_v61 }
 0xdc4   : > { %v1365_v30 = vpop.permute.xlu2 %1364 }
 0xdc5   : > { %1870 = vmatmul.msk.bf16.vlgmr.msrb.gmra.mxu1 %vm360_vm1, %v1365_v30  ;;  %v2555_v30 = vadd.f32 %v1323_v51, %v1322_v10 }
 0xdec   : > { %v1342_v9 = vpop.permute.xlu1 %1341 }
 0xded   : > { %1868 = vmatmul.msk.bf16.vlgmr.msrb.gmra.mxu0 %vm360_vm1, %v1342_v9 }
 0xe42   : > { %v1378_v53 = vpop.f32.mrf.mxu1 }
 0xe43   : > { %v1382_v35 = vadd.f32 %v1869_v34, %v1378_v53 }
 0xe45   : > { %1998 = vtanh.f32 %v1382_v35  ;;  %v1872_v3 = vmul.f32 -1.442695, %v1382_v35 }
 0xe4a   : > { %v1380_v39 = vpop.f32.mrf.mxu1 }
 0xe4b   : > { %v1999_v54 = vpop.eup %1998  ;;  %v1313_v39 = vmul.f32 %v1307_v41, %v2506_v56  ;;  %v1474_v41 = vstv %s2575_s16 }
 0xe4c   : > { %1442 = vrot.lane.b32.xlu1 %v1999_v54, %s2040_s13 }
 0xe4d   : > { %v2567_v61 = vadd.f32 %v1314_v27, %v1313_v39 }
 0xe6a   : > { %v1355_v58 = vpop.f32.mrf.mxu0 }
 0xe6b   : > { %v1359_v59 = vadd.f32 %v1867_v55, %v1355_v58  ;;  %v1478_v58 = vmul.f32 %v2579_v42, %v2522_v38 }
 0xe6d   : > { %2000 = vtanh.f32 %v1359_v59  ;;  %v1871_v14 = vmul.f32 -1.442695, %v1359_v59 }
 0xe6e   : > { %2002 = vpow2.f32 %v1872_v3 }
 0xe72   : > { %v1357_v6 = vpop.f32.mrf.mxu0 }
 0xe73   : > { %v2001_v63 = vpop.eup %2000 }
 0xe74   : > { %1405 = vrot.lane.b32.xlu0 %v2001_v63, %s2040_s13  ;;  %v2003_v4 = vpop.eup %2002 }
 0xe75   : > { %v1423_v48 = vadd.f32 1.0, %v2003_v4 }
 0xe77   : > { %2004 = vrcp.f32 %v1423_v48  ;;  %v1435_v12 = vand.u32 2147483648, %v1423_v48  ;;  %vm1429_vm6 = vweird.f32 %v1423_v48  ;;  %v1433_v7 = vand.u32 2147483647, %v1423_v48 }
 0xe78   : > { %2006 = vpow2.f32 %v1871_v14 }
 0xe79   : > { %v1436_v18 = vor.u32 1.1754944e-38, %v1435_v12  ;;  %vm1434_vm8 = vcmp.eq.f32.partialorder %v1433_v7, 8.507059e+37  ;;  %v1518_v7 = vld [vmem:[%s2114_s15] sm:$0xff] }
 0xe7d   : > { %v2005_v46 = vpop.eup %2004 }
 0xe7e   : > { %v1425_v47 = vmul.f32 %v2005_v46, %v1423_v48  ;;  %vm1430_vm5 = vweird.f32 %v2005_v46  ;;  %v2007_v28 = vpop.eup %2006  ;;  %v1465_v48 = vstv %s2591_s23 }
 0xe7f   : > { %vm1431_vm7 = vmor %vm1429_vm6, %vm1430_vm5  ;;  %v1386_v1 = vadd.f32 1.0, %v2007_v28 }
 0xe80   : > { %v1426_v11 = vsub.f32 1.0, %v1425_v47 }
 0xe81   : > { %2008 = vrcp.f32 %v1386_v1  ;;  %v1398_v8 = vand.u32 2147483648, %v1386_v1  ;;  %vm1392_vm10 = vweird.f32 %v1386_v1  ;;  %v1396_v33 = vand.u32 2147483647, %v1386_v1 }
 0xe82   : > { %v1427_v22 = vmul.f32 %v2005_v46, %v1426_v11 }
 0xe83   : > { %v1399_v40 = vor.u32 1.1754944e-38, %v1398_v8  ;;  %vm1397_vm12 = vcmp.eq.f32.partialorder %v1396_v33, 8.507059e+37 }
 0xe84   : > { %v1428_v52 = vadd.f32 %v2005_v46, %v1427_v22 }
 0xe86   : > { %v1432_v17 = vsel %vm1431_vm7, %v2005_v46, %v1428_v52  ;;  %v2595_v46 = vstv %s1467_s27 }
 0xe87   : > { %v1437_v25 = vsel %vm1434_vm8, %v1436_v18, %v1432_v17  ;;  %v2009_v60 = vpop.eup %2008  ;;  %v1469_v47 = vmul.f32 %v2595_v46, %v2537_v49 }
 0xe88   : > { %v1388_v2 = vmul.f32 %v2009_v60, %v1386_v1  ;;  %vm1393_vm9 = vweird.f32 %v2009_v60  ;;  %v1440_v9 = vmul.f32 %v1437_v25, %v2555_v30 }
 0xe89   : > { %vm1394_vm11 = vmor %vm1392_vm10, %vm1393_vm9 }
 0xe8a   : > { %v1389_v29 = vsub.f32 1.0, %v1388_v2 }
 0xe8c   : > { %v1390_v32 = vmul.f32 %v2009_v60, %v1389_v29 }
 0xe8e   : > { %v1391_v44 = vadd.f32 %v2009_v60, %v1390_v32 }
 0xe90   : > { %v1395_v36 = vsel %vm1394_vm11, %v2009_v60, %v1391_v44 }
 0xe91   : > { %v1400_v5 = vsel %vm1397_vm12, %v1399_v40, %v1395_v36 }
 0xe92   : > { %v1403_v20 = vmul.f32 %v1400_v5, %v2567_v61 }
 0xebe   : > { %v1443_v23 = vpop.permute.xlu1 %1442 }
 0xebf   : > { %v1445_v26 = vmul.f32 %v1443_v23, %v1437_v25 }
 0xec1   : > { %1447 = vrot.lane.b32.xlu0 %v1445_v26, %s2039_s12  ;;  %v1875_v26 = vld [vmem:[%s2109_s11 + $0x38] sm:$0xff]  ;;  %s1614_s11 = sadd.s32 7, %s2093_s26 }
 0xec2   : > { %p1615_p6 = scmp.lt.s32.totalorder %s1614_s11, 15 }
 0xec3   : > { %s1619_s26 = scalar_select %p304_p4, 1, 0 }
 0xec4   : > { %s1616_s15 = scalar_select %p1615_p6, 1, 0 }
 0xec5   : > { %p1881_p4 = scmp.ne.s32.totalorder %s2088_s25, 1 }
 0xec6   : > { %s1617_s29 = scvt.s32.f32 %s1616_s15 }
 0xec8   : > { %s1623_s30 = ssub.f32 1.0, %s1617_s29 }
 0xee6   : > { %v1406_v16 = vpop.permute.xlu0 %1405 }
 0xee7   : > { %v1408_v45 = vmul.f32 %v1406_v16, %v1400_v5 }
 0xee9   : > { %1410 = vrot.lane.b32.xlu2 %v1408_v45, %s2039_s12 }
 0xf33   : > { %v1448_v34 = vpop.permute.xlu0 %1447 }
 0xf34   : > { %v2558_v53 = vadd.f32 %v1448_v34, %v1440_v9 }
 0xf36   : > { %2010 = vtanh.f32 %v2558_v53 }
 0xf3c   : > { %v2011_v35 = vpop.eup %2010 }
 0xf3d   : > { %1453 = vrot.lane.b32.xlu2 %v2011_v35, %s2040_s13 }
 0xf43   : > { %v1411_v21 = vpop.permute.xlu2 %1410 }
 0xf44   : > { %v2570_v54 = vadd.f32 %v1411_v21, %v1403_v20 }
 0xf46   : > { %2012 = vtanh.f32 %v2570_v54 }
 0xf4c   : > { %v2013_v55 = vpop.eup %2012 }
 0xf4d   : > { %1416 = vrot.lane.b32.xlu1 %v2013_v55, %s2040_s13 }
 0xf97   : > { %v1454_v62 = vpop.permute.xlu2 %1453 }
 0xf98   : > { %v1456_v56 = vmul.f32 %v1454_v62, %v1437_v25 }
 0xf9a   : > { %v1475_v59 = vmul.f32 %v1474_v41, %v1456_v56 }
 0xf9c   : > { %v2585_v6 = vadd.f32 %v1478_v58, %v1475_v59 }
 0xf9e   : > { %v1519_v63 = vpack.c.bf16 %v2585_v6, %v2585_v6 }
 0xfa0   : > { %1521 = vrot.lane.b32.xlu1 %v1519_v63, %s2039_s12 }
 0xfbf   : > { %v1417_v3 = vpop.permute.xlu1 %1416 }
 0xfc0   : > { %v1419_v4 = vmul.f32 %v1417_v3, %v1400_v5 }
 0xfc2   : > { %v1466_v11 = vmul.f32 %v1465_v48, %v1419_v4 }
 0xfc4   : > { %v2601_v22 = vadd.f32 %v1469_v47, %v1466_v11 }
 0xfc6   : > { %v1497_v52 = vpack.c.bf16 %v2601_v22, %v2601_v22 }
 0xfc8   : > { %1499 = vrot.lane.b32.xlu0 %v1497_v52, %s2039_s12 }
0x1012   : > { %v1522_v12 = vpop.permute.xlu1 %1521 }
0x1013   : > { %1877 = vmatmul.msk.bf16.vlgmr.msrb.gmra.mxu3 %vm360_vm1, %v1522_v12  ;;  %v1481_v12 = vmul.f32 %v2579_v42, %v2555_v30  ;;  %v1471_v42 = vmul.f32 %v1465_v48, %v2570_v54 }
0x103a   : > { %v1500_v14 = vpop.permute.xlu0 %1499 }
0x103b   : > { %1876 = vmatmul.msk.bf16.vlgmr.msrb.gmra.mxu2 %vm360_vm1, %v1500_v14 }
0x1096   : > { %v1535_v17 = vpop.f32.mrf.mxu3 }
0x1097   : > { %v1539_v18 = vadd.f32 %v1535_v17, %v1518_v7 }
0x1099   : > { %2014 = vtanh.f32 %v1539_v18  ;;  %v1879_v29 = vmul.f32 -1.442695, %v1539_v18  ;;  %v1472_v18 = vmul.f32 %v2595_v46, %v2567_v61 }
0x109e   : > { %v1537_v23 = vpop.f32.mrf.mxu3 }
0x109f   : > { %v2015_v25 = vpop.eup %2014 }
0x10a0   : > { %1599 = vrot.lane.b32.xlu0 %v2015_v25, %s2040_s13 }
0x10be   : > { %v1513_v28 = vpop.f32.mrf.mxu2 }
0x10bf   : > { %v1517_v1 = vadd.f32 %v1875_v26, %v1513_v28 }
0x10c1   : > { %2016 = vtanh.f32 %v1517_v1  ;;  %v1878_v8 = vmul.f32 -1.442695, %v1517_v1 }
0x10c2   : > { %2018 = vpow2.f32 %v1879_v29 }
0x10c6   : > { %v1515_v60 = vpop.f32.mrf.mxu2 }
0x10c7   : > { %v2017_v2 = vpop.eup %2016 }
0x10c8   : > { %1562 = vrot.lane.b32.xlu2 %v2017_v2, %s2040_s13  ;;  %v2019_v32 = vpop.eup %2018 }
0x10c9   : > { %v1580_v44 = vadd.f32 1.0, %v2019_v32 }
0x10cb   : > { %2020 = vrcp.f32 %v1580_v44  ;;  %v1592_v9 = vand.u32 2147483648, %v1580_v44  ;;  %vm1586_vm14 = vweird.f32 %v1580_v44  ;;  %v1590_v34 = vand.u32 2147483647, %v1580_v44 }
0x10cc   : > { %2022 = vpow2.f32 %v1878_v8 }
0x10cd   : > { %v1593_v27 = vor.u32 1.1754944e-38, %v1592_v9  ;;  %vm1591_vm0 = vcmp.eq.f32.partialorder %v1590_v34, 8.507059e+37 }
0x10d1   : > { %v2021_v33 = vpop.eup %2020 }
0x10d2   : > { %v2023_v36 = vpop.eup %2022  ;;  %v1582_v40 = vmul.f32 %v2021_v33, %v1580_v44  ;;  %vm1587_vm13 = vweird.f32 %v2021_v33 }
0x10d3   : > { %v1543_v16 = vadd.f32 1.0, %v2023_v36  ;;  %vm1588_vm15 = vmor %vm1586_vm14, %vm1587_vm13 }
0x10d4   : > { %v1583_v5 = vsub.f32 1.0, %v1582_v40 }
0x10d5   : > { %2024 = vrcp.f32 %v1543_v16  ;;  %v1555_v59 = vand.u32 2147483648, %v1543_v16  ;;  %vm1549_vm3 = vweird.f32 %v1543_v16  ;;  %v1553_v63 = vand.u32 2147483647, %v1543_v16 }
0x10d6   : > { %v1584_v45 = vmul.f32 %v2021_v33, %v1583_v5 }
0x10d7   : > { %v1556_v4 = vor.u32 1.1754944e-38, %v1555_v59  ;;  %vm1554_vm5 = vcmp.eq.f32.partialorder %v1553_v63, 8.507059e+37 }
0x10d8   : > { %v1585_v10 = vadd.f32 %v2021_v33, %v1584_v45 }
0x10da   : > { %v1589_v35 = vsel %vm1588_vm15, %v2021_v33, %v1585_v10 }
0x10db   : > { %v2025_v51 = vpop.eup %2024  ;;  %v2612_v21 = vsel %vm1591_vm0, %v1593_v27, %v1589_v35 }
0x10dc   : > { %v1545_v39 = vmul.f32 %v2025_v51, %v1543_v16  ;;  %vm1550_vm2 = vweird.f32 %v2025_v51 }
0x10dd   : > { %vm1551_vm4 = vmor %vm1549_vm3, %vm1550_vm2 }
0x10de   : > { %v1546_v62 = vsub.f32 1.0, %v1545_v39 }
0x10e0   : > { %v1547_v56 = vmul.f32 %v2025_v51, %v1546_v62 }
0x10e2   : > { %v1548_v58 = vadd.f32 %v2025_v51, %v1547_v56 }
0x10e4   : > { %v1552_v3 = vsel %vm1551_vm4, %v2025_v51, %v1548_v58 }
0x10e5   : > { %v2618_v11 = vsel %vm1554_vm5, %v1556_v4, %v1552_v3 }
0x1112   : > { %v1600_v20 = vpop.permute.xlu0 %1599 }
0x1113   : > { %v1602_v55 = vmul.f32 %v1600_v20, %v2612_v21 }
0x1115   : > { %1604 = vrot.lane.b32.xlu2 %v1602_v55, %s2039_s12 }
0x111d   : > { %537 = vrot.lane.b32.xlu2 %v2218_v13, %s2039_s12  ;;  %v1480_v13 = vmul.f32 %v1474_v41, %v2558_v53 }
0x111f   : > { %v2635_v14 = vadd.f32 %v1481_v12, %v1480_v13 }
0x1122   : > { %v1563_v47 = vpop.permute.xlu2 %1562 }
0x1123   : > { %v1565_v52 = vmul.f32 %v1563_v47, %v2618_v11 }
0x1125   : > { %1567 = vrot.lane.b32.xlu1 %v1565_v52, %s2039_s12  ;;  %700 = vrot.lane.b32.xlu2 %v2264_v31, %s2039_s12  ;;  %v1597_v31 = vmul.f32 %v2612_v21, %v2635_v14 }
0x112d   : > { %1010 = vrot.lane.b32.xlu2 %v2409_v0, %s2039_s12 }
0x1135   : > { %1174 = vrot.lane.b32.xlu2 %v2457_v15, %s2039_s12 }
0x113d   : > { %1484 = vrot.lane.b32.xlu2 %v2601_v22, %s2039_s12 }
0x116f   : > { %v1605_v0 = vpop.permute.xlu2 %1604 }
0x1170   : > { %v2639_v7 = vadd.f32 %v1605_v0, %v1597_v31 }
0x1172   : > { %2026 = vtanh.f32 %v2639_v7 }
0x1177   : > { %v538_v15 = vpop.permute.xlu2 %537 }
0x1178   : > { %v2027_v17 = vpop.eup %2026  ;;  %540 = vst.msk [vmem:[%s2119_s18] sm:$0xff] %vm360_vm1, %v538_v15 }
0x1179   : > { %1610 = vrot.lane.b32.xlu1 %v2027_v17, %s2040_s13 }
0x117f   : > { %v701_v30 = vpop.permute.xlu2 %700 }
0x1180   : > { %1834 = vst.msk [vmem:[%s2124_s21 + $0x30] sm:$0xff] %vm360_vm1, %v701_v30 }
0x1181   : > { %694 = vrot.lane.b32.xlu1 %v2280_v37, %s2039_s12  ;;  %v1473_v37 = vadd.f32 %v1472_v18, %v1471_v42 }
0x1183   : > { %v1560_v23 = vmul.f32 %v2618_v11, %v1473_v37 }
0x1187   : > { %v1011_v53 = vpop.permute.xlu2 %1010 }
0x1188   : > { %1849 = vst.msk [vmem:[%s2119_s18 + $0x18] sm:$0xff] %vm360_vm1, %v1011_v53 }
0x1189   : > { %858 = vrot.lane.b32.xlu1 %v2326_v43, %s2039_s12 }
0x118f   : > { %v1175_v41 = vpop.permute.xlu2 %1174 }
0x1190   : > { %1858 = vst.msk [vmem:[%s2124_s21 + $0x18] sm:$0xff] %vm360_vm1, %v1175_v41 }
0x1191   : > { %1168 = vrot.lane.b32.xlu1 %v2473_v24, %s2039_s12  ;;  %v1621_v24 = vstv %s1617_s29 }
0x1197   : > { %v1485_v25 = vpop.permute.xlu2 %1484  ;;  %v1568_v26 = vpop.permute.xlu1 %1567 }
0x1198   : > { %1873 = vst.msk [vmem:[%s2119_s18 + $0x30] sm:$0xff] %vm360_vm1, %v1485_v25  ;;  %v1570_v43 = vadd.f32 %v1568_v26, %v1560_v23 }
0x1199   : > { %1332 = vrot.lane.b32.xlu1 %v2522_v38, %s2039_s12 }
0x119a   : > { %2028 = vtanh.f32 %v1570_v43  ;;  %v1627_v38 = vmul.f32 %v1621_v24, %v1570_v43 }
0x11a0   : > { %v2029_v54 = vpop.eup %2028 }
0x11a1   : > { %1573 = vrot.lane.b32.xlu0 %v2029_v54, %s2040_s13  ;;  %s1620_s13 = scvt.s32.f32 %s1619_s26 }
0x11a3   : > { %s1632_s8 = ssub.f32 1.0, %s1620_s13  ;;  %v1630_v48 = vstv %s1620_s13 }
0x11a4   : > { %v1636_v5 = vmul.f32 %v1630_v48, %v2639_v7 }
0x11a5   : > { %v1633_v46 = vstv %s1632_s8 }
0x11a6   : > { %v1634_v1 = vmul.f32 %v1633_v46, %v2585_v6  ;;  %v1637_v45 = vmul.f32 %v1633_v46, %v2635_v14 }
0x11a8   : > { %v1638_v10 = vadd.f32 %v1637_v45, %v1636_v5 }
0x11a9   : > { %542 = vrot.lane.b32.xlu0 %v2226_v19, %s2039_s12  ;;  %v1624_v19 = vstv %s1623_s30 }
0x11aa   : > { %v1628_v61 = vmul.f32 %v1624_v19, %v1473_v37  ;;  %v1625_v36 = vmul.f32 %v1624_v19, %v2601_v22 }
0x11b1   : > { %852 = vrot.lane.b32.xlu0 %v2341_v50, %s2039_s12  ;;  %v1629_v50 = vadd.f32 %v1628_v61, %v1627_v38 }
0x11b9   : > { %1016 = vrot.lane.b32.xlu0 %v2393_v57, %s2039_s12 }
0x11c1   : > { %1326 = vrot.lane.b32.xlu0 %v2537_v49, %s2039_s12 }
0x11c9   : > { %1490 = vrot.lane.b32.xlu0 %v2585_v6, %s2039_s12 }
0x11d1   : > { %1652 = vrot.lane.b32.xlu0 %v1629_v50, %s2041_s19 }
0x11eb   : > { %v1611_v57 = vpop.permute.xlu1 %1610 }
0x11ec   : > { %v1613_v49 = vmul.f32 %v1611_v57, %v2612_v21 }
0x11ee   : > { %v1631_v28 = vmul.f32 %v1630_v48, %v1613_v49 }
0x11f0   : > { %v1635_v60 = vadd.f32 %v1634_v1, %v1631_v28 }
0x11f2   : > { %1646 = vrot.lane.b32.xlu2 %v1635_v60, %s2039_s12 }
0x11f3   : > { %v695_v2 = vpop.permute.xlu1 %694 }
0x11f4   : > { %1833 = vst.msk [vmem:[%s2119_s18 + $0x8] sm:$0xff] %vm360_vm1, %v695_v2 }
0x11fb   : > { %v859_v29 = vpop.permute.xlu1 %858 }
0x11fc   : > { %1842 = vst.msk [vmem:[%s2124_s21 + $0x28] sm:$0xff] %vm360_vm1, %v859_v29 }
0x1203   : > { %v1169_v32 = vpop.permute.xlu1 %1168 }
0x1204   : > { %1857 = vst.msk [vmem:[%s2119_s18 + $0x20] sm:$0xff] %vm360_vm1, %v1169_v32 }
0x120b   : > { %v1333_v44 = vpop.permute.xlu1 %1332 }
0x120c   : > { %1866 = vst.msk [vmem:[%s2124_s21 + $0x10] sm:$0xff] %vm360_vm1, %v1333_v44 }
0x1213   : > { %v1574_v8 = vpop.permute.xlu0 %1573 }
0x1214   : > { %v1576_v6 = vmul.f32 %v1574_v8, %v2618_v11 }
0x1216   : > { %v1622_v33 = vmul.f32 %v1621_v24, %v1576_v6 }
0x1218   : > { %v1626_v40 = vadd.f32 %v1625_v36, %v1622_v33 }
0x121a   : > { %1640 = vrot.lane.b32.xlu1 %v1626_v40, %s2039_s12 }
0x121b   : > { %v543_v16 = vpop.permute.xlu0 %542 }
0x121c   : > { %1826 = vst.msk [vmem:[%s2124_s21 + $0x38] sm:$0xff] %vm360_vm1, %v543_v16 }
0x1222   : > { %1658 = vrot.lane.b32.xlu1 %v1638_v10, %s2041_s19 }
0x1223   : > { %v853_v51 = vpop.permute.xlu0 %852 }
0x1224   : > { %1841 = vst.msk [vmem:[%s2119_s18 + $0x10] sm:$0xff] %vm360_vm1, %v853_v51 }
0x122b   : > { %v1017_v22 = vpop.permute.xlu0 %1016 }
0x122c   : > { %1850 = vst.msk [vmem:[%s2124_s21 + $0x20] sm:$0xff] %vm360_vm1, %v1017_v22 }
0x1233   : > { %v1327_v9 = vpop.permute.xlu0 %1326 }
0x1234   : > { %1865 = vst.msk [vmem:[%s2119_s18 + $0x28] sm:$0xff] %vm360_vm1, %v1327_v9 }
0x123b   : > { %v1491_v34 = vpop.permute.xlu0 %1490 }
0x123c   : > { %1874 = vst.msk [vmem:[%s2124_s21 + $0x8] sm:$0xff] %vm360_vm1, %v1491_v34 }
0x1243   : > { %v1653_v35 = vpop.permute.xlu0 %1652 }
0x1244   : > { %1655 = vst.msk [vmem:[#allocation3] sm:$0xff] %vm360_vm1, %v1653_v35 }
0x124c   : > { %v1647_v39 = vpop.permute.xlu2 %1646 }
0x124d   : > { %1649 = vst.msk [vmem:[%s2124_s21] sm:$0xff] %vm360_vm1, %v1647_v39 }
0x124e   : > { %1656 = vst.msk [vmem:[#allocation4] sm:$0xff] %vm360_vm1, %v1647_v39 }
0x128c   : > { %v1641_v27 = vpop.permute.xlu1 %1640 }
0x128d   : > { %1880 = vst.msk [vmem:[%s2119_s18 + $0x38] sm:$0xff] %vm360_vm1, %v1641_v27 }
0x128e   : > { %1650 = vst.msk [vmem:[#allocation2] sm:$0xff] %vm360_vm1, %v1641_v27 }
0x1291   : > { %1665 = sbr.rel (%p1881_p4) target bundleno = 4762 (0x129a), region = 44 }
0x1294   : > { %v1659_v20 = vpop.permute.xlu1 %1658 }
0x1295   : > { %1661 = vst.msk [vmem:[#allocation5] sm:$0xff] %vm360_vm1, %v1659_v20 }
0x1296   : > { %1666 = vst.msk [vmem:[%s2743_s6] sm:$0xff] %vm360_vm1, %v1641_v27 }
0x1297   : > { %1882 = vst.msk [vmem:[%s2743_s6 + $0x8] sm:$0xff] %vm360_vm1, %v1647_v39 }
0x1298   : > { %1669 = vst.msk [vmem:[%s2744_s7] sm:$0xff] %vm360_vm1, %v1653_v35 }
0x1299   : > { %1883 = vst.msk [vmem:[%s2744_s7 + $0x8] sm:$0xff] %vm360_vm1, %v1659_v20 }
0x129a PF: > { %s18_s24 = sadd.s32 1, %s2036_s24  }
0x129b   : > { %p15_p7 = scmp.ge.s32.totalorder %s18_s24, 4  }
0x129d   :  { %17 = sbr.rel (!%p15_p7) target bundleno = 1 (0x1), region = 135 }

</bundles_post_ra>
